<compile_context>
chip_gen: v7x
topology: tpu7x:2x2x1
jax: 0.10.0
libtpu: 0.0.40
codegen_flags: <defaults>
</compile_context>

<pallas_src>
import numpy as np
import jax
import jax.numpy as jnp
from jax import lax
from jax.experimental import pallas as pl
from jax.experimental.pallas import tpu as pltpu


def _round_up(x, m):
    return ((x + m - 1) // m) * m


# ----------------------------- Pallas kernels ------------------------------

def _node_pair_kernel(ctx_ref, ner_ref, nm_ref, adj_ref,
                      wre_ref, bre_ref, wt_ref, wb_ref, batt_ref, o_ref):
    # linear_re: h = ctx @ W_re + b_re                             (L, 128)
    h = jnp.dot(ctx_ref[0], wre_ref[...],
                preferred_element_type=jnp.float32) + bre_ref[...]
    nm = nm_ref[0]                                                  # (Nnp, L)
    nf_h = jnp.dot(nm, h, preferred_element_type=jnp.float32)            # (Nnp, 128)
    nf_n = jnp.dot(nm, ner_ref[0], preferred_element_type=jnp.float32)   # (Nnp, 20)
    # att_w split into the 128 "hidden" rows and 20 "ner" rows -> no 148-lane concat.
    xw = (jnp.dot(nf_h, wt_ref[...], preferred_element_type=jnp.float32)
          + jnp.dot(nf_n, wb_ref[...], preferred_element_type=jnp.float32))  # (Nnp, 128)
    # adjacency rows are pre-gathered at the head/tail pair indices:
    #   relu(A_r @ xw + b)[idx] == relu(A_r[idx] @ xw + b)
    prop = jnp.dot(adj_ref[0], xw, preferred_element_type=jnp.float32)   # (2*Rp*Npp, 128)
    act = jnp.maximum(prop + batt_ref[...], 0.0)
    o_ref[...] = act.reshape(o_ref.shape)        # tile-aligned split of the row axis


def pallas_node_pair(ctx, ner_vec, nm_p, adj_pairs, w_re, b_re,
                     w_top, w_bot, b_att, *, Rp, Np_pad, F):
    B, L, D_in = ctx.shape
    Nnp = nm_p.shape[1]
    RN2 = adj_pairs.shape[1]                       # 2 * Rp * Np_pad
    return pl.pallas_call(
        _node_pair_kernel,
        out_shape=jax.ShapeDtypeStruct((2 * Rp, B, Np_pad, F), jnp.float32),
        grid=(B,),
        in_specs=[
            pl.BlockSpec((1, L, D_in), lambda b: (b, 0, 0)),
            pl.BlockSpec((1, L, ner_vec.shape[-1]), lambda b: (b, 0, 0)),
            pl.BlockSpec((1, Nnp, L), lambda b: (b, 0, 0)),
            pl.BlockSpec((1, RN2, Nnp), lambda b: (b, 0, 0)),
            pl.BlockSpec(w_re.shape, lambda b: (0, 0)),
            pl.BlockSpec((1, w_re.shape[1]), lambda b: (0, 0)),
            pl.BlockSpec(w_top.shape, lambda b: (0, 0)),
            pl.BlockSpec(w_bot.shape, lambda b: (0, 0)),
            pl.BlockSpec((1, F), lambda b: (0, 0)),
        ],
        out_specs=pl.BlockSpec((2 * Rp, 1, Np_pad, F), lambda b: (0, b, 0, 0)),
        compiler_params=pltpu.CompilerParams(
            dimension_semantics=("parallel",)),
    )(ctx, ner_vec, nm_p, adj_pairs,
      w_re, b_re.reshape(1, -1), w_top, w_bot, b_att.reshape(1, -1))


def _bili_diag_kernel(pairs_ref, w_ref, b_ref, dh_ref, dt_ref, o_ref):
    # pairs: (2, tr, BNp, F); w: (tr, F, F); b: (tr, 1); dh/dt: (BNp, F)
    head = pairs_ref[0] + dh_ref[...]                              # (tr, BNp, F)
    tail = pairs_ref[1] + dt_ref[...]
    # Stream W_r as 128 LHS rows against the small (F x BNp) stationary tail block.
    u = jnp.einsum('rfg,rng->rfn', w_ref[...], tail,
                   preferred_element_type=jnp.float32)             # (tr, F, BNp)
    hu = jnp.einsum('rnf,rfm->rnm', head, u,
                    preferred_element_type=jnp.float32)            # (tr, BNp, BNp)
    n = hu.shape[-1]
    rows = lax.broadcasted_iota(jnp.int32, (n, n), 0)
    cols = lax.broadcasted_iota(jnp.int32, (n, n), 1)
    eye = (rows == cols).astype(jnp.float32)
    s = jnp.sum(hu * eye, axis=-1)                                 # diagonal -> (tr, BNp)
    o_ref[...] = s + b_ref[...]


def pallas_bilinear_diag(pairs, w, bias, dh, dt, *, tr=8):
    # pairs: (2, Rp, BNp, F); w: (Rp, F, F); bias: (Rp,); dh/dt: (BNp, F)
    _, Rp, BNp, F = pairs.shape
    assert Rp % tr == 0
    nblk = Rp // tr
    return pl.pallas_call(
        _bili_diag_kernel,
        out_shape=jax.ShapeDtypeStruct((Rp, BNp), jnp.float32),
        grid=(nblk,),
        in_specs=[
            pl.BlockSpec((2, tr, BNp, F), lambda j: (0, j, 0, 0)),
            pl.BlockSpec((tr, F, F), lambda j: (j, 0, 0)),     # ~0.5 MB streamed / step
            pl.BlockSpec((tr, 1), lambda j: (j, 0)),
            pl.BlockSpec((BNp, F), lambda j: (0, 0)),
            pl.BlockSpec((BNp, F), lambda j: (0, 0)),
        ],
        out_specs=pl.BlockSpec((tr, BNp), lambda j: (j, 0)),
        compiler_params=pltpu.CompilerParams(
            dimension_semantics=("parallel",)),
    )(pairs, w, bias.reshape(-1, 1), dh, dt)


# ------------------------------ model wrapper -------------------------------

class Config:
    entity_type_size = 20
    dis_size = 20
    relation_num = 97
    data_word_vec = np.zeros((100, 50), np.float32)  # only its shape is used upstream


def init_params(key, cfg):
    hidden = 128
    gat_in = hidden + cfg.entity_type_size          # 148
    gat_out = 108
    bili_in = gat_out + cfg.dis_size                # 128
    ks = jax.random.split(key, 8)

    def rnd(k, shape, scale=0.05):
        return scale * jax.random.normal(k, shape, dtype=jnp.float32)

    return dict(
        linear_re_w=rnd(ks[0], (768, hidden)),
        linear_re_b=rnd(ks[1], (hidden,)),
        ner_emb=rnd(ks[2], (7, cfg.entity_type_size)).at[0].set(0.0),     # padding_idx=0
        att_w=rnd(ks[3], (gat_in, gat_out)),
        att_b=rnd(ks[4], (gat_out,)),
        dis_emb=rnd(ks[5], (20, cfg.dis_size)).at[10].set(0.0),           # padding_idx=10
        bili_w=rnd(ks[6], (cfg.relation_num, bili_in, bili_in)),
        bili_b=rnd(ks[7], (cfg.relation_num,)),
    )


def prepare_params(params, cfg):
    """One-time (outside jit) zero-padding / splitting to TPU-friendly shapes."""
    hidden = 128
    gat_out = params["att_b"].shape[0]               # 108
    F = params["bili_w"].shape[-1]                   # 128
    R = params["bili_w"].shape[0]                    # 97
    Rp = _round_up(R, 8)                             # 104 (sublane multiple, not 128)
    att_w = params["att_w"]                          # (148, 108)
    prep = dict(params)
    prep["att_w_top"] = jnp.pad(att_w[:hidden], ((0, 0), (0, F - gat_out)))   # (128,128)
    prep["att_w_bot"] = jnp.pad(att_w[hidden:], ((0, 0), (0, F - gat_out)))   # (20,128)
    prep["att_b_p"] = jnp.pad(params["att_b"], (0, F - gat_out))              # (128,)
    prep["bili_w_p"] = jnp.pad(params["bili_w"], ((0, Rp - R), (0, 0), (0, 0)))
    prep["bili_b_p"] = jnp.pad(params["bili_b"], (0, Rp - R))
    return prep


def gcn_forward(prep, cfg, context_idxs, context_ner, context_starts,
                context_masks, node_mapping, edge_weight, head_index,
                tail_index, dis_h_2_t, dis_t_2_h, bert_output):
    B, L = context_idxs.shape
    R = cfg.relation_num                        # 97
    Nn = node_mapping.shape[1]
    Np = head_index.shape[1]
    gat_out = prep["att_b"].shape[0]            # 108
    F = prep["bili_w_p"].shape[-1]              # 128
    Rp = prep["bili_w_p"].shape[0]              # 104
    Nnp = _round_up(Nn, 8)
    Np_pad = _round_up(Np, 8)
    BNp = B * Np_pad

    # TODO(synk): frozen BertModel forward has no clean Pallas equivalent here;
    # `bert_output` is a deterministic stand-in for self.bert(...)[0].

    # --- select word-start tokens, pad_sequence(padding_value=-1) + F.pad(0) ---
    nonzero = context_starts != 0
    counts = jnp.sum(nonzero, axis=1)                              # (B,)
    max_count = jnp.max(counts)
    order = jnp.argsort(jnp.where(nonzero, 0, 1), axis=1, stable=True)
    gathered = jnp.take_along_axis(bert_output, order[:, :, None], axis=1)
    posn = jnp.arange(L)[None, :, None]
    ctx = jnp.where(posn < counts[:, None, None], gathered,
                    jnp.where(posn < max_count, -1.0, 0.0))        # (B, L, 768)

    # --- entity type embedding (small XLA gather; consumed un-concatenated) ---
    ner_vec = jnp.take(prep["ner_emb"], context_ner, axis=0)       # (B, L, 20)

    # --- pre-gather adjacency rows at head/tail pair indices (tiny tensors) ---
    ew = jnp.pad(edge_weight, ((0, 0), (0, 0), (0, 0), (0, Nnp - Nn)))   # (B,R,Nn,Nnp)
    hidx = jnp.broadcast_to(head_index[:, None, :, None], (B, R, Np, Nnp))
    tidx = jnp.broadcast_to(tail_index[:, None, :, None], (B, R, Np, Nnp))
    adj_h = jnp.take_along_axis(ew, hidx, axis=2)                        # (B,R,Np,Nnp)
    adj_t = jnp.take_along_axis(ew, tidx, axis=2)
    adj_ht = jnp.stack([adj_h, adj_t], axis=1)                           # (B,2,R,Np,Nnp)
    adj_ht = jnp.pad(adj_ht,
                     ((0, 0), (0, 0), (0, Rp - R), (0, Np_pad - Np), (0, 0)))
    adj_pairs = adj_ht.reshape(B, 2 * Rp * Np_pad, Nnp)

    nm_p = jnp.pad(node_mapping, ((0, 0), (0, Nnp - Nn), (0, 0)))        # (B, Nnp, L)

    # --- fused kernel 1: linear_re -> node features -> GAT-style propagation,
    #     directly producing head/tail pair features for every relation ---
    # TODO(synk): GraphAttentionLayer source was not provided; implemented as
    # per-relation propagation relu(A_r @ X @ W + b), matching downstream shapes.
    pair_rows = pallas_node_pair(ctx, ner_vec, nm_p, adj_pairs,
                                 prep["linear_re_w"], prep["linear_re_b"],
                                 prep["att_w_top"], prep["att_w_bot"],
                                 prep["att_b_p"],
                                 Rp=Rp, Np_pad=Np_pad, F=F)   # (2*Rp, B, Np_pad, F)
    pairs = pair_rows.reshape(2, Rp, BNp, F)                  # contiguous -> free reshape

    # --- distance embeddings placed into the zero lanes [108:128) ---
    ds = prep["dis_emb"].shape[-1]
    dh = jnp.take(prep["dis_emb"], dis_h_2_t, axis=0)          # (B, Np, 20)
    dt = jnp.take(prep["dis_emb"], dis_t_2_h, axis=0)
    dh = jnp.pad(dh, ((0, 0), (0, Np_pad - Np), (gat_out, F - gat_out - ds)))
    dt = jnp.pad(dt, ((0, 0), (0, Np_pad - Np), (gat_out, F - gat_out - ds)))
    dh = dh.reshape(BNp, F)
    dt = dt.reshape(BNp, F)

    # --- fused kernel 2: relation-tiled Bilinear + diagonal ---
    bili = pallas_bilinear_diag(pairs, prep["bili_w_p"], prep["bili_b_p"],
                                dh, dt, tr=8)                  # (Rp, BNp)

    pred = bili[:R].reshape(R, B, Np_pad)[:, :, :Np]           # drop padded rel / pairs
    return jnp.transpose(pred, (1, 2, 0))                      # (B, Np, R)


# ---------------------------------- main -------------------------------------

if __name__ == "__main__":
    cfg = Config()
    key = jax.random.PRNGKey(0)
    kp, kd = jax.random.split(key)
    params = init_params(kp, cfg)
    prep = prepare_params(params, cfg)          # one-time padding, outside jit

    B, L, Nn, Np = 2, 32, 12, 6
    ks = jax.random.split(kd, 10)
    context_idxs = jax.random.randint(ks[0], (B, L), 0, 100)
    context_masks = jnp.ones((B, L), jnp.int32)
    context_ner = jax.random.randint(ks[1], (B, L), 0, 7)
    context_starts = jax.random.bernoulli(ks[2], 0.6, (B, L)).astype(jnp.int32)
    context_starts = context_starts.at[:, 0].set(1)   # ensure non-empty selection
    node_mapping = jax.random.uniform(ks[3], (B, Nn, L), dtype=jnp.float32)
    node_mapping = node_mapping / jnp.sum(node_mapping, -1, keepdims=True)
    edge_weight = jax.random.uniform(ks[4], (B, cfg.relation_num, Nn, Nn),
                                     dtype=jnp.float32)
    edge_weight = edge_weight / jnp.sum(edge_weight, -1, keepdims=True)
    head_index = jax.random.randint(ks[5], (B, Np), 0, Nn)
    tail_index = jax.random.randint(ks[6], (B, Np), 0, Nn)
    dis_h_2_t = jax.random.randint(ks[7], (B, Np), 0, 20)
    dis_t_2_h = jax.random.randint(ks[8], (B, Np), 0, 20)
    bert_output = jax.random.normal(ks[9], (B, L, 768), dtype=jnp.float32)

    fwd = jax.jit(lambda *args: gcn_forward(prep, cfg, *args))
    out = fwd(context_idxs, context_ner, context_starts, context_masks,
              node_mapping, edge_weight, head_index, tail_index,
              dis_h_2_t, dis_t_2_h, bert_output)
    out = jax.block_until_ready(out)
    assert out.shape == (B, Np, cfg.relation_num), out.shape
    assert out.dtype == jnp.float32
    print("KERNEL_OK")
</pallas_src>

<mosaic_0001>
module attributes {stable_mosaic.version = 11 : i64} {
  func.func private @main(%arg0: i32) attributes {dimension_semantics = [#tpu.dimension_semantics<core_parallel>], iteration_bounds = array<i64: 2>, tpu.core_type = #tpu.core_type<sc_scalar_subcore>, window_params = []} {
    return
  }
}

module attributes {stable_mosaic.version = 11 : i64} {
  func.func private @main(%arg0: i32) attributes {dimension_semantics = [#tpu.dimension_semantics<core_parallel>], iteration_bounds = array<i64: 2>, tpu.core_type = #tpu.core_type<sc_scalar_subcore>, window_params = []} {
    return
  }
}

module attributes {stable_mosaic.version = 11 : i64} {
  func.func @_node_pair_kernel(%arg0: i32, %arg1: memref<1x32x768xf32, #tpu.memory_space<vmem>>, %arg2: memref<1x32x20xf32, #tpu.memory_space<vmem>>, %arg3: memref<1x16x32xf32, #tpu.memory_space<vmem>>, %arg4: memref<1x1664x16xf32, #tpu.memory_space<vmem>>, %arg5: memref<768x128xf32, #tpu.memory_space<vmem>>, %arg6: memref<1x128xf32, #tpu.memory_space<vmem>>, %arg7: memref<128x128xf32, #tpu.memory_space<vmem>>, %arg8: memref<20x128xf32, #tpu.memory_space<vmem>>, %arg9: memref<1x128xf32, #tpu.memory_space<vmem>>, %arg10: memref<208x1x8x128xf32, #tpu.memory_space<vmem>>) attributes {dimension_semantics = [#tpu.dimension_semantics<parallel>], iteration_bounds = array<i64: 2>, scalar_prefetch = 0 : i64, scratch_operands = 0 : i64, tpu.core_type = #tpu.core_type<tc>, window_params = [{transform_indices = @transform_0, window_bounds = array<i64: 1, 32, 768>}, {transform_indices = @transform_1, window_bounds = array<i64: 1, 32, 20>}, {transform_indices = @transform_2, window_bounds = array<i64: 1, 16, 32>}, {transform_indices = @transform_3, window_bounds = array<i64: 1, 1664, 16>}, {pipeline_mode = #tpu.pipeline_mode<synchronous>, transform_indices = @transform_4, window_bounds = array<i64: 768, 128>}, {pipeline_mode = #tpu.pipeline_mode<synchronous>, transform_indices = @transform_5, window_bounds = array<i64: 1, 128>}, {pipeline_mode = #tpu.pipeline_mode<synchronous>, transform_indices = @transform_6, window_bounds = array<i64: 128, 128>}, {pipeline_mode = #tpu.pipeline_mode<synchronous>, transform_indices = @transform_7, window_bounds = array<i64: 20, 128>}, {pipeline_mode = #tpu.pipeline_mode<synchronous>, transform_indices = @transform_8, window_bounds = array<i64: 1, 128>}, {transform_indices = @transform_9, window_bounds = array<i64: 208, 1, 8, 128>}]} {
    %c0 = arith.constant 0 : index
    %c0_0 = arith.constant 0 : index
    %c0_1 = arith.constant 0 : index
    %0 = vector.load %arg1[%c0, %c0_0, %c0_1] : memref<1x32x768xf32, #tpu.memory_space<vmem>>, vector<1x32x768xf32>
    %1 = vector.shape_cast %0 : vector<1x32x768xf32> to vector<32x768xf32>
    %c0_2 = arith.constant 0 : index
    %c0_3 = arith.constant 0 : index
    %2 = vector.load %arg5[%c0_2, %c0_3] : memref<768x128xf32, #tpu.memory_space<vmem>>, vector<768x128xf32>
    %cst = arith.constant dense<0.000000e+00> : vector<32x128xf32>
    %3 = tpu.matmul %1, %2, %cst {dimension_numbers = #tpu.dot_dimension_numbers<[1], [0], [0], [1], [0, 0, 1, 1], [], []>} : vector<32x768xf32>, vector<768x128xf32>, vector<32x128xf32> -> vector<32x128xf32>
    %c0_4 = arith.constant 0 : index
    %c0_5 = arith.constant 0 : index
    %4 = vector.load %arg6[%c0_4, %c0_5] : memref<1x128xf32, #tpu.memory_space<vmem>>, vector<1x128xf32>
    %5 = vector.broadcast %4 : vector<1x128xf32> to vector<32x128xf32>
    %6 = arith.addf %3, %5 : vector<32x128xf32>
    %c0_6 = arith.constant 0 : index
    %c0_7 = arith.constant 0 : index
    %c0_8 = arith.constant 0 : index
    %7 = vector.load %arg3[%c0_6, %c0_7, %c0_8] : memref<1x16x32xf32, #tpu.memory_space<vmem>>, vector<1x16x32xf32>
    %8 = vector.shape_cast %7 : vector<1x16x32xf32> to vector<16x32xf32>
    %cst_9 = arith.constant dense<0.000000e+00> : vector<16x128xf32>
    %9 = tpu.matmul %8, %6, %cst_9 {dimension_numbers = #tpu.dot_dimension_numbers<[1], [0], [0], [1], [0, 0, 1, 1], [], []>} : vector<16x32xf32>, vector<32x128xf32>, vector<16x128xf32> -> vector<16x128xf32>
    %c0_10 = arith.constant 0 : index
    %c0_11 = arith.constant 0 : index
    %c0_12 = arith.constant 0 : index
    %10 = vector.load %arg2[%c0_10, %c0_11, %c0_12] : memref<1x32x20xf32, #tpu.memory_space<vmem>>, vector<1x32x20xf32>
    %11 = vector.shape_cast %10 : vector<1x32x20xf32> to vector<32x20xf32>
    %cst_13 = arith.constant dense<0.000000e+00> : vector<16x20xf32>
    %12 = tpu.matmul %8, %11, %cst_13 {dimension_numbers = #tpu.dot_dimension_numbers<[1], [0], [0], [1], [0, 0, 1, 1], [], []>} : vector<16x32xf32>, vector<32x20xf32>, vector<16x20xf32> -> vector<16x20xf32>
    %c0_14 = arith.constant 0 : index
    %c0_15 = arith.constant 0 : index
    %13 = vector.load %arg7[%c0_14, %c0_15] : memref<128x128xf32, #tpu.memory_space<vmem>>, vector<128x128xf32>
    %cst_16 = arith.constant dense<0.000000e+00> : vector<16x128xf32>
    %14 = tpu.matmul %9, %13, %cst_16 {dimension_numbers = #tpu.dot_dimension_numbers<[1], [0], [0], [1], [0, 0, 1, 1], [], []>} : vector<16x128xf32>, vector<128x128xf32>, vector<16x128xf32> -> vector<16x128xf32>
    %c0_17 = arith.constant 0 : index
    %c0_18 = arith.constant 0 : index
    %15 = vector.load %arg8[%c0_17, %c0_18] : memref<20x128xf32, #tpu.memory_space<vmem>>, vector<20x128xf32>
    %cst_19 = arith.constant dense<0.000000e+00> : vector<16x128xf32>
    %16 = tpu.matmul %12, %15, %cst_19 {dimension_numbers = #tpu.dot_dimension_numbers<[1], [0], [0], [1], [0, 0, 1, 1], [], []>} : vector<16x20xf32>, vector<20x128xf32>, vector<16x128xf32> -> vector<16x128xf32>
    %17 = arith.addf %14, %16 : vector<16x128xf32>
    %c0_20 = arith.constant 0 : index
    %c0_21 = arith.constant 0 : index
    %c0_22 = arith.constant 0 : index
    %18 = vector.load %arg4[%c0_20, %c0_21, %c0_22] : memref<1x1664x16xf32, #tpu.memory_space<vmem>>, vector<1x1664x16xf32>
    %19 = vector.shape_cast %18 : vector<1x1664x16xf32> to vector<1664x16xf32>
    %cst_23 = arith.constant dense<0.000000e+00> : vector<1664x128xf32>
    %20 = tpu.matmul %19, %17, %cst_23 {dimension_numbers = #tpu.dot_dimension_numbers<[1], [0], [0], [1], [0, 0, 1, 1], [], []>} : vector<1664x16xf32>, vector<16x128xf32>, vector<1664x128xf32> -> vector<1664x128xf32>
    %c0_24 = arith.constant 0 : index
    %c0_25 = arith.constant 0 : index
    %21 = vector.load %arg9[%c0_24, %c0_25] : memref<1x128xf32, #tpu.memory_space<vmem>>, vector<1x128xf32>
    %22 = vector.broadcast %21 : vector<1x128xf32> to vector<1664x128xf32>
    %23 = arith.addf %20, %22 : vector<1664x128xf32>
    %cst_26 = arith.constant 0.000000e+00 : f32
    %24 = vector.broadcast %cst_26 : f32 to vector<1664x128xf32>
    %25 = arith.maximumf %23, %24 : vector<1664x128xf32>
    %26 = vector.shape_cast %25 : vector<1664x128xf32> to vector<208x1x8x128xf32>
    %c0_27 = arith.constant 0 : index
    %c0_28 = arith.constant 0 : index
    %c0_29 = arith.constant 0 : index
    %c0_30 = arith.constant 0 : index
    %27 = vector.load %arg10[%c0_27, %c0_28, %c0_29, %c0_30] : memref<208x1x8x128xf32, #tpu.memory_space<vmem>>, vector<208x1x8x128xf32>
    tpu.vector_store %arg10[%c0_27, %c0_28, %c0_29, %c0_30], %26 {strides = array<i32>} : memref<208x1x8x128xf32, #tpu.memory_space<vmem>>, vector<208x1x8x128xf32>,
    return
  }
  func.func @transform_0(%arg0: i32) -> (i32, i32, i32) {
    %c0_i32 = arith.constant 0 : i32
    %c0_i32_0 = arith.constant 0 : i32
    %c0_i32_1 = arith.constant 0 : i32
    return %arg0, %c0_i32, %c0_i32_0 : i32, i32, i32
  }
  func.func @transform_1(%arg0: i32) -> (i32, i32, i32) {
    %c0_i32 = arith.constant 0 : i32
    %c0_i32_0 = arith.constant 0 : i32
    %c0_i32_1 = arith.constant 0 : i32
    return %arg0, %c0_i32, %c0_i32_0 : i32, i32, i32
  }
  func.func @transform_2(%arg0: i32) -> (i32, i32, i32) {
    %c0_i32 = arith.constant 0 : i32
    %c0_i32_0 = arith.constant 0 : i32
    %c0_i32_1 = arith.constant 0 : i32
    return %arg0, %c0_i32, %c0_i32_0 : i32, i32, i32
  }
  func.func @transform_3(%arg0: i32) -> (i32, i32, i32) {
    %c0_i32 = arith.constant 0 : i32
    %c0_i32_0 = arith.constant 0 : i32
    %c0_i32_1 = arith.constant 0 : i32
    return %arg0, %c0_i32, %c0_i32_0 : i32, i32, i32
  }
  func.func @transform_4(%arg0: i32) -> (i32, i32) {
    %c0_i32 = arith.constant 0 : i32
    %c0_i32_0 = arith.constant 0 : i32
    %c0_i32_1 = arith.constant 0 : i32
    return %c0_i32, %c0_i32_0 : i32, i32
  }
  func.func @transform_5(%arg0: i32) -> (i32, i32) {
    %c0_i32 = arith.constant 0 : i32
    %c0_i32_0 = arith.constant 0 : i32
    %c0_i32_1 = arith.constant 0 : i32
    return %c0_i32, %c0_i32_0 : i32, i32
  }
  func.func @transform_6(%arg0: i32) -> (i32, i32) {
    %c0_i32 = arith.constant 0 : i32
    %c0_i32_0 = arith.constant 0 : i32
    %c0_i32_1 = arith.constant 0 : i32
    return %c0_i32, %c0_i32_0 : i32, i32
  }
  func.func @transform_7(%arg0: i32) -> (i32, i32) {
    %c0_i32 = arith.constant 0 : i32
    %c0_i32_0 = arith.constant 0 : i32
    %c0_i32_1 = arith.constant 0 : i32
    return %c0_i32, %c0_i32_0 : i32, i32
  }
  func.func @transform_8(%arg0: i32) -> (i32, i32) {
    %c0_i32 = arith.constant 0 : i32
    %c0_i32_0 = arith.constant 0 : i32
    %c0_i32_1 = arith.constant 0 : i32
    return %c0_i32, %c0_i32_0 : i32, i32
  }
  func.func @transform_9(%arg0: i32) -> (i32, i32, i32, i32) {
    %c0_i32 = arith.constant 0 : i32
    %c0_i32_0 = arith.constant 0 : i32
    %c0_i32_1 = arith.constant 0 : i32
    %c0_i32_2 = arith.constant 0 : i32
    return %c0_i32, %arg0, %c0_i32_0, %c0_i32_1 : i32, i32, i32, i32
  }
}

module attributes {stable_mosaic.version = 11 : i64} {
  func.func @_bili_diag_kernel(%arg0: i32, %arg1: memref<2x8x16x128xf32, #tpu.memory_space<vmem>>, %arg2: memref<8x128x128xf32, #tpu.memory_space<vmem>>, %arg3: memref<8x1xf32, #tpu.memory_space<vmem>>, %arg4: memref<16x128xf32, #tpu.memory_space<vmem>>, %arg5: memref<16x128xf32, #tpu.memory_space<vmem>>, %arg6: memref<8x16xf32, #tpu.memory_space<vmem>>) attributes {dimension_semantics = [#tpu.dimension_semantics<parallel>], iteration_bounds = array<i64: 13>, scalar_prefetch = 0 : i64, scratch_operands = 0 : i64, tpu.core_type = #tpu.core_type<tc>, window_params = [{transform_indices = @transform_0, window_bounds = array<i64: 2, 8, 16, 128>}, {transform_indices = @transform_1, window_bounds = array<i64: 8, 128, 128>}, {transform_indices = @transform_2, window_bounds = array<i64: 8, 1>}, {pipeline_mode = #tpu.pipeline_mode<synchronous>, transform_indices = @transform_3, window_bounds = array<i64: 16, 128>}, {pipeline_mode = #tpu.pipeline_mode<synchronous>, transform_indices = @transform_4, window_bounds = array<i64: 16, 128>}, {transform_indices = @transform_5, window_bounds = array<i64: 8, 16>}]} {
    %c0 = arith.constant 0 : index
    %c0_0 = arith.constant 0 : index
    %c0_1 = arith.constant 0 : index
    %c0_2 = arith.constant 0 : index
    %0 = vector.load %arg1[%c0, %c0_0, %c0_1, %c0_2] : memref<2x8x16x128xf32, #tpu.memory_space<vmem>>, vector<1x8x16x128xf32>
    %1 = vector.shape_cast %0 : vector<1x8x16x128xf32> to vector<8x16x128xf32>
    %c0_3 = arith.constant 0 : index
    %c0_4 = arith.constant 0 : index
    %2 = vector.load %arg4[%c0_3, %c0_4] : memref<16x128xf32, #tpu.memory_space<vmem>>, vector<16x128xf32>
    %3 = vector.shape_cast %2 : vector<16x128xf32> to vector<1x16x128xf32>
    %4 = vector.broadcast %3 : vector<1x16x128xf32> to vector<8x16x128xf32>
    %5 = arith.addf %1, %4 : vector<8x16x128xf32>
    %c1 = arith.constant 1 : index
    %c0_5 = arith.constant 0 : index
    %c0_6 = arith.constant 0 : index
    %c0_7 = arith.constant 0 : index
    %6 = vector.load %arg1[%c1, %c0_5, %c0_6, %c0_7] : memref<2x8x16x128xf32, #tpu.memory_space<vmem>>, vector<1x8x16x128xf32>
    %7 = vector.shape_cast %6 : vector<1x8x16x128xf32> to vector<8x16x128xf32>
    %c0_8 = arith.constant 0 : index
    %c0_9 = arith.constant 0 : index
    %8 = vector.load %arg5[%c0_8, %c0_9] : memref<16x128xf32, #tpu.memory_space<vmem>>, vector<16x128xf32>
    %9 = vector.shape_cast %8 : vector<16x128xf32> to vector<1x16x128xf32>
    %10 = vector.broadcast %9 : vector<1x16x128xf32> to vector<8x16x128xf32>
    %11 = arith.addf %7, %10 : vector<8x16x128xf32>
    %c0_10 = arith.constant 0 : index
    %c0_11 = arith.constant 0 : index
    %c0_12 = arith.constant 0 : index
    %12 = vector.load %arg2[%c0_10, %c0_11, %c0_12] : memref<8x128x128xf32, #tpu.memory_space<vmem>>, vector<8x128x128xf32>
    "tpu.trace_start"() <{level = 10 : i32, message = "rfg,rng->rfn"}> : () -> ()
    %cst = arith.constant dense<0.000000e+00> : vector<8x128x16xf32>
    %13 = tpu.matmul %12, %11, %cst {dimension_numbers = #tpu.dot_dimension_numbers<[2], [2], [1], [1], [0, 0, 0, 1, 1, 1], [0], [0]>} : vector<8x128x128xf32>, vector<8x16x128xf32>, vector<8x128x16xf32> -> vector<8x128x16xf32>
    "tpu.trace_stop"() : () -> ()
    "tpu.trace_start"() <{level = 10 : i32, message = "rnf,rfm->rnm"}> : () -> ()
    %cst_13 = arith.constant dense<0.000000e+00> : vector<8x16x16xf32>
    %14 = tpu.matmul %5, %13, %cst_13 {dimension_numbers = #tpu.dot_dimension_numbers<[2], [1], [1], [2], [0, 0, 0, 1, 1, 2], [0], [0]>} : vector<8x16x128xf32>, vector<8x128x16xf32>, vector<8x16x16xf32> -> vector<8x16x16xf32>
    "tpu.trace_stop"() : () -> ()
    %15 = tpu.iota {dimensions = array<i32: 0>} : vector<16x16xi32>
    %16 = tpu.iota {dimensions = array<i32: 1>} : vector<16x16xi32>
    %17 = arith.cmpi eq, %15, %16 : vector<16x16xi32>
    %18 = arith.extui %17 : vector<16x16xi1> to vector<16x16xi32>
    %19 = arith.sitofp %18 : vector<16x16xi32> to vector<16x16xf32>
    %20 = vector.shape_cast %19 : vector<16x16xf32> to vector<1x16x16xf32>
    %21 = vector.broadcast %20 : vector<1x16x16xf32> to vector<8x16x16xf32>
    %22 = arith.mulf %14, %21 : vector<8x16x16xf32>
    %cst_14 = arith.constant dense<0.000000e+00> : vector<8x16xf32>
    %23 = vector.multi_reduction <add>, %22, %cst_14 [2] : vector<8x16x16xf32> to vector<8x16xf32>
    %c0_15 = arith.constant 0 : index
    %c0_16 = arith.constant 0 : index
    %24 = vector.load %arg3[%c0_15, %c0_16] : memref<8x1xf32, #tpu.memory_space<vmem>>, vector<8x1xf32>
    %25 = vector.broadcast %24 : vector<8x1xf32> to vector<8x16xf32>
    %26 = arith.addf %23, %25 : vector<8x16xf32>
    %c0_17 = arith.constant 0 : index
    %c0_18 = arith.constant 0 : index
    %27 = vector.load %arg6[%c0_17, %c0_18] : memref<8x16xf32, #tpu.memory_space<vmem>>, vector<8x16xf32>
    tpu.vector_store %arg6[%c0_17, %c0_18], %26 {strides = array<i32>} : memref<8x16xf32, #tpu.memory_space<vmem>>, vector<8x16xf32>,
    return
  }
  func.func @transform_0(%arg0: i32) -> (i32, i32, i32, i32) {
    %c0_i32 = arith.constant 0 : i32
    %c0_i32_0 = arith.constant 0 : i32
    %c0_i32_1 = arith.constant 0 : i32
    %c0_i32_2 = arith.constant 0 : i32
    return %c0_i32, %arg0, %c0_i32_0, %c0_i32_1 : i32, i32, i32, i32
  }
  func.func @transform_1(%arg0: i32) -> (i32, i32, i32) {
    %c0_i32 = arith.constant 0 : i32
    %c0_i32_0 = arith.constant 0 : i32
    %c0_i32_1 = arith.constant 0 : i32
    return %arg0, %c0_i32, %c0_i32_0 : i32, i32, i32
  }
  func.func @transform_2(%arg0: i32) -> (i32, i32) {
    %c0_i32 = arith.constant 0 : i32
    %c0_i32_0 = arith.constant 0 : i32
    return %arg0, %c0_i32 : i32, i32
  }
  func.func @transform_3(%arg0: i32) -> (i32, i32) {
    %c0_i32 = arith.constant 0 : i32
    %c0_i32_0 = arith.constant 0 : i32
    %c0_i32_1 = arith.constant 0 : i32
    return %c0_i32, %c0_i32_0 : i32, i32
  }
  func.func @transform_4(%arg0: i32) -> (i32, i32) {
    %c0_i32 = arith.constant 0 : i32
    %c0_i32_0 = arith.constant 0 : i32
    %c0_i32_1 = arith.constant 0 : i32
    return %c0_i32, %c0_i32_0 : i32, i32
  }
  func.func @transform_5(%arg0: i32) -> (i32, i32) {
    %c0_i32 = arith.constant 0 : i32
    %c0_i32_0 = arith.constant 0 : i32
    return %arg0, %c0_i32 : i32, i32
  }
}

</mosaic_0001>

<bundles_post_ra>
// kernel: _lambda_.3
= control target key start
LH: loop header
LB: loop body
LE: loop exit
PB: predicated region body
PF: predicated region fallthrough
CT: control target
= control target key end

     0   :  { %s3959_s18 = smov 0   ;;  %s3961_s19 = smov 0   ;;  %s4372_s0 = inlined_call_operand.vmem [shape: f32[2,104,16,128], index: 0, kind: input, shape index: {}]   ;;  %s4373_s1 = inlined_call_operand.vmem [shape: f32[104,128,128], index: 1, kind: input, shape index: {}]   ;;  %s4374_s2 = inlined_call_operand.vmem [shape: f32[104,1], index: 2, kind: input, shape index: {}]   ;;  %s4375_s3 = inlined_call_operand.vmem [shape: f32[16,128], index: 3, kind: input, shape index: {}]   ;;  %s4376_s4 = inlined_call_operand.vmem [shape: f32[16,128], index: 4, kind: input, shape index: {}]   ;;  %s4377_s5 = inlined_call_operand.vmem [shape: f32[104,16], index: 5, kind: output, shape index: {}]  }
   0x1   :  { %s3963_s20 = smov 0  }
   0x2 LB: > { %s3975_s21 = sadd.s32 4294967295, %s3925_s20   ;;  %s3978_s22 = sadd.s32 1, %s3925_s20   ;;  %s3925_s20 = sphi %s3963_s20, %s4380_s20   ;;  %s3921_s19 = sphi %s3961_s19, %s4379_s19   ;;  %s3917_s18 = sphi %s3959_s18, %s4378_s18  }
   0x3   : > { %s19_s23 = ssub.s32 %s3925_s20, %s3978_s22  ;;  %s22_s24 = sadd.s32 1, %s3921_s19 }
   0x4   : > { %p20_p0 = scmp.eq.s32.totalorder %s19_s23, 0  ;;  %p29_p1 = scmp.ne.s32.totalorder %s3921_s19, %s3917_s18 }
   0x5   : > { %p30_p2 = scmp.eq.s32.totalorder %s3925_s20, 0  ;;  %p2760_p4 = scmp.ge.s32.totalorder %s3925_s20, 13 }
   0x6   : > { %s3987_s25 = scalar_select %p20_p0, %s3921_s19, %s22_s24  }
   0x7   : > { %p31_p3 = por %p30_p2, %p29_p1  ;;  %181 = sbr.rel (%p2760_p4) target bundleno = 34 (0x22), region = 24 }
   0xe   : > { %184 = sbr.rel (!%p31_p3) target bundleno = 34 (0x22), region = 28  ;;  %s186_s26 = sand.u32 (%p31_p3), 1, %s3921_s19  }
   0xf   : > { %s2793_s27 = sshll.u32 (%p31_p3), %s3925_s20, 7  ;;  %s2761_s28 = sshll.u32 (%p31_p3), %s186_s26, 8 }
  0x10   : > { %s3995_s6 = scalar_lea.vmem (%p31_p3), %s4372_s0, %s2793_s27  ;;  %s4000_s7 = scalar_lea.vmem (%p31_p3), [#allocation2], %s2761_s28 }
  0x11   : > { %v282_v0 = vld [vmem:[%s3995_s6] sm:$0xff] (%p31_p3)  ;;  %v284_v1 = vld [vmem:[%s3995_s6 + $0x8] sm:$0xff] (%p31_p3)  ;;  %v286_v2 = vld [vmem:[%s3995_s6 + $0x10] sm:$0xff] (%p31_p3) }
  0x12   : > { %283 = vst [vmem:[%s4000_s7] sm:$0xff] (%p31_p3), %v282_v0  ;;  %285 = vst [vmem:[%s4000_s7 + $0x8] sm:$0xff] (%p31_p3), %v284_v1  ;;  %v288_v3 = vld [vmem:[%s3995_s6 + $0x18] sm:$0xff] (%p31_p3)  ;;  %v290_v4 = vld [vmem:[%s3995_s6 + $0x20] sm:$0xff] (%p31_p3) }
  0x13   : > { %287 = vst [vmem:[%s4000_s7 + $0x10] sm:$0xff] (%p31_p3), %v286_v2  ;;  %v292_v5 = vld [vmem:[%s3995_s6 + $0x28] sm:$0xff] (%p31_p3)  ;;  %289 = vst [vmem:[%s4000_s7 + $0x18] sm:$0xff] (%p31_p3), %v288_v3  ;;  %v294_v6 = vld [vmem:[%s3995_s6 + $0x30] sm:$0xff] (%p31_p3) }
  0x14   : > { %291 = vst [vmem:[%s4000_s7 + $0x20] sm:$0xff] (%p31_p3), %v290_v4  ;;  %293 = vst [vmem:[%s4000_s7 + $0x28] sm:$0xff] (%p31_p3), %v292_v5  ;;  %v296_v7 = vld [vmem:[%s3995_s6 + $0x38] sm:$0xff] (%p31_p3)  ;;  %v298_v8 = vld [vmem:[%s3995_s6 + $0x40] sm:$0xff] (%p31_p3) }
  0x15   : > { %295 = vst [vmem:[%s4000_s7 + $0x30] sm:$0xff] %v294_v6  ;;  %297 = vst [vmem:[%s4000_s7 + $0x38] sm:$0xff] %v296_v7  ;;  %v300_v9 = vld [vmem:[%s3995_s6 + $0x48] sm:$0xff]  ;;  %v302_v10 = vld [vmem:[%s3995_s6 + $0x50] sm:$0xff] }
  0x16   : > { %299 = vst [vmem:[%s4000_s7 + $0x40] sm:$0xff] %v298_v8  ;;  %v304_v11 = vld [vmem:[%s3995_s6 + $0x58] sm:$0xff]  ;;  %301 = vst [vmem:[%s4000_s7 + $0x48] sm:$0xff] %v300_v9  ;;  %v306_v12 = vld [vmem:[%s3995_s6 + $0x60] sm:$0xff] }
  0x17   : > { %303 = vst [vmem:[%s4000_s7 + $0x50] sm:$0xff] %v302_v10  ;;  %305 = vst [vmem:[%s4000_s7 + $0x58] sm:$0xff] %v304_v11  ;;  %v308_v13 = vld [vmem:[%s3995_s6 + $0x68] sm:$0xff]  ;;  %v310_v14 = vld [vmem:[%s3995_s6 + $0x70] sm:$0xff] }
  0x18   : > { %307 = vst [vmem:[%s4000_s7 + $0x60] sm:$0xff] %v306_v12  ;;  %309 = vst [vmem:[%s4000_s7 + $0x68] sm:$0xff] %v308_v13  ;;  %v312_v15 = vld [vmem:[%s3995_s6 + $0x78] sm:$0xff]  ;;  %v314_v16 = vld [vmem:[%s3995_s6 + $0x680] sm:$0xff] }
  0x19   : > { %311 = vst [vmem:[%s4000_s7 + $0x70] sm:$0xff] %v310_v14  ;;  %v316_v17 = vld [vmem:[%s3995_s6 + $0x688] sm:$0xff]  ;;  %313 = vst [vmem:[%s4000_s7 + $0x78] sm:$0xff] %v312_v15  ;;  %v318_v18 = vld [vmem:[%s3995_s6 + $0x690] sm:$0xff] }
  0x1a   : > { %315 = vst [vmem:[%s4000_s7 + $0x80] sm:$0xff] %v314_v16  ;;  %317 = vst [vmem:[%s4000_s7 + $0x88] sm:$0xff] %v316_v17  ;;  %v320_v19 = vld [vmem:[%s3995_s6 + $0x698] sm:$0xff]  ;;  %v322_v20 = vld [vmem:[%s3995_s6 + $0x6a0] sm:$0xff] }
  0x1b   : > { %319 = vst [vmem:[%s4000_s7 + $0x90] sm:$0xff] %v318_v18  ;;  %321 = vst [vmem:[%s4000_s7 + $0x98] sm:$0xff] %v320_v19  ;;  %v324_v21 = vld [vmem:[%s3995_s6 + $0x6a8] sm:$0xff]  ;;  %v326_v22 = vld [vmem:[%s3995_s6 + $0x6b0] sm:$0xff] }
  0x1c   : > { %323 = vst [vmem:[%s4000_s7 + $0xa0] sm:$0xff] %v322_v20  ;;  %v328_v23 = vld [vmem:[%s3995_s6 + $0x6b8] sm:$0xff]  ;;  %325 = vst [vmem:[%s4000_s7 + $0xa8] sm:$0xff] %v324_v21  ;;  %v330_v24 = vld [vmem:[%s3995_s6 + $0x6c0] sm:$0xff] }
  0x1d   : > { %327 = vst [vmem:[%s4000_s7 + $0xb0] sm:$0xff] %v326_v22  ;;  %329 = vst [vmem:[%s4000_s7 + $0xb8] sm:$0xff] %v328_v23  ;;  %v332_v25 = vld [vmem:[%s3995_s6 + $0x6c8] sm:$0xff]  ;;  %v334_v26 = vld [vmem:[%s3995_s6 + $0x6d0] sm:$0xff] }
  0x1e   : > { %331 = vst [vmem:[%s4000_s7 + $0xc0] sm:$0xff] %v330_v24  ;;  %333 = vst [vmem:[%s4000_s7 + $0xc8] sm:$0xff] %v332_v25  ;;  %v336_v27 = vld [vmem:[%s3995_s6 + $0x6d8] sm:$0xff]  ;;  %v338_v28 = vld [vmem:[%s3995_s6 + $0x6e0] sm:$0xff] }
  0x1f   : > { %335 = vst [vmem:[%s4000_s7 + $0xd0] sm:$0xff] %v334_v26  ;;  %v340_v29 = vld [vmem:[%s3995_s6 + $0x6e8] sm:$0xff]  ;;  %337 = vst [vmem:[%s4000_s7 + $0xd8] sm:$0xff] %v336_v27  ;;  %v342_v30 = vld [vmem:[%s3995_s6 + $0x6f0] sm:$0xff] }
  0x20   : > { %339 = vst [vmem:[%s4000_s7 + $0xe0] sm:$0xff] %v338_v28  ;;  %341 = vst [vmem:[%s4000_s7 + $0xe8] sm:$0xff] %v340_v29  ;;  %v344_v31 = vld [vmem:[%s3995_s6 + $0x6f8] sm:$0xff] }
  0x21   : > { %343 = vst [vmem:[%s4000_s7 + $0xf0] sm:$0xff] %v342_v30  ;;  %345 = vst [vmem:[%s4000_s7 + $0xf8] sm:$0xff] %v344_v31 }
  0x22 PF: > { %p2765_p5 = scmp.ge.s32.totalorder %s3925_s20, 1  ;;  %p367_p6 = scmp.lt.s32.totalorder %s3925_s20, 14 }
  0x24   : > { %p368_p7 = pnand %p2765_p5, %p367_p6 }
  0x25   : > { %s374_s8 = sand.u32 (!%p368_p7), 1, %s3917_s18   ;;  %s2767_s9 = sshll.u32 (!%p368_p7), %s3975_s21, 3  ;;  %v4070_v32 = vld [vmem:[%s4376_s4] sm:$0xff] (!%p368_p7)  ;;  %v4075_v33 = vld [vmem:[%s4376_s4 + $0x8] sm:$0xff] (!%p368_p7)  ;;  %vm2410_vm2 = vcmask (!%p368_p7), 130048   ;;  %vm2593_vm3 = vcmask (!%p368_p7), 130112  }
  0x26   : > { %371 = sbr.rel (%p368_p7) target bundleno = 939 (0x3ab), region = 74  ;;  %s2766_s10 = sshll.u32 (!%p368_p7), %s374_s8, 8  ;;  %vm2658_vm4 = vcmask (!%p368_p7), 1041409   ;;  %vm2660_vm5 = vcmask (!%p368_p7), 1042434   ;;  %vm2662_vm6 = vcmask (!%p368_p7), 1043459   ;;  %vm2664_vm7 = vcmask (!%p368_p7), 1044484  }
  0x27   : > { %p412_p8 = scmp.lt.s32.totalorder (!%p368_p7), %s2767_s9, 103  ;;  %s4077_s15 = scalar_lea.vmem (!%p368_p7), [#allocation2], %s2766_s10  ;;  %vm2666_vm8 = vcmask (!%p368_p7), 1045509   ;;  %vm2668_vm9 = vcmask (!%p368_p7), 1046534   ;;  %vm2670_vm10 = vcmask (!%p368_p7), 1047559  }
  0x28   : > { %v2772_v34 = vld [vmem:[%s4077_s15 + $0x80] sm:$0xff] (!%p368_p7)  ;;  %v2773_v35 = vld [vmem:[%s4077_s15 + $0x88] sm:$0xff] (!%p368_p7)  ;;  %v2774_v36 = vld [vmem:[%s4077_s15 + $0x90] sm:$0xff] (!%p368_p7)  ;;  %p418_p9 = scmp.lt.s32.totalorder (!%p368_p7), %s3975_s21, 12 }
  0x29   : > { %v479_v37 = vadd.f32 (!%p368_p7), %v2772_v34, %v4070_v32  ;;  %v480_v38 = vadd.f32 (!%p368_p7), %v2773_v35, %v4075_v33  ;;  %v2775_v39 = vld [vmem:[%s4077_s15 + $0x98] sm:$0xff] (!%p368_p7)  ;;  %v481_v40 = vadd.f32 (!%p368_p7), %v2774_v36, %v4070_v32  ;;  %v2776_v41 = vld [vmem:[%s4077_s15 + $0xa0] sm:$0xff] (!%p368_p7)  ;;  %v2777_v42 = vld [vmem:[%s4077_s15 + $0xa8] sm:$0xff] (!%p368_p7) }
  0x2a   : > { %v482_v43 = vadd.f32 (!%p368_p7), %v2775_v39, %v4075_v33  ;;  %v483_v44 = vadd.f32 (!%p368_p7), %v2776_v41, %v4070_v32  ;;  %v484_v45 = vadd.f32 (!%p368_p7), %v2777_v42, %v4075_v33  ;;  %v2778_v46 = vld [vmem:[%s4077_s15 + $0xb0] sm:$0xff] (!%p368_p7)  ;;  %v2779_v47 = vld [vmem:[%s4077_s15 + $0xb8] sm:$0xff] (!%p368_p7)  ;;  %v2780_v54 = vld [vmem:[%s4077_s15 + $0xc0] sm:$0xff] (!%p368_p7) }
  0x2b   : > { %v3587_v48 = vpack.c.bf16 (!%p368_p7), %v480_v38, %v479_v37  ;;  %v485_v49 = vadd.f32 (!%p368_p7), %v2778_v46, %v4070_v32  ;;  %v486_v50 = vadd.f32 (!%p368_p7), %v2779_v47, %v4075_v33  ;;  %v2781_v55 = vld [vmem:[%s4077_s15 + $0xc8] sm:$0xff] (!%p368_p7)  ;;  %v2782_v58 = vld [vmem:[%s4077_s15 + $0xd0] sm:$0xff] (!%p368_p7)  ;;  %v2783_v59 = vld [vmem:[%s4077_s15 + $0xd8] sm:$0xff] (!%p368_p7)  ;;  %v487_v60 = vadd.f32 (!%p368_p7), %v2780_v54, %v4070_v32 }
  0x2c   : > { %v3591_v52 = vpack.c.bf16 (!%p368_p7), %v482_v43, %v481_v40  ;;  %v3595_v53 = vpack.c.bf16 (!%p368_p7), %v484_v45, %v483_v44  ;;  %v488_v61 = vadd.f32 (!%p368_p7), %v2781_v55, %v4075_v33  ;;  %v489_v62 = vadd.f32 (!%p368_p7), %v2782_v58, %v4070_v32  ;;  %v2784_v29 = vld [vmem:[%s4077_s15 + $0xe0] sm:$0xff] (!%p368_p7)  ;;  %v2785_v30 = vld [vmem:[%s4077_s15 + $0xe8] sm:$0xff] (!%p368_p7)  ;;  %v2786_v35 = vld [vmem:[%s4077_s15 + $0xf0] sm:$0xff] (!%p368_p7) }
  0x2d   : > { %s4382_s9 = smov (!%p412_p8, %s2767_s9), 103  ;;  %3588 = vmatprep.subr.bf16.mxu0 %v3587_v48  ;;  %v3599_v57 = vpack.c.bf16 %v486_v50, %v485_v49  ;;  %v490_v63 = vadd.f32 %v2783_v59, %v4075_v33  ;;  %v2787_v36 = vld [vmem:[%s4077_s15 + $0xf8] sm:$0xff]  ;;  %v491_v38 = vadd.f32 %v2784_v29, %v4070_v32  ;;  %v492_v39 = vadd.f32 %v2785_v30, %v4075_v33  ;;  %s4384_s21 = smov (!%p418_p9, %s3975_s21), 12 }
  0x2e   : > { %s2794_s16 = sshll.u32 %s4382_s9, 7  ;;  %3590 = vmatpush3.bf16.xpose.msra.mxu0 %v3587_v48  ;;  %3592 = vmatprep.subr.bf16.mxu1 %v3591_v52  ;;  %v4112_v2 = vpack.c.bf16 %v488_v61, %v487_v60  ;;  %v493_v42 = vadd.f32 %v2786_v35, %v4070_v32  ;;  %v494_v43 = vadd.f32 %v2787_v36, %v4075_v33  ;;  %s2770_s28 = sshll.u32 %s4384_s21, 3 }
  0x2f   : > { %s4096_s20 = scalar_lea.vmem %s4373_s1, %s2794_s16  ;;  %3596 = vmatprep.subr.bf16.mxu0 %v3595_v53  ;;  %3594 = vmatpush3.bf16.xpose.msra.mxu1 %v3591_v52  ;;  %v4116_v5 = vpack.c.bf16 %v490_v63, %v489_v62  ;;  %v4158_v46 = vpack.c.bf16 %v492_v39, %v491_v38  ;;  %s421_s6 = scalar_lea.vmem %s4374_s2, %s2770_s28 }
  0x30   : > { %v495_v51 = vld [vmem:[%s4096_s20] sm:$0xff]  ;;  %3600 = vmatprep.subr.bf16.mxu1 %v3599_v57  ;;  %v496_v0 = vld [vmem:[%s4096_s20 + $0x8] sm:$0xff]  ;;  %v497_v1 = vld [vmem:[%s4096_s20 + $0x10] sm:$0xff]  ;;  %v4162_v49 = vpack.c.bf16 %v494_v43, %v493_v42  ;;  %s425_s9 = scalar_lea.vmem %s4377_s5, %s2770_s28 }
  0x31   : > { %3087 = vmatprep.mubr.f32.mxu0 %v495_v51  ;;  %v511_v56 = vld [vmem:[%s4096_s20 + $0x80] sm:$0xff]  ;;  %v512_v3 = vld [vmem:[%s4096_s20 + $0x88] sm:$0xff]  ;;  %v513_v4 = vld [vmem:[%s4096_s20 + $0x90] sm:$0xff] }
  0x32   : > { %3115 = vmatprep.mubr.f32.mxu1 %v511_v56  ;;  %v498_v6 = vld [vmem:[%s4096_s20 + $0x18] sm:$0xff]  ;;  %v499_v7 = vld [vmem:[%s4096_s20 + $0x20] sm:$0xff]  ;;  %v500_v10 = vld [vmem:[%s4096_s20 + $0x28] sm:$0xff] }
  0x33   : > { %v514_v8 = vld [vmem:[%s4096_s20 + $0x98] sm:$0xff]  ;;  %v515_v9 = vld [vmem:[%s4096_s20 + $0xa0] sm:$0xff]  ;;  %v501_v11 = vld [vmem:[%s4096_s20 + $0x30] sm:$0xff] }
  0x34   : > { %v516_v12 = vld [vmem:[%s4096_s20 + $0xa8] sm:$0xff]  ;;  %v517_v13 = vld [vmem:[%s4096_s20 + $0xb0] sm:$0xff]  ;;  %v502_v14 = vld [vmem:[%s4096_s20 + $0x38] sm:$0xff] }
  0x35   : > { %3088 = vmatmul.mubr.f32.vlgmr.msra.gmra.mrb[0].mxu0 %v496_v0  ;;  %v503_v15 = vld [vmem:[%s4096_s20 + $0x40] sm:$0xff]  ;;  %v518_v16 = vld [vmem:[%s4096_s20 + $0xb8] sm:$0xff]  ;;  %v504_v18 = vld [vmem:[%s4096_s20 + $0x48] sm:$0xff] }
  0x36   : > { %3598 = vmatpush3.bf16.xpose.msra.mxu0 %v3595_v53  ;;  %3090 = vmatprep.mubr.f32.mxu0 %v497_v1  ;;  %v519_v17 = vld [vmem:[%s4096_s20 + $0xc0] sm:$0xff]  ;;  %v505_v19 = vld [vmem:[%s4096_s20 + $0x50] sm:$0xff]  ;;  %v520_v20 = vld [vmem:[%s4096_s20 + $0xc8] sm:$0xff] }
  0x37   : > { %3116 = vmatmul.mubr.f32.vlgmr.msra.gmra.mrb[0].mxu1 %v512_v3  ;;  %3604 = vmatprep.subr.bf16.mxu0 %v4112_v2  ;;  %v521_v21 = vld [vmem:[%s4096_s20 + $0xd0] sm:$0xff]  ;;  %v506_v22 = vld [vmem:[%s4096_s20 + $0x58] sm:$0xff]  ;;  %v507_v23 = vld [vmem:[%s4096_s20 + $0x60] sm:$0xff] }
  0x38   : > { %3118 = vmatprep.mubr.f32.mxu1 %v513_v4  ;;  %3602 = vmatpush3.bf16.xpose.msra.mxu1 %v3599_v57  ;;  %v522_v24 = vld [vmem:[%s4096_s20 + $0xd8] sm:$0xff]  ;;  %v523_v25 = vld [vmem:[%s4096_s20 + $0xe0] sm:$0xff]  ;;  %v508_v26 = vld [vmem:[%s4096_s20 + $0x68] sm:$0xff] }
  0x39   : > { %3091 = vmatmul.mubr.f32.gmra.mrb[2].mxu0 %v498_v6  ;;  %3608 = vmatprep.subr.bf16.mxu1 %v4116_v5  ;;  %v509_v27 = vld [vmem:[%s4096_s20 + $0x70] sm:$0xff]  ;;  %v524_v28 = vld [vmem:[%s4096_s20 + $0xe8] sm:$0xff]  ;;  %v510_v34 = vld [vmem:[%s4096_s20 + $0x78] sm:$0xff] }
  0x3a   : > { %3093 = vmatprep.mubr.f32.mxu0 %v499_v7  ;;  %v525_v31 = vld [vmem:[%s4096_s20 + $0xf0] sm:$0xff]  ;;  %v527_v37 = vld [vmem:[%s4096_s20 + $0x100] sm:$0xff]  ;;  %v526_v40 = vld [vmem:[%s4096_s20 + $0xf8] sm:$0xff] }
  0x3b   : > { %3119 = vmatmul.mubr.f32.gmra.mrb[2].mxu1 %v514_v8  ;;  %v543_v41 = vld [vmem:[%s4096_s20 + $0x180] sm:$0xff]  ;;  %v528_v44 = vld [vmem:[%s4096_s20 + $0x108] sm:$0xff]  ;;  %v529_v45 = vld [vmem:[%s4096_s20 + $0x110] sm:$0xff] }
  0x3c   : > { %3121 = vmatprep.mubr.f32.mxu1 %v515_v9  ;;  %v544_v47 = vld [vmem:[%s4096_s20 + $0x188] sm:$0xff]  ;;  %v545_v48 = vld [vmem:[%s4096_s20 + $0x190] sm:$0xff]  ;;  %v530_v32 = vld [vmem:[%s4096_s20 + $0x118] sm:$0xff] }
  0x3d   : > { %3094 = vmatmul.mubr.f32.gmra.mrb[4].mxu0 %v500_v10  ;;  %v531_v33 = vld [vmem:[%s4096_s20 + $0x120] sm:$0xff]  ;;  %v546_v50 = vld [vmem:[%s4096_s20 + $0x198] sm:$0xff]  ;;  %v532_v52 = vld [vmem:[%s4096_s20 + $0x128] sm:$0xff] }
  0x3e   : > { %3096 = vmatprep.mubr.f32.mxu0 %v501_v11  ;;  %v547_v51 = vld [vmem:[%s4096_s20 + $0x1a0] sm:$0xff]  ;;  %v533_v53 = vld [vmem:[%s4096_s20 + $0x130] sm:$0xff]  ;;  %v548_v54 = vld [vmem:[%s4096_s20 + $0x1a8] sm:$0xff] }
  0x3f   : > { %3122 = vmatmul.mubr.f32.gmra.mrb[4].mxu1 %v516_v12  ;;  %v549_v55 = vld [vmem:[%s4096_s20 + $0x1b0] sm:$0xff]  ;;  %v534_v56 = vld [vmem:[%s4096_s20 + $0x138] sm:$0xff]  ;;  %v535_v57 = vld [vmem:[%s4096_s20 + $0x140] sm:$0xff] }
  0x40   : > { %3124 = vmatprep.mubr.f32.mxu1 %v517_v13  ;;  %v550_v58 = vld [vmem:[%s4096_s20 + $0x1b8] sm:$0xff]  ;;  %v551_v59 = vld [vmem:[%s4096_s20 + $0x1c0] sm:$0xff]  ;;  %v536_v60 = vld [vmem:[%s4096_s20 + $0x148] sm:$0xff] }
  0x41   : > { %3097 = vmatmul.mubr.f32.gmra.mrb[6].mxu0 %v502_v14  ;;  %v537_v61 = vld [vmem:[%s4096_s20 + $0x150] sm:$0xff]  ;;  %v552_v62 = vld [vmem:[%s4096_s20 + $0x1c8] sm:$0xff]  ;;  %v538_v0 = vld [vmem:[%s4096_s20 + $0x158] sm:$0xff] }
  0x42   : > { %3099 = vmatprep.mubr.f32.mxu0 %v503_v15  ;;  %v553_v63 = vld [vmem:[%s4096_s20 + $0x1d0] sm:$0xff]  ;;  %v539_v1 = vld [vmem:[%s4096_s20 + $0x160] sm:$0xff]  ;;  %v540_v4 = vld [vmem:[%s4096_s20 + $0x168] sm:$0xff] }
  0x43   : > { %3125 = vmatmul.mubr.f32.gmra.mrb[6].mxu1 %v518_v16  ;;  %v555_v3 = vld [vmem:[%s4096_s20 + $0x1e0] sm:$0xff]  ;;  %v556_v6 = vld [vmem:[%s4096_s20 + $0x1e8] sm:$0xff]  ;;  %v557_v7 = vld [vmem:[%s4096_s20 + $0x1f0] sm:$0xff] }
  0x44   : > { %3127 = vmatprep.mubr.f32.mxu1 %v519_v17  ;;  %v542_v8 = vld [vmem:[%s4096_s20 + $0x178] sm:$0xff]  ;;  %v559_v9 = vld [vmem:[%s4096_s20 + $0x200] sm:$0xff]  ;;  %v560_v12 = vld [vmem:[%s4096_s20 + $0x208] sm:$0xff] }
  0x45   : > { %3100 = vmatmul.mubr.f32.gmra.mrb[8].mxu0 %v504_v18  ;;  %v558_v10 = vld [vmem:[%s4096_s20 + $0x1f8] sm:$0xff]  ;;  %v575_v11 = vld [vmem:[%s4096_s20 + $0x280] sm:$0xff]  ;;  %v561_v13 = vld [vmem:[%s4096_s20 + $0x210] sm:$0xff] }
  0x46   : > { %3102 = vmatprep.mubr.f32.mxu0 %v505_v19  ;;  %v576_v14 = vld [vmem:[%s4096_s20 + $0x288] sm:$0xff]  ;;  %v577_v15 = vld [vmem:[%s4096_s20 + $0x290] sm:$0xff]  ;;  %v562_v16 = vld [vmem:[%s4096_s20 + $0x218] sm:$0xff] }
  0x47   : > { %3128 = vmatmul.mubr.f32.gmra.mrb[8].mxu1 %v520_v20  ;;  %v563_v17 = vld [vmem:[%s4096_s20 + $0x220] sm:$0xff]  ;;  %v578_v18 = vld [vmem:[%s4096_s20 + $0x298] sm:$0xff]  ;;  %v564_v20 = vld [vmem:[%s4096_s20 + $0x228] sm:$0xff] }
  0x48   : > { %3130 = vmatprep.mubr.f32.mxu1 %v521_v21  ;;  %v579_v19 = vld [vmem:[%s4096_s20 + $0x2a0] sm:$0xff]  ;;  %v565_v21 = vld [vmem:[%s4096_s20 + $0x230] sm:$0xff]  ;;  %v584_v30 = vld [vmem:[%s4096_s20 + $0x2c8] sm:$0xff] }
  0x49   : > { %3103 = vmatmul.mubr.f32.gmra.mrb[10].mxu0 %v506_v22  ;;  %v580_v22 = vld [vmem:[%s4096_s20 + $0x2a8] sm:$0xff]  ;;  %v569_v29 = vld [vmem:[%s4096_s20 + $0x250] sm:$0xff]  ;;  %v571_v35 = vld [vmem:[%s4096_s20 + $0x260] sm:$0xff] }
  0x4a   : > { %3105 = vmatprep.mubr.f32.mxu0 %v507_v23  ;;  %v581_v23 = vld [vmem:[%s4096_s20 + $0x2b0] sm:$0xff]  ;;  %v586_v36 = vld [vmem:[%s4096_s20 + $0x2d8] sm:$0xff]  ;;  %v572_v38 = vld [vmem:[%s4096_s20 + $0x268] sm:$0xff] }
  0x4b   : > { %3131 = vmatmul.mubr.f32.gmra.mrb[10].mxu1 %v522_v24  ;;  %v566_v24 = vld [vmem:[%s4096_s20 + $0x238] sm:$0xff]  ;;  %v573_v39 = vld [vmem:[%s4096_s20 + $0x270] sm:$0xff]  ;;  %v591_v43 = vld [vmem:[%s4096_s20 + $0x300] sm:$0xff] }
  0x4c   : > { %3133 = vmatprep.mubr.f32.mxu1 %v523_v25  ;;  %v567_v25 = vld [vmem:[%s4096_s20 + $0x240] sm:$0xff]  ;;  %v574_v42 = vld [vmem:[%s4096_s20 + $0x278] sm:$0xff] }
  0x4d   : > { %3106 = vmatmul.mubr.f32.gmra.mrb[12].mxu0 %v508_v26  ;;  %v582_v26 = vld [vmem:[%s4096_s20 + $0x2b8] sm:$0xff] }
  0x4e   : > { %3108 = vmatprep.mubr.f32.mxu0 %v509_v27  ;;  %v583_v27 = vld [vmem:[%s4096_s20 + $0x2c0] sm:$0xff] }
  0x4f   : > { %3134 = vmatmul.mubr.f32.gmra.mrb[12].mxu1 %v524_v28  ;;  %v568_v28 = vld [vmem:[%s4096_s20 + $0x248] sm:$0xff] }
  0x50   : > { %3136 = vmatprep.mubr.f32.mxu1 %v525_v31  ;;  %v585_v31 = vld [vmem:[%s4096_s20 + $0x2d0] sm:$0xff] }
  0x51   : > { %3109 = vmatmul.mubr.f32.gmra.mrb[14].mxu0 %v510_v34  ;;  %v570_v34 = vld [vmem:[%s4096_s20 + $0x258] sm:$0xff] }
  0x52   : > { %3143 = vmatprep.mubr.f32.mxu0 %v527_v37  ;;  %v587_v37 = vld [vmem:[%s4096_s20 + $0x2e0] sm:$0xff] }
  0x53   : > { %3137 = vmatmul.mubr.f32.gmra.mrb[14].mxu1 %v526_v40  ;;  %v588_v40 = vld [vmem:[%s4096_s20 + $0x2e8] sm:$0xff] }
  0x54   : > { %3171 = vmatprep.mubr.f32.mxu1 %v543_v41  ;;  %v589_v41 = vld [vmem:[%s4096_s20 + $0x2f0] sm:$0xff] }
  0x55   : > { %3144 = vmatmul.mubr.f32.vlgmr.msra.gmra.mrb[16].mxu0 %v528_v44  ;;  %v590_v44 = vld [vmem:[%s4096_s20 + $0x2f8] sm:$0xff] }
  0x56   : > { %3606 = vmatpush3.bf16.xpose.msra.mxu0 %v4112_v2  ;;  %3146 = vmatprep.mubr.f32.mxu0 %v529_v45  ;;  %v554_v2 = vld [vmem:[%s4096_s20 + $0x1d8] sm:$0xff]  ;;  %v607_v45 = vld [vmem:[%s4096_s20 + $0x380] sm:$0xff] }
  0x57   : > { %3172 = vmatmul.mubr.f32.vlgmr.msra.gmra.mrb[16].mxu1 %v544_v47  ;;  %3612 = vmatprep.subr.bf16.mxu0 %v4158_v46  ;;  %v593_v47 = vld [vmem:[%s4096_s20 + $0x310] sm:$0xff] }
  0x58   : > { %3174 = vmatprep.mubr.f32.mxu1 %v545_v48  ;;  %3610 = vmatpush3.bf16.xpose.msra.mxu1 %v4116_v5  ;;  %v541_v5 = vld [vmem:[%s4096_s20 + $0x170] sm:$0xff]  ;;  %v608_v48 = vld [vmem:[%s4096_s20 + $0x388] sm:$0xff] }
  0x59   : > { %3147 = vmatmul.mubr.f32.gmra.mrb[18].mxu0 %v530_v32  ;;  %3616 = vmatprep.subr.bf16.mxu1 %v4162_v49  ;;  %v594_v32 = vld [vmem:[%s4096_s20 + $0x318] sm:$0xff] }
  0x5a   : > { %3149 = vmatprep.mubr.f32.mxu0 %v531_v33  ;;  %v595_v33 = vld [vmem:[%s4096_s20 + $0x320] sm:$0xff] }
  0x5b   : > { %3175 = vmatmul.mubr.f32.gmra.mrb[18].mxu1 %v546_v50  ;;  %v610_v50 = vld [vmem:[%s4096_s20 + $0x398] sm:$0xff] }
  0x5c   : > { %3177 = vmatprep.mubr.f32.mxu1 %v547_v51  ;;  %v611_v51 = vld [vmem:[%s4096_s20 + $0x3a0] sm:$0xff] }
  0x5d   : > { %3150 = vmatmul.mubr.f32.gmra.mrb[20].mxu0 %v532_v52  ;;  %v596_v52 = vld [vmem:[%s4096_s20 + $0x328] sm:$0xff] }
  0x5e   : > { %3152 = vmatprep.mubr.f32.mxu0 %v533_v53  ;;  %v597_v53 = vld [vmem:[%s4096_s20 + $0x330] sm:$0xff] }
  0x5f   : > { %3178 = vmatmul.mubr.f32.gmra.mrb[20].mxu1 %v548_v54  ;;  %v612_v54 = vld [vmem:[%s4096_s20 + $0x3a8] sm:$0xff] }
  0x60   : > { %3180 = vmatprep.mubr.f32.mxu1 %v549_v55  ;;  %v613_v55 = vld [vmem:[%s4096_s20 + $0x3b0] sm:$0xff] }
  0x61   : > { %3153 = vmatmul.mubr.f32.gmra.mrb[22].mxu0 %v534_v56  ;;  %v598_v56 = vld [vmem:[%s4096_s20 + $0x338] sm:$0xff] }
  0x62   : > { %3155 = vmatprep.mubr.f32.mxu0 %v535_v57  ;;  %v599_v57 = vld [vmem:[%s4096_s20 + $0x340] sm:$0xff] }
  0x63   : > { %3181 = vmatmul.mubr.f32.gmra.mrb[22].mxu1 %v550_v58  ;;  %v614_v58 = vld [vmem:[%s4096_s20 + $0x3b8] sm:$0xff] }
  0x64   : > { %3183 = vmatprep.mubr.f32.mxu1 %v551_v59  ;;  %v615_v59 = vld [vmem:[%s4096_s20 + $0x3c0] sm:$0xff] }
  0x65   : > { %3156 = vmatmul.mubr.f32.gmra.mrb[24].mxu0 %v536_v60  ;;  %v600_v60 = vld [vmem:[%s4096_s20 + $0x348] sm:$0xff] }
  0x66   : > { %3158 = vmatprep.mubr.f32.mxu0 %v537_v61  ;;  %v601_v61 = vld [vmem:[%s4096_s20 + $0x350] sm:$0xff] }
  0x67   : > { %3184 = vmatmul.mubr.f32.gmra.mrb[24].mxu1 %v552_v62  ;;  %v616_v62 = vld [vmem:[%s4096_s20 + $0x3c8] sm:$0xff] }
  0x68   : > { %3186 = vmatprep.mubr.f32.mxu1 %v553_v63  ;;  %v617_v63 = vld [vmem:[%s4096_s20 + $0x3d0] sm:$0xff] }
  0x69   : > { %3159 = vmatmul.mubr.f32.gmra.mrb[26].mxu0 %v538_v0  ;;  %v602_v0 = vld [vmem:[%s4096_s20 + $0x358] sm:$0xff] }
  0x6a   : > { %3161 = vmatprep.mubr.f32.mxu0 %v539_v1  ;;  %v603_v1 = vld [vmem:[%s4096_s20 + $0x360] sm:$0xff] }
  0x6b   : > { %3187 = vmatmul.mubr.f32.gmra.mrb[26].mxu1 %v554_v2  ;;  %v618_v2 = vld [vmem:[%s4096_s20 + $0x3d8] sm:$0xff] }
  0x6c   : > { %3189 = vmatprep.mubr.f32.mxu1 %v555_v3  ;;  %v619_v3 = vld [vmem:[%s4096_s20 + $0x3e0] sm:$0xff] }
  0x6d   : > { %3162 = vmatmul.mubr.f32.gmra.mrb[28].mxu0 %v540_v4  ;;  %v604_v4 = vld [vmem:[%s4096_s20 + $0x368] sm:$0xff] }
  0x6e   : > { %3164 = vmatprep.mubr.f32.mxu0 %v541_v5  ;;  %v605_v5 = vld [vmem:[%s4096_s20 + $0x370] sm:$0xff] }
  0x6f   : > { %3190 = vmatmul.mubr.f32.gmra.mrb[28].mxu1 %v556_v6  ;;  %v426_v6 = vld [vmem:[%s4077_s15] sm:$0xff] }
  0x70   : > { %3192 = vmatprep.mubr.f32.mxu1 %v557_v7  ;;  %v4260_v7 = vld [vmem:[%s4375_s3] sm:$0xff] }
  0x71   : > { %3165 = vmatmul.mubr.f32.gmra.mrb[30].mxu0 %v542_v8  ;;  %v620_v8 = vld [vmem:[%s4096_s20 + $0x3e8] sm:$0xff] }
  0x72   : > { %3199 = vmatprep.mubr.f32.mxu0 %v559_v9  ;;  %v621_v9 = vld [vmem:[%s4096_s20 + $0x3f0] sm:$0xff] }
  0x73   : > { %3193 = vmatmul.mubr.f32.gmra.mrb[30].mxu1 %v558_v10  ;;  %v606_v10 = vld [vmem:[%s4096_s20 + $0x378] sm:$0xff] }
  0x74   : > { %3227 = vmatprep.mubr.f32.mxu1 %v575_v11  ;;  %v444_v11 = vadd.f32 %v4260_v7, %v426_v6 }
  0x75   : > { %3200 = vmatmul.mubr.f32.vlgmr.msra.gmra.mrb[32].mxu0 %v560_v12  ;;  %v622_v12 = vld [vmem:[%s4096_s20 + $0x3f8] sm:$0xff] }
  0x76   : > { %3614 = vmatpush3.bf16.xpose.msra.mxu0 %v4158_v46  ;;  %3202 = vmatprep.mubr.f32.mxu0 %v561_v13  ;;  %v592_v46 = vld [vmem:[%s4096_s20 + $0x308] sm:$0xff]  ;;  %v428_v13 = vld [vmem:[%s4077_s15 + $0x10] sm:$0xff] }
  0x77   : > { %3228 = vmatmul.mubr.f32.vlgmr.msra.gmra.mrb[32].mxu1 %v576_v14  ;;  %v446_v14 = vadd.f32 %v4260_v7, %v428_v13 }
  0x78   : > { %3230 = vmatprep.mubr.f32.mxu1 %v577_v15  ;;  %3618 = vmatpush3.bf16.xpose.msra.mxu1 %v4162_v49  ;;  %v609_v49 = vld [vmem:[%s4096_s20 + $0x390] sm:$0xff] }
  0x79   : > { %3203 = vmatmul.mubr.f32.gmra.mrb[34].mxu0 %v562_v16 }
  0x7a   : > { %3205 = vmatprep.mubr.f32.mxu0 %v563_v17 }
  0x7b   : > { %3231 = vmatmul.mubr.f32.gmra.mrb[34].mxu1 %v578_v18 }
  0x7c   : > { %3233 = vmatprep.mubr.f32.mxu1 %v579_v19 }
  0x7d   : > { %3206 = vmatmul.mubr.f32.gmra.mrb[36].mxu0 %v564_v20 }
  0x7e   : > { %3208 = vmatprep.mubr.f32.mxu0 %v565_v21 }
  0x7f   : > { %3234 = vmatmul.mubr.f32.gmra.mrb[36].mxu1 %v580_v22 }
  0x80   : > { %3236 = vmatprep.mubr.f32.mxu1 %v581_v23 }
  0x81   : > { %3209 = vmatmul.mubr.f32.gmra.mrb[38].mxu0 %v566_v24 }
  0x82   : > { %3211 = vmatprep.mubr.f32.mxu0 %v567_v25 }
  0x83   : > { %3237 = vmatmul.mubr.f32.gmra.mrb[38].mxu1 %v582_v26 }
  0x84   : > { %3239 = vmatprep.mubr.f32.mxu1 %v583_v27 }
  0x85   : > { %3212 = vmatmul.mubr.f32.gmra.mrb[40].mxu0 %v568_v28 }
  0x86   : > { %3214 = vmatprep.mubr.f32.mxu0 %v569_v29 }
  0x87   : > { %3240 = vmatmul.mubr.f32.gmra.mrb[40].mxu1 %v584_v30 }
  0x88   : > { %3242 = vmatprep.mubr.f32.mxu1 %v585_v31 }
  0x89   : > { %3215 = vmatmul.mubr.f32.gmra.mrb[42].mxu0 %v570_v34 }
  0x8a   : > { %3217 = vmatprep.mubr.f32.mxu0 %v571_v35 }
  0x8b   : > { %3243 = vmatmul.mubr.f32.gmra.mrb[42].mxu1 %v586_v36 }
  0x8c   : > { %3245 = vmatprep.mubr.f32.mxu1 %v587_v37 }
  0x8d   : > { %3218 = vmatmul.mubr.f32.gmra.mrb[44].mxu0 %v572_v38 }
  0x8e   : > { %3220 = vmatprep.mubr.f32.mxu0 %v573_v39 }
  0x8f   : > { %3246 = vmatmul.mubr.f32.gmra.mrb[44].mxu1 %v588_v40 }
  0x90   : > { %3248 = vmatprep.mubr.f32.mxu1 %v589_v41 }
  0x91   : > { %3221 = vmatmul.mubr.f32.gmra.mrb[46].mxu0 %v574_v42 }
  0x92   : > { %3255 = vmatprep.mubr.f32.mxu0 %v591_v43 }
  0x93   : > { %3249 = vmatmul.mubr.f32.gmra.mrb[46].mxu1 %v590_v44 }
  0x94   : > { %3283 = vmatprep.mubr.f32.mxu1 %v607_v45 }
  0x95   : > { %3256 = vmatmul.mubr.f32.vlgmr.msra.gmra.mrb[48].mxu0 %v592_v46 }
  0x96   : > { %3258 = vmatprep.mubr.f32.mxu0 %v593_v47 }
  0x97   : > { %3284 = vmatmul.mubr.f32.vlgmr.msra.gmra.mrb[48].mxu1 %v608_v48 }
  0x98   : > { %3286 = vmatprep.mubr.f32.mxu1 %v609_v49 }
  0x99   : > { %3259 = vmatmul.mubr.f32.gmra.mrb[50].mxu0 %v594_v32 }
  0x9a   : > { %3261 = vmatprep.mubr.f32.mxu0 %v595_v33 }
  0x9b   : > { %3287 = vmatmul.mubr.f32.gmra.mrb[50].mxu1 %v610_v50 }
  0x9c   : > { %3289 = vmatprep.mubr.f32.mxu1 %v611_v51 }
  0x9d   : > { %3262 = vmatmul.mubr.f32.gmra.mrb[52].mxu0 %v596_v52 }
  0x9e   : > { %3264 = vmatprep.mubr.f32.mxu0 %v597_v53 }
  0x9f   : > { %3290 = vmatmul.mubr.f32.gmra.mrb[52].mxu1 %v612_v54 }
  0xa0   : > { %3292 = vmatprep.mubr.f32.mxu1 %v613_v55 }
  0xa1   : > { %3265 = vmatmul.mubr.f32.gmra.mrb[54].mxu0 %v598_v56 }
  0xa2   : > { %3267 = vmatprep.mubr.f32.mxu0 %v599_v57 }
  0xa3   : > { %3293 = vmatmul.mubr.f32.gmra.mrb[54].mxu1 %v614_v58 }
  0xa4   : > { %3295 = vmatprep.mubr.f32.mxu1 %v615_v59  ;;  %v427_v59 = vld [vmem:[%s4077_s15 + $0x8] sm:$0xff] }
  0xa5   : > { %3268 = vmatmul.mubr.f32.gmra.mrb[56].mxu0 %v600_v60  ;;  %v4273_v60 = vld [vmem:[%s4375_s3 + $0x8] sm:$0xff] }
  0xa6   : > { %3270 = vmatprep.mubr.f32.mxu0 %v601_v61 }
  0xa7   : > { %3296 = vmatmul.mubr.f32.gmra.mrb[56].mxu1 %v616_v62 }
  0xa8   : > { %3298 = vmatprep.mubr.f32.mxu1 %v617_v63  ;;  %v430_v63 = vld [vmem:[%s4077_s15 + $0x20] sm:$0xff] }
  0xa9   : > { %3271 = vmatmul.mubr.f32.gmra.mrb[58].mxu0 %v602_v0 }
  0xaa   : > { %3273 = vmatprep.mubr.f32.mxu0 %v603_v1  ;;  %v429_v1 = vld [vmem:[%s4077_s15 + $0x18] sm:$0xff] }
  0xab   : > { %3299 = vmatmul.mubr.f32.gmra.mrb[58].mxu1 %v618_v2 }
  0xac   : > { %3301 = vmatprep.mubr.f32.mxu1 %v619_v3  ;;  %v445_v3 = vadd.f32 %v4273_v60, %v427_v59 }
  0xad   : > { %3274 = vmatmul.mubr.f32.gmra.mrb[60].mxu0 %v604_v4 }
  0xae   : > { %3276 = vmatprep.mubr.f32.mxu0 %v605_v5  ;;  %v432_v5 = vld [vmem:[%s4077_s15 + $0x30] sm:$0xff] }
  0xaf   : > { %3302 = vmatmul.mubr.f32.gmra.mrb[60].mxu1 %v620_v8  ;;  %v448_v8 = vadd.f32 %v4260_v7, %v430_v63  ;;  %v450_v13 = vadd.f32 %v4260_v7, %v432_v5  ;;  %v436_v63 = vld [vmem:[%s4077_s15 + $0x50] sm:$0xff] }
  0xb0   : > { %3304 = vmatprep.mubr.f32.mxu1 %v621_v9 }
  0xb1   : > { %3277 = vmatmul.mubr.f32.gmra.mrb[62].mxu0 %v606_v10 }
  0xb2   : > { %3339 = vmatprep.mubr.f32.mxu0 %v444_v11  ;;  %v447_v11 = vadd.f32 %v4273_v60, %v429_v1 }
  0xb3   : > { %3305 = vmatmul.mubr.f32.gmra.mrb[62].mxu1 %v622_v12 }
  0xb4   : > { %3374 = vmatprep.mubr.f32.mxu1 %v446_v14 }
 0x108   : > { %v3089_v15 = vpop.f32.mrb[0].mxu0 }
 0x109   : > { %v689_v16 = vpop.f32.mrb[1].mxu0 }
 0x10a   : > { %v3619_v17 = vpack.c.bf16 %v3089_v15, %v689_v16  ;;  %v3117_v18 = vpop.f32.mrb[0].mxu1 }
 0x10b   : > { %v834_v19 = vpop.f32.mrb[1].mxu1 }
 0x10c   : > { %v3092_v20 = vpop.f32.mrb[2].mxu0  ;;  %3620 = vmatprep.subr.bf16.mxu0 %v3619_v17  ;;  %v3651_v21 = vpack.c.bf16 %v3117_v18, %v834_v19 }
 0x10d   : > { %v699_v22 = vpop.f32.mrb[3].mxu0  ;;  %3622 = vmatpush3.bf16.msra.mxu0 %v3619_v17 }
 0x10e   : > { %v3623_v23 = vpack.c.bf16 %v3092_v20, %v699_v22  ;;  %v3120_v24 = vpop.f32.mrb[2].mxu1  ;;  %3652 = vmatprep.subr.bf16.mxu1 %v3651_v21 }
 0x10f   : > { %v844_v25 = vpop.f32.mrb[3].mxu1  ;;  %3654 = vmatpush3.bf16.msra.mxu1 %v3651_v21 }
 0x110   : > { %v3095_v26 = vpop.f32.mrb[4].mxu0  ;;  %3624 = vmatprep.subr.bf16.mxu0 %v3623_v23  ;;  %v3655_v27 = vpack.c.bf16 %v3120_v24, %v844_v25 }
 0x111   : > { %v709_v28 = vpop.f32.mrb[5].mxu0  ;;  %3626 = vmatpush3.bf16.msra.mxu0 %v3623_v23 }
 0x112   : > { %v3627_v29 = vpack.c.bf16 %v3095_v26, %v709_v28  ;;  %v3123_v30 = vpop.f32.mrb[4].mxu1  ;;  %3656 = vmatprep.subr.bf16.mxu1 %v3655_v27 }
 0x113   : > { %v854_v31 = vpop.f32.mrb[5].mxu1  ;;  %3658 = vmatpush3.bf16.msra.mxu1 %v3655_v27 }
 0x114   : > { %v3098_v34 = vpop.f32.mrb[6].mxu0  ;;  %3628 = vmatprep.subr.bf16.mxu0 %v3627_v29  ;;  %v3659_v35 = vpack.c.bf16 %v3123_v30, %v854_v31 }
 0x115   : > { %v719_v36 = vpop.f32.mrb[7].mxu0  ;;  %3630 = vmatpush3.bf16.msra.mxu0 %v3627_v29 }
 0x116   : > { %v3631_v37 = vpack.c.bf16 %v3098_v34, %v719_v36  ;;  %v3126_v38 = vpop.f32.mrb[6].mxu1  ;;  %3660 = vmatprep.subr.bf16.mxu1 %v3659_v35 }
 0x117   : > { %v864_v39 = vpop.f32.mrb[7].mxu1  ;;  %3662 = vmatpush3.bf16.msra.mxu1 %v3659_v35 }
 0x118   : > { %v3101_v40 = vpop.f32.mrb[8].mxu0  ;;  %3632 = vmatprep.subr.bf16.mxu0 %v3631_v37  ;;  %v3663_v41 = vpack.c.bf16 %v3126_v38, %v864_v39 }
 0x119   : > { %v729_v42 = vpop.f32.mrb[9].mxu0  ;;  %3634 = vmatpush3.bf16.msra.mxu0 %v3631_v37 }
 0x11a   : > { %v3635_v43 = vpack.c.bf16 %v3101_v40, %v729_v42  ;;  %v3129_v44 = vpop.f32.mrb[8].mxu1  ;;  %3664 = vmatprep.subr.bf16.mxu1 %v3663_v41 }
 0x11b   : > { %v874_v45 = vpop.f32.mrb[9].mxu1  ;;  %3666 = vmatpush3.bf16.msra.mxu1 %v3663_v41 }
 0x11c   : > { %v3104_v46 = vpop.f32.mrb[10].mxu0  ;;  %3636 = vmatprep.subr.bf16.mxu0 %v3635_v43  ;;  %v3667_v47 = vpack.c.bf16 %v3129_v44, %v874_v45 }
 0x11d   : > { %v739_v48 = vpop.f32.mrb[11].mxu0  ;;  %3638 = vmatpush3.bf16.msra.mxu0 %v3635_v43 }
 0x11e   : > { %v3639_v49 = vpack.c.bf16 %v3104_v46, %v739_v48  ;;  %v3132_v32 = vpop.f32.mrb[10].mxu1  ;;  %3668 = vmatprep.subr.bf16.mxu1 %v3667_v47 }
 0x11f   : > { %v884_v33 = vpop.f32.mrb[11].mxu1  ;;  %3670 = vmatpush3.bf16.msra.mxu1 %v3667_v47 }
 0x120   : > { %v3107_v50 = vpop.f32.mrb[12].mxu0  ;;  %3640 = vmatprep.subr.bf16.mxu0 %v3639_v49  ;;  %v3671_v51 = vpack.c.bf16 %v3132_v32, %v884_v33 }
 0x121   : > { %v749_v52 = vpop.f32.mrb[13].mxu0  ;;  %3642 = vmatpush3.bf16.msra.mxu0 %v3639_v49 }
 0x122   : > { %v3643_v53 = vpack.c.bf16 %v3107_v50, %v749_v52  ;;  %v3135_v54 = vpop.f32.mrb[12].mxu1  ;;  %3672 = vmatprep.subr.bf16.mxu1 %v3671_v51 }
 0x123   : > { %v894_v55 = vpop.f32.mrb[13].mxu1  ;;  %3674 = vmatpush3.bf16.msra.mxu1 %v3671_v51 }
 0x124   : > { %v3110_v56 = vpop.f32.mrb[14].mxu0  ;;  %3644 = vmatprep.subr.bf16.mxu0 %v3643_v53  ;;  %v3675_v57 = vpack.c.bf16 %v3135_v54, %v894_v55 }
 0x125   : > { %v759_v58 = vpop.f32.mrb[15].mxu0  ;;  %3646 = vmatpush3.bf16.msra.mxu0 %v3643_v53  ;;  %v431_v53 = vld [vmem:[%s4077_s15 + $0x28] sm:$0xff] }
 0x126   : > { %v3647_v61 = vpack.c.bf16 %v3110_v56, %v759_v58  ;;  %v3138_v62 = vpop.f32.mrb[14].mxu1  ;;  %3676 = vmatprep.subr.bf16.mxu1 %v3675_v57  ;;  %v434_v56 = vld [vmem:[%s4077_s15 + $0x40] sm:$0xff]  ;;  %v433_v58 = vld [vmem:[%s4077_s15 + $0x38] sm:$0xff] }
 0x127   : > { %v904_v0 = vpop.f32.mrb[15].mxu1  ;;  %3678 = vmatpush3.bf16.msra.mxu1 %v3675_v57  ;;  %v452_v1 = vadd.f32 %v4260_v7, %v434_v56  ;;  %v440_v56 = vld [vmem:[%s4077_s15 + $0x70] sm:$0xff] }
 0x128   : > { %v3145_v2 = vpop.f32.mrb[16].mxu0  ;;  %3648 = vmatprep.subr.bf16.mxu0 %v3647_v61  ;;  %v3679_v4 = vpack.c.bf16 %v3138_v62, %v904_v0  ;;  %v449_v62 = vadd.f32 %v4273_v60, %v431_v53 }
 0x129   : > { %v979_v6 = vpop.f32.mrb[17].mxu0  ;;  %3650 = vmatpush3.bf16.msra.mxu0 %v3647_v61 }
 0x12a   : > { %v3683_v9 = vpack.c.bf16 %v3145_v2, %v979_v6  ;;  %v3173_v10 = vpop.f32.mrb[16].mxu1  ;;  %3680 = vmatprep.subr.bf16.mxu1 %v3679_v4  ;;  %v454_v6 = vadd.f32 %v4260_v7, %v436_v63 }
 0x12b   : > { %v1124_v12 = vpop.f32.mrb[17].mxu1  ;;  %3682 = vmatpush3.bf16.msra.mxu1 %v3679_v4  ;;  %v451_v4 = vadd.f32 %v4273_v60, %v433_v58 }
 0x12c   : > { %v3148_v14 = vpop.f32.mrb[18].mxu0  ;;  %3340 = vmatmul.mubr.f32.vlgmr.msra.gmra.mrb[64].mxu0 %v445_v3  ;;  %3684 = vmatprep.subr.bf16.mxu0 %v3683_v9  ;;  %v3715_v15 = vpack.c.bf16 %v3173_v10, %v1124_v12 }
 0x12d   : > { %v989_v16 = vpop.f32.mrb[19].mxu0  ;;  %3686 = vmatpush3.bf16.msra.mxu0 %v3683_v9  ;;  %3409 = vmatprep.mubr.f32.mxu0 %v448_v8 }
 0x12e   : > { %v3687_v17 = vpack.c.bf16 %v3148_v14, %v989_v16  ;;  %v3176_v18 = vpop.f32.mrb[18].mxu1  ;;  %3716 = vmatprep.subr.bf16.mxu1 %v3715_v15  ;;  %3375 = vmatmul.mubr.f32.vlgmr.msra.gmra.mrb[64].mxu1 %v447_v11 }
 0x12f   : > { %v1134_v19 = vpop.f32.mrb[19].mxu1  ;;  %3718 = vmatpush3.bf16.msra.mxu1 %v3715_v15  ;;  %3444 = vmatprep.mubr.f32.mxu1 %v450_v13 }
 0x130   : > { %v3151_v20 = vpop.f32.mrb[20].mxu0  ;;  %3688 = vmatprep.subr.bf16.mxu0 %v3687_v17  ;;  %v3719_v21 = vpack.c.bf16 %v3176_v18, %v1134_v19 }
 0x131   : > { %v999_v22 = vpop.f32.mrb[21].mxu0  ;;  %3690 = vmatpush3.bf16.msra.mxu0 %v3687_v17 }
 0x132   : > { %v3691_v23 = vpack.c.bf16 %v3151_v20, %v999_v22  ;;  %v3179_v24 = vpop.f32.mrb[20].mxu1  ;;  %3720 = vmatprep.subr.bf16.mxu1 %v3719_v21 }
 0x133   : > { %v1144_v25 = vpop.f32.mrb[21].mxu1  ;;  %3722 = vmatpush3.bf16.msra.mxu1 %v3719_v21 }
 0x134   : > { %v3154_v26 = vpop.f32.mrb[22].mxu0  ;;  %3692 = vmatprep.subr.bf16.mxu0 %v3691_v23  ;;  %v3723_v27 = vpack.c.bf16 %v3179_v24, %v1144_v25 }
 0x135   : > { %v1009_v28 = vpop.f32.mrb[23].mxu0  ;;  %3694 = vmatpush3.bf16.msra.mxu0 %v3691_v23 }
 0x136   : > { %v3695_v29 = vpack.c.bf16 %v3154_v26, %v1009_v28  ;;  %v3182_v30 = vpop.f32.mrb[22].mxu1  ;;  %3724 = vmatprep.subr.bf16.mxu1 %v3723_v27 }
 0x137   : > { %v1154_v31 = vpop.f32.mrb[23].mxu1  ;;  %3726 = vmatpush3.bf16.msra.mxu1 %v3723_v27 }
 0x138   : > { %v3157_v34 = vpop.f32.mrb[24].mxu0  ;;  %3696 = vmatprep.subr.bf16.mxu0 %v3695_v29  ;;  %v3727_v35 = vpack.c.bf16 %v3182_v30, %v1154_v31 }
 0x139   : > { %v1019_v36 = vpop.f32.mrb[25].mxu0  ;;  %3698 = vmatpush3.bf16.msra.mxu0 %v3695_v29 }
 0x13a   : > { %v3699_v37 = vpack.c.bf16 %v3157_v34, %v1019_v36  ;;  %v3185_v38 = vpop.f32.mrb[24].mxu1  ;;  %3728 = vmatprep.subr.bf16.mxu1 %v3727_v35 }
 0x13b   : > { %v1164_v39 = vpop.f32.mrb[25].mxu1  ;;  %3730 = vmatpush3.bf16.msra.mxu1 %v3727_v35 }
 0x13c   : > { %v3160_v40 = vpop.f32.mrb[26].mxu0  ;;  %3700 = vmatprep.subr.bf16.mxu0 %v3699_v37  ;;  %v3731_v41 = vpack.c.bf16 %v3185_v38, %v1164_v39 }
 0x13d   : > { %v1029_v42 = vpop.f32.mrb[27].mxu0  ;;  %3702 = vmatpush3.bf16.msra.mxu0 %v3699_v37 }
 0x13e   : > { %v3703_v43 = vpack.c.bf16 %v3160_v40, %v1029_v42  ;;  %v3188_v44 = vpop.f32.mrb[26].mxu1  ;;  %3732 = vmatprep.subr.bf16.mxu1 %v3731_v41 }
 0x13f   : > { %v1174_v45 = vpop.f32.mrb[27].mxu1  ;;  %3734 = vmatpush3.bf16.msra.mxu1 %v3731_v41 }
 0x140   : > { %v3163_v46 = vpop.f32.mrb[28].mxu0  ;;  %3704 = vmatprep.subr.bf16.mxu0 %v3703_v43  ;;  %v3735_v47 = vpack.c.bf16 %v3188_v44, %v1174_v45 }
 0x141   : > { %v1039_v48 = vpop.f32.mrb[29].mxu0  ;;  %3706 = vmatpush3.bf16.msra.mxu0 %v3703_v43 }
 0x142   : > { %v3707_v49 = vpack.c.bf16 %v3163_v46, %v1039_v48  ;;  %v3191_v32 = vpop.f32.mrb[28].mxu1  ;;  %3736 = vmatprep.subr.bf16.mxu1 %v3735_v47 }
 0x143   : > { %v1184_v33 = vpop.f32.mrb[29].mxu1  ;;  %3738 = vmatpush3.bf16.msra.mxu1 %v3735_v47 }
 0x144   : > { %v3166_v50 = vpop.f32.mrb[30].mxu0  ;;  %3708 = vmatprep.subr.bf16.mxu0 %v3707_v49  ;;  %v3739_v51 = vpack.c.bf16 %v3191_v32, %v1184_v33 }
 0x145   : > { %v1049_v52 = vpop.f32.mrb[31].mxu0  ;;  %3710 = vmatpush3.bf16.msra.mxu0 %v3707_v49  ;;  %v435_v49 = vld [vmem:[%s4077_s15 + $0x48] sm:$0xff] }
 0x146   : > { %v3711_v54 = vpack.c.bf16 %v3166_v50, %v1049_v52  ;;  %v3194_v55 = vpop.f32.mrb[30].mxu1  ;;  %3740 = vmatprep.subr.bf16.mxu1 %v3739_v51  ;;  %v438_v50 = vld [vmem:[%s4077_s15 + $0x60] sm:$0xff]  ;;  %v437_v52 = vld [vmem:[%s4077_s15 + $0x58] sm:$0xff] }
 0x147   : > { %v1194_v57 = vpop.f32.mrb[31].mxu1  ;;  %3742 = vmatpush3.bf16.msra.mxu1 %v3739_v51  ;;  %v456_v58 = vadd.f32 %v4260_v7, %v438_v50 }
 0x148   : > { %v3201_v59 = vpop.f32.mrb[32].mxu0  ;;  %3712 = vmatprep.subr.bf16.mxu0 %v3711_v54  ;;  %v3743_v61 = vpack.c.bf16 %v3194_v55, %v1194_v57  ;;  %v453_v55 = vadd.f32 %v4273_v60, %v435_v49 }
 0x149   : > { %v1269_v0 = vpop.f32.mrb[33].mxu0  ;;  %3714 = vmatpush3.bf16.msra.mxu0 %v3711_v54 }
 0x14a   : > { %v3747_v2 = vpack.c.bf16 %v3201_v59, %v1269_v0  ;;  %v3229_v3 = vpop.f32.mrb[32].mxu1  ;;  %3744 = vmatprep.subr.bf16.mxu1 %v3743_v61  ;;  %v458_v0 = vadd.f32 %v4260_v7, %v440_v56 }
 0x14b   : > { %v1414_v5 = vpop.f32.mrb[33].mxu1  ;;  %3746 = vmatpush3.bf16.msra.mxu1 %v3743_v61 }
 0x14c   : > { %v3204_v8 = vpop.f32.mrb[34].mxu0  ;;  %3748 = vmatprep.subr.bf16.mxu0 %v3747_v2  ;;  %3410 = vmatmul.mubr.f32.vlgmr.msra.gmra.mrb[66].mxu0 %v449_v62  ;;  %v3779_v9 = vpack.c.bf16 %v3229_v3, %v1414_v5  ;;  %v455_v62 = vadd.f32 %v4273_v60, %v437_v52 }
 0x14d   : > { %v1279_v10 = vpop.f32.mrb[35].mxu0  ;;  %3750 = vmatpush3.bf16.msra.mxu0 %v3747_v2  ;;  %3479 = vmatprep.mubr.f32.mxu0 %v452_v1 }
 0x14e   : > { %v3751_v11 = vpack.c.bf16 %v3204_v8, %v1279_v10  ;;  %v3232_v12 = vpop.f32.mrb[34].mxu1  ;;  %3780 = vmatprep.subr.bf16.mxu1 %v3779_v9  ;;  %3445 = vmatmul.mubr.f32.vlgmr.msra.gmra.mrb[66].mxu1 %v451_v4 }
 0x14f   : > { %v1424_v13 = vpop.f32.mrb[35].mxu1  ;;  %3782 = vmatpush3.bf16.msra.mxu1 %v3779_v9  ;;  %3514 = vmatprep.mubr.f32.mxu1 %v454_v6 }
 0x150   : > { %v3207_v14 = vpop.f32.mrb[36].mxu0  ;;  %3752 = vmatprep.subr.bf16.mxu0 %v3751_v11  ;;  %v3783_v15 = vpack.c.bf16 %v3232_v12, %v1424_v13 }
 0x151   : > { %v1289_v16 = vpop.f32.mrb[37].mxu0  ;;  %3754 = vmatpush3.bf16.msra.mxu0 %v3751_v11 }
 0x152   : > { %v3755_v17 = vpack.c.bf16 %v3207_v14, %v1289_v16  ;;  %v3235_v18 = vpop.f32.mrb[36].mxu1  ;;  %3784 = vmatprep.subr.bf16.mxu1 %v3783_v15 }
 0x153   : > { %v1434_v19 = vpop.f32.mrb[37].mxu1  ;;  %3786 = vmatpush3.bf16.msra.mxu1 %v3783_v15 }
 0x154   : > { %v3210_v20 = vpop.f32.mrb[38].mxu0  ;;  %3756 = vmatprep.subr.bf16.mxu0 %v3755_v17  ;;  %v3787_v21 = vpack.c.bf16 %v3235_v18, %v1434_v19 }
 0x155   : > { %v1299_v22 = vpop.f32.mrb[39].mxu0  ;;  %3758 = vmatpush3.bf16.msra.mxu0 %v3755_v17 }
 0x156   : > { %v3759_v23 = vpack.c.bf16 %v3210_v20, %v1299_v22  ;;  %v3238_v24 = vpop.f32.mrb[38].mxu1  ;;  %3788 = vmatprep.subr.bf16.mxu1 %v3787_v21 }
 0x157   : > { %v1444_v25 = vpop.f32.mrb[39].mxu1  ;;  %3790 = vmatpush3.bf16.msra.mxu1 %v3787_v21 }
 0x158   : > { %v3213_v26 = vpop.f32.mrb[40].mxu0  ;;  %3760 = vmatprep.subr.bf16.mxu0 %v3759_v23  ;;  %v3791_v27 = vpack.c.bf16 %v3238_v24, %v1444_v25 }
 0x159   : > { %v1309_v28 = vpop.f32.mrb[41].mxu0  ;;  %3762 = vmatpush3.bf16.msra.mxu0 %v3759_v23 }
 0x15a   : > { %v3763_v29 = vpack.c.bf16 %v3213_v26, %v1309_v28  ;;  %v3241_v30 = vpop.f32.mrb[40].mxu1  ;;  %3792 = vmatprep.subr.bf16.mxu1 %v3791_v27 }
 0x15b   : > { %v1454_v31 = vpop.f32.mrb[41].mxu1  ;;  %3794 = vmatpush3.bf16.msra.mxu1 %v3791_v27 }
 0x15c   : > { %v3216_v34 = vpop.f32.mrb[42].mxu0  ;;  %3764 = vmatprep.subr.bf16.mxu0 %v3763_v29  ;;  %v3795_v35 = vpack.c.bf16 %v3241_v30, %v1454_v31 }
 0x15d   : > { %v1319_v36 = vpop.f32.mrb[43].mxu0  ;;  %3766 = vmatpush3.bf16.msra.mxu0 %v3763_v29 }
 0x15e   : > { %v3767_v37 = vpack.c.bf16 %v3216_v34, %v1319_v36  ;;  %v3244_v38 = vpop.f32.mrb[42].mxu1  ;;  %3796 = vmatprep.subr.bf16.mxu1 %v3795_v35 }
 0x15f   : > { %v1464_v39 = vpop.f32.mrb[43].mxu1  ;;  %3798 = vmatpush3.bf16.msra.mxu1 %v3795_v35 }
 0x160   : > { %v3219_v40 = vpop.f32.mrb[44].mxu0  ;;  %3768 = vmatprep.subr.bf16.mxu0 %v3767_v37  ;;  %v3799_v41 = vpack.c.bf16 %v3244_v38, %v1464_v39 }
 0x161   : > { %v1329_v42 = vpop.f32.mrb[45].mxu0  ;;  %3770 = vmatpush3.bf16.msra.mxu0 %v3767_v37 }
 0x162   : > { %v3771_v43 = vpack.c.bf16 %v3219_v40, %v1329_v42  ;;  %v3247_v44 = vpop.f32.mrb[44].mxu1  ;;  %3800 = vmatprep.subr.bf16.mxu1 %v3799_v41  ;;  %v439_v42 = vld [vmem:[%s4077_s15 + $0x68] sm:$0xff] }
 0x163   : > { %v1474_v45 = vpop.f32.mrb[45].mxu1  ;;  %3802 = vmatpush3.bf16.msra.mxu1 %v3799_v41 }
 0x164   : > { %v3222_v46 = vpop.f32.mrb[46].mxu0  ;;  %3772 = vmatprep.subr.bf16.mxu0 %v3771_v43  ;;  %v3803_v47 = vpack.c.bf16 %v3247_v44, %v1474_v45 }
 0x165   : > { %v1339_v48 = vpop.f32.mrb[47].mxu0  ;;  %3774 = vmatpush3.bf16.msra.mxu0 %v3771_v43 }
 0x166   : > { %v3775_v32 = vpack.c.bf16 %v3222_v46, %v1339_v48  ;;  %v3250_v33 = vpop.f32.mrb[46].mxu1  ;;  %3804 = vmatprep.subr.bf16.mxu1 %v3803_v47  ;;  %v441_v46 = vld [vmem:[%s4077_s15 + $0x78] sm:$0xff] }
 0x167   : > { %v1484_v51 = vpop.f32.mrb[47].mxu1  ;;  %3806 = vmatpush3.bf16.msra.mxu1 %v3803_v47  ;;  %v457_v47 = vadd.f32 %v4273_v60, %v439_v42  ;;  %v459_v49 = vadd.f32 %v4273_v60, %v441_v46  ;;  %v2459_v42 = vld [vmem:[%s421_s6] sm:$0xff] }
 0x168   : > { %v3257_v53 = vpop.f32.mrb[48].mxu0  ;;  %3776 = vmatprep.subr.bf16.mxu0 %v3775_v32  ;;  %v3807_v54 = vpack.c.bf16 %v3250_v33, %v1484_v51  ;;  %v2383_v33 = vlaneseq }
 0x169   : > { %v1559_v57 = vpop.f32.mrb[49].mxu0  ;;  %3778 = vmatpush3.bf16.msra.mxu0 %v3775_v32  ;;  %v3927_v32 = vmov 0  }
 0x16a   : > { %v3811_v59 = vpack.c.bf16 %v3257_v53, %v1559_v57  ;;  %v3285_v61 = vpop.f32.mrb[48].mxu1  ;;  %3808 = vmatprep.subr.bf16.mxu1 %v3807_v54  ;;  %3901 = vset.pattern.permute.xlu0 %v3927_v32  ;;  %v4302_v50 = vshrl.u32 %v2383_v33, 7  ;;  %v4305_v52 = vand.u32 127, %v2383_v33  ;;  %v3928_v53 = vmov 0.0  }
 0x16b   : > { %v1704_v63 = vpop.f32.mrb[49].mxu1  ;;  %3810 = vmatpush3.bf16.msra.mxu1 %v3807_v54  ;;  %3902 = vset.pattern.permute.xlu1 %v3927_v32 }
 0x16c   : > { %v3260_v1 = vpop.f32.mrb[50].mxu0  ;;  %3812 = vmatprep.subr.bf16.mxu0 %v3811_v59  ;;  %3480 = vmatmul.mubr.f32.vlgmr.msra.gmra.mrb[68].mxu0 %v453_v55  ;;  %v3843_v2 = vpack.c.bf16 %v3285_v61, %v1704_v63  ;;  %v2385_v51 = vadd.s32 8, %v4302_v50  ;;  %vm2388_vm1 = vcmp.eq.s32.totalorder %v4302_v50, %v4305_v52 }
 0x16d   : > { %v1569_v3 = vpop.f32.mrb[51].mxu0  ;;  %3814 = vmatpush3.bf16.msra.mxu0 %v3811_v59  ;;  %3549 = vmatprep.mubr.f32.mxu0 %v456_v58  ;;  %v2788_v55 = vsel %vm2388_vm1, 1.0, %v3928_v53 }
 0x16e   : > { %v3815_v4 = vpack.c.bf16 %v3260_v1, %v1569_v3  ;;  %v3288_v5 = vpop.f32.mrb[50].mxu1  ;;  %3844 = vmatprep.subr.bf16.mxu1 %v3843_v2  ;;  %3515 = vmatmul.mubr.f32.vlgmr.msra.gmra.mrb[68].mxu1 %v455_v62  ;;  %vm2389_vm0 = vcmp.eq.s32.totalorder %v2385_v51, %v4305_v52 }
 0x16f   : > { %v1714_v6 = vpop.f32.mrb[51].mxu1  ;;  %3846 = vmatpush3.bf16.msra.mxu1 %v3843_v2  ;;  %3584 = vmatprep.mubr.f32.mxu1 %v458_v0  ;;  %v2789_v60 = vsel %vm2389_vm0, 1.0, %v3928_v53 }
 0x170   : > { %v3263_v8 = vpop.f32.mrb[52].mxu0  ;;  %3816 = vmatprep.subr.bf16.mxu0 %v3815_v4  ;;  %v3847_v9 = vpack.c.bf16 %v3288_v5, %v1714_v6 }
 0x171   : > { %v1579_v10 = vpop.f32.mrb[53].mxu0  ;;  %3818 = vmatpush3.bf16.msra.mxu0 %v3815_v4 }
 0x172   : > { %v3819_v7 = vpack.c.bf16 %v3263_v8, %v1579_v10  ;;  %v3291_v11 = vpop.f32.mrb[52].mxu1  ;;  %3848 = vmatprep.subr.bf16.mxu1 %v3847_v9 }
 0x173   : > { %v1724_v12 = vpop.f32.mrb[53].mxu1  ;;  %3850 = vmatpush3.bf16.msra.mxu1 %v3847_v9 }
 0x174   : > { %v3266_v13 = vpop.f32.mrb[54].mxu0  ;;  %3820 = vmatprep.subr.bf16.mxu0 %v3819_v7  ;;  %v3851_v14 = vpack.c.bf16 %v3291_v11, %v1724_v12 }
 0x175   : > { %v1589_v15 = vpop.f32.mrb[55].mxu0  ;;  %3822 = vmatpush3.bf16.msra.mxu0 %v3819_v7 }
 0x176   : > { %v3823_v16 = vpack.c.bf16 %v3266_v13, %v1589_v15  ;;  %v3294_v17 = vpop.f32.mrb[54].mxu1  ;;  %3852 = vmatprep.subr.bf16.mxu1 %v3851_v14 }
 0x177   : > { %v1734_v18 = vpop.f32.mrb[55].mxu1  ;;  %3854 = vmatpush3.bf16.msra.mxu1 %v3851_v14 }
 0x178   : > { %v3269_v19 = vpop.f32.mrb[56].mxu0  ;;  %3824 = vmatprep.subr.bf16.mxu0 %v3823_v16  ;;  %v3855_v20 = vpack.c.bf16 %v3294_v17, %v1734_v18 }
 0x179   : > { %v1599_v21 = vpop.f32.mrb[57].mxu0  ;;  %3826 = vmatpush3.bf16.msra.mxu0 %v3823_v16 }
 0x17a   : > { %v3827_v22 = vpack.c.bf16 %v3269_v19, %v1599_v21  ;;  %v3297_v23 = vpop.f32.mrb[56].mxu1  ;;  %3856 = vmatprep.subr.bf16.mxu1 %v3855_v20 }
 0x17b   : > { %v1744_v24 = vpop.f32.mrb[57].mxu1  ;;  %3858 = vmatpush3.bf16.msra.mxu1 %v3855_v20 }
 0x17c   : > { %v3272_v25 = vpop.f32.mrb[58].mxu0  ;;  %3828 = vmatprep.subr.bf16.mxu0 %v3827_v22  ;;  %v3859_v26 = vpack.c.bf16 %v3297_v23, %v1744_v24 }
 0x17d   : > { %v1609_v27 = vpop.f32.mrb[59].mxu0  ;;  %3830 = vmatpush3.bf16.msra.mxu0 %v3827_v22 }
 0x17e   : > { %v3831_v28 = vpack.c.bf16 %v3272_v25, %v1609_v27  ;;  %v3300_v29 = vpop.f32.mrb[58].mxu1  ;;  %3860 = vmatprep.subr.bf16.mxu1 %v3859_v26 }
 0x17f   : > { %v1754_v30 = vpop.f32.mrb[59].mxu1  ;;  %3862 = vmatpush3.bf16.msra.mxu1 %v3859_v26 }
 0x180   : > { %v3275_v31 = vpop.f32.mrb[60].mxu0  ;;  %3832 = vmatprep.subr.bf16.mxu0 %v3831_v28  ;;  %v3863_v34 = vpack.c.bf16 %v3300_v29, %v1754_v30 }
 0x181   : > { %v1619_v35 = vpop.f32.mrb[61].mxu0  ;;  %3834 = vmatpush3.bf16.msra.mxu0 %v3831_v28 }
 0x182   : > { %v3835_v36 = vpack.c.bf16 %v3275_v31, %v1619_v35  ;;  %v3303_v37 = vpop.f32.mrb[60].mxu1  ;;  %3864 = vmatprep.subr.bf16.mxu1 %v3863_v34 }
 0x183   : > { %v1764_v38 = vpop.f32.mrb[61].mxu1  ;;  %3866 = vmatpush3.bf16.msra.mxu1 %v3863_v34 }
 0x184   : > { %v3278_v39 = vpop.f32.mrb[62].mxu0  ;;  %3836 = vmatprep.subr.bf16.mxu0 %v3835_v36  ;;  %v3867_v40 = vpack.c.bf16 %v3303_v37, %v1764_v38 }
 0x185   : > { %v1629_v41 = vpop.f32.mrb[63].mxu0  ;;  %3838 = vmatpush3.bf16.msra.mxu0 %v3835_v36 }
 0x186   : > { %v3839_v43 = vpack.c.bf16 %v3278_v39, %v1629_v41  ;;  %v3306_v44 = vpop.f32.mrb[62].mxu1  ;;  %3868 = vmatprep.subr.bf16.mxu1 %v3867_v40 }
 0x187   : > { %v1774_v45 = vpop.f32.mrb[63].mxu1  ;;  %3870 = vmatpush3.bf16.msra.mxu1 %v3867_v40 }
 0x188   : > { %3840 = vmatprep.subr.bf16.mxu0 %v3839_v43  ;;  %v3871_v48 = vpack.c.bf16 %v3306_v44, %v1774_v45 }
 0x189   : > { %3842 = vmatpush3.bf16.msra.mxu0 %v3839_v43 }
 0x18a   : > { %3872 = vmatprep.subr.bf16.mxu1 %v3871_v48 }
 0x18b   : > { %3874 = vmatpush3.bf16.msra.mxu1 %v3871_v48 }
 0x18c   : > { %3550 = vmatmul.mubr.f32.vlgmr.msra.gmra.mrb[70].mxu0 %v457_v47 }
 0x18e   : > { %3585 = vmatmul.mubr.f32.vlgmr.msra.gmra.mrb[70].mxu1 %v459_v49 }
 0x1ff   : > { %v3341_v54 = vpop.f32.mrb[64].mxu0 }
 0x200   : > { %v2395_v56 = vmul.f32 %v3341_v54, %v2789_v60  ;;  %v1849_v57 = vpop.f32.mrb[65].mxu0  ;;  %v2478_v54 = vsub.s32 3, %v4302_v50 }
 0x201   : > { %v3376_v58 = vpop.f32.mrb[64].mxu1  ;;  %v2394_v59 = vmul.f32 %v2788_v55, %v1849_v57  ;;  %v2470_v57 = vsub.s32 1, %v4302_v50 }
 0x202   : > { %v2414_v61 = vsel %vm2410_vm2, %v2395_v56, 0.0  ;;  %v2397_v62 = vmul.f32 %v3376_v58, %v2789_v60  ;;  %v1924_v63 = vpop.f32.mrb[65].mxu1  ;;  %v2482_v56 = vsub.s32 4, %v4302_v50 }
 0x203   : > { %2415 = vadd.xlane.f32.xlu0 %v2414_v61  ;;  %v2396_v0 = vmul.f32 %v2788_v55, %v1924_v63  ;;  %v2411_v2 = vsel %vm2410_vm2, %v2394_v59, 0.0  ;;  %v2486_v63 = vsub.s32 5, %v4302_v50 }
 0x204   : > { %v2420_v1 = vsel %vm2410_vm2, %v2397_v62, 0.0 }
 0x205   : > { %2421 = vadd.xlane.f32.xlu1 %v2420_v1  ;;  %v2417_v3 = vsel %vm2410_vm2, %v2396_v0, 0.0 }
 0x207   : > { %2412 = vadd.xlane.f32.xlu0 %v2411_v2 }
 0x209   : > { %2418 = vadd.xlane.f32.xlu1 %v2417_v3 }
 0x21f   : > { %v3411_v4 = vpop.f32.mrb[66].mxu0 }
 0x220   : > { %v2399_v5 = vmul.f32 %v3411_v4, %v2789_v60  ;;  %v1999_v6 = vpop.f32.mrb[67].mxu0 }
 0x221   : > { %v2398_v8 = vmul.f32 %v2788_v55, %v1999_v6  ;;  %v3446_v9 = vpop.f32.mrb[66].mxu1 }
 0x222   : > { %v2426_v10 = vsel %vm2410_vm2, %v2399_v5, 0.0  ;;  %v2401_v7 = vmul.f32 %v3446_v9, %v2789_v60  ;;  %v2074_v11 = vpop.f32.mrb[67].mxu1  ;;  %v2490_v9 = vsub.s32 6, %v4302_v50 }
 0x223   : > { %2427 = vadd.xlane.f32.xlu1 %v2426_v10  ;;  %v2423_v12 = vsel %vm2410_vm2, %v2398_v8, 0.0  ;;  %v2400_v13 = vmul.f32 %v2788_v55, %v2074_v11 }
 0x224   : > { %2424 = vadd.xlane.f32.xlu0 %v2423_v12  ;;  %v2432_v14 = vsel %vm2410_vm2, %v2401_v7, 0.0  ;;  %v2494_v7 = vsub.s32 7, %v4302_v50 }
 0x225   : > { %v2429_v15 = vsel %vm2410_vm2, %v2400_v13, 0.0 }
 0x227   : > { %2433 = vadd.xlane.f32.xlu1 %v2432_v14  ;;  %v2474_v14 = vsub.s32 2, %v4302_v50 }
 0x228   : > { %2430 = vadd.xlane.f32.xlu0 %v2429_v15 }
 0x23f   : > { %v3481_v16 = vpop.f32.mrb[68].mxu0 }
 0x240   : > { %v2403_v17 = vmul.f32 %v3481_v16, %v2789_v60  ;;  %v2149_v18 = vpop.f32.mrb[69].mxu0 }
 0x241   : > { %v2402_v19 = vmul.f32 %v2788_v55, %v2149_v18  ;;  %v3516_v20 = vpop.f32.mrb[68].mxu1 }
 0x242   : > { %v2438_v21 = vsel %vm2410_vm2, %v2403_v17, 0.0  ;;  %v2405_v22 = vmul.f32 %v3516_v20, %v2789_v60  ;;  %v2224_v23 = vpop.f32.mrb[69].mxu1 }
 0x243   : > { %2439 = vadd.xlane.f32.xlu1 %v2438_v21  ;;  %v2435_v24 = vsel %vm2410_vm2, %v2402_v19, 0.0  ;;  %v2404_v25 = vmul.f32 %v2788_v55, %v2224_v23 }
 0x244   : > { %2436 = vadd.xlane.f32.xlu0 %v2435_v24  ;;  %v2444_v26 = vsel %vm2410_vm2, %v2405_v22, 0.0 }
 0x245   : > { %v2441_v27 = vsel %vm2410_vm2, %v2404_v25, 0.0 }
 0x247   : > { %2445 = vadd.xlane.f32.xlu1 %v2444_v26 }
 0x248   : > { %2442 = vadd.xlane.f32.xlu0 %v2441_v27 }
 0x25f   : > { %v3551_v28 = vpop.f32.mrb[70].mxu0 }
 0x260   : > { %v2407_v29 = vmul.f32 %v3551_v28, %v2789_v60  ;;  %v2299_v30 = vpop.f32.mrb[71].mxu0 }
 0x261   : > { %v2406_v31 = vmul.f32 %v2788_v55, %v2299_v30  ;;  %v3586_v34 = vpop.f32.mrb[70].mxu1 }
 0x262   : > { %v2450_v35 = vsel %vm2410_vm2, %v2407_v29, 0.0  ;;  %v2409_v36 = vmul.f32 %v3586_v34, %v2789_v60  ;;  %v2374_v37 = vpop.f32.mrb[71].mxu1 }
 0x263   : > { %2451 = vadd.xlane.f32.xlu1 %v2450_v35  ;;  %v2447_v38 = vsel %vm2410_vm2, %v2406_v31, 0.0  ;;  %v2408_v39 = vmul.f32 %v2788_v55, %v2374_v37  ;;  %v2466_v55 = vsub.s32 0, %v4302_v50 }
 0x264   : > { %2448 = vadd.xlane.f32.xlu0 %v2447_v38  ;;  %v2456_v40 = vsel %vm2410_vm2, %v2409_v36, 0.0 }
 0x265   : > { %v2453_v41 = vsel %vm2410_vm2, %v2408_v39, 0.0  ;;  %v2588_v39 = vadd.s32 4294967288, %v4305_v52 }
 0x267   : > { %2457 = vadd.xlane.f32.xlu1 %v2456_v40 }
 0x26b   : > { %2454 = vadd.xlane.f32.xlu1 %v2453_v41  ;;  %v2586_v41 = vsub.s32 %v4305_v52, %v4302_v50 }
 0x27a   : > { %2462 = vperm.xlu0 %3901, %v2459_v42  }
 0x290   : > { %v2416_v43 = vpop.xlane.xlu0 %2415 }
 0x292   : > { %v2422_v45 = vpop.xlane.xlu1 %2421 }
 0x294   : > { %v2413_v44 = vpop.xlane.xlu0 %2412 }
 0x296   : > { %v2419_v47 = vpop.xlane.xlu1 %2418 }
 0x2b0   : > { %v2428_v49 = vpop.xlane.xlu1 %2427 }
 0x2b1   : > { %v2425_v46 = vpop.xlane.xlu0 %2424 }
 0x2b4   : > { %v2434_v33 = vpop.xlane.xlu1 %2433 }
 0x2b5   : > { %v2431_v48 = vpop.xlane.xlu0 %2430 }
 0x2d0   : > { %v2440_v53 = vpop.xlane.xlu1 %2439 }
 0x2d1   : > { %v2437_v32 = vpop.xlane.xlu0 %2436 }
 0x2d4   : > { %v2446_v58 = vpop.xlane.xlu1 %2445 }
 0x2d5   : > { %v2443_v51 = vpop.xlane.xlu0 %2442 }
 0x2f0   : > { %v2452_v4 = vpop.xlane.xlu1 %2451 }
 0x2f1   : > { %v2449_v60 = vpop.xlane.xlu0 %2448 }
 0x2f4   : > { %v2458_v10 = vpop.xlane.xlu1 %2457 }
 0x2f8   : > { %v2455_v19 = vpop.xlane.xlu1 %2454 }
 0x2f9   : > { %v2463_v59 = vpop.permute.xlu0 %2462 }
 0x2fa   : > { %v2479_v61 = vrot.slane %v2463_v59, %v2478_v54  ;;  %v2467_v62 = vrot.slane %v2463_v59, %v2466_v55  ;;  %v2483_v2 = vrot.slane %v2463_v59, %v2482_v56  ;;  %v2471_v3 = vrot.slane %v2463_v59, %v2470_v57 }
 0x2fb   : > { %v2487_v8 = vrot.slane %v2463_v59, %v2486_v63  ;;  %v2491_v13 = vrot.slane %v2463_v59, %v2490_v9  ;;  %v2495_v15 = vrot.slane %v2463_v59, %v2494_v7  ;;  %v2475_v18 = vrot.slane %v2463_v59, %v2474_v14 }
 0x2fc   : > { %v2510_v0 = vadd.f32 %v2479_v61, %v2431_v48  ;;  %v2505_v1 = vadd.f32 %v2467_v62, %v2416_v43  ;;  %v2512_v5 = vadd.f32 %v2483_v2, %v2437_v32  ;;  %v2507_v6 = vadd.f32 %v2471_v3, %v2422_v45 }
 0x2fd   : > { %v2514_v11 = vadd.f32 %v2487_v8, %v2443_v51  ;;  %v2504_v12 = vadd.f32 %v2467_v62, %v2413_v44  ;;  %v2516_v16 = vadd.f32 %v2491_v13, %v2449_v60  ;;  %v2506_v17 = vadd.f32 %v2471_v3, %v2419_v47 }
 0x2fe   : > { %2555 = vperm.xlu0 %3901, %v2510_v0   ;;  %2540 = vperm.xlu1 %3902, %v2505_v1   ;;  %v2518_v20 = vadd.f32 %v2495_v15, %v2455_v19  ;;  %v2509_v21 = vadd.f32 %v2475_v18, %v2428_v49  ;;  %v2511_v22 = vadd.f32 %v2479_v61, %v2434_v33 }
 0x2ff   : > { %v2508_v23 = vadd.f32 %v2475_v18, %v2425_v46  ;;  %v2513_v24 = vadd.f32 %v2483_v2, %v2440_v53  ;;  %v2515_v25 = vadd.f32 %v2487_v8, %v2446_v58  ;;  %v2517_v26 = vadd.f32 %v2491_v13, %v2452_v4 }
 0x300   : > { %v2519_v27 = vadd.f32 %v2495_v15, %v2458_v10  ;;  %v2591_v43 = vsub.s32 %v2588_v39, %v4302_v50 }
 0x302   : > { %2561 = vperm.xlu0 %3901, %v2512_v5   ;;  %2546 = vperm.xlu1 %3902, %v2507_v6  }
 0x306   : > { %2567 = vperm.xlu0 %3901, %v2514_v11   ;;  %2537 = vperm.xlu1 %3902, %v2504_v12  }
 0x30a   : > { %2573 = vperm.xlu0 %3901, %v2516_v16   ;;  %2543 = vperm.xlu1 %3902, %v2506_v17  }
 0x30e   : > { %2579 = vperm.xlu0 %3901, %v2518_v20   ;;  %2552 = vperm.xlu1 %3902, %v2509_v21  }
 0x312   : > { %2558 = vperm.xlu1 %3902, %v2511_v22  }
 0x316   : > { %2549 = vperm.xlu1 %3902, %v2508_v23  }
 0x31a   : > { %2564 = vperm.xlu1 %3902, %v2513_v24  }
 0x31e   : > { %2570 = vperm.xlu1 %3902, %v2515_v25  }
 0x322   : > { %2576 = vperm.xlu1 %3902, %v2517_v26  }
 0x326   : > { %2582 = vperm.xlu1 %3902, %v2519_v27  }
 0x37d   : > { %v2541_v28 = vpop.permute.xlu1 %2540  ;;  %v2556_v34 = vpop.permute.xlu0 %2555 }
 0x37e   : > { %v2592_v33 = vrot.slane %v2541_v28, %v2591_v43  ;;  %v2616_v58 = vrot.slane %v2556_v34, %v2586_v41 }
 0x381   : > { %v2547_v29 = vpop.permute.xlu1 %2546  ;;  %v2562_v36 = vpop.permute.xlu0 %2561 }
 0x382   : > { %v2602_v46 = vrot.slane %v2547_v29, %v2591_v43  ;;  %v2625_v55 = vrot.slane %v2562_v36, %v2586_v41 }
 0x385   : > { %v2538_v30 = vpop.permute.xlu1 %2537  ;;  %v2568_v40 = vpop.permute.xlu0 %2567 }
 0x386   : > { %v2587_v47 = vrot.slane %v2538_v30, %v2586_v41  ;;  %v2634_v59 = vrot.slane %v2568_v40, %v2586_v41 }
 0x388   : > { %v2594_v52 = vsel %vm2593_vm3, %v2592_v33, %v2587_v47 }
 0x389   : > { %v2544_v31 = vpop.permute.xlu1 %2543  ;;  %v2574_v48 = vpop.permute.xlu0 %2573 }
 0x38a   : > { %v2598_v44 = vrot.slane %v2544_v31, %v2586_v41  ;;  %v2643_v63 = vrot.slane %v2574_v48, %v2586_v41 }
 0x38c   : > { %v2603_v51 = vsel %vm2593_vm3, %v2602_v46, %v2598_v44 }
 0x38d   : > { %v2553_v35 = vpop.permute.xlu1 %2552  ;;  %v2659_v56 = vsel %vm2658_vm4, %v2603_v51, %v2594_v52  ;;  %v2580_v0 = vpop.permute.xlu0 %2579 }
 0x38e   : > { %v2611_v49 = vrot.slane %v2553_v35, %v2591_v43  ;;  %v2652_v8 = vrot.slane %v2580_v0, %v2586_v41 }
 0x391   : > { %v2559_v37 = vpop.permute.xlu1 %2558 }
 0x392   : > { %v2620_v54 = vrot.slane %v2559_v37, %v2591_v43 }
 0x394   : > { %v2621_v2 = vsel %vm2593_vm3, %v2620_v54, %v2616_v58 }
 0x395   : > { %v2550_v38 = vpop.permute.xlu1 %2549 }
 0x396   : > { %v2607_v45 = vrot.slane %v2550_v38, %v2586_v41 }
 0x398   : > { %v2612_v53 = vsel %vm2593_vm3, %v2611_v49, %v2607_v45 }
 0x399   : > { %v2565_v42 = vpop.permute.xlu1 %2564  ;;  %v2661_v61 = vsel %vm2660_vm5, %v2612_v53, %v2659_v56 }
 0x39a   : > { %v2629_v60 = vrot.slane %v2565_v42, %v2591_v43  ;;  %v2663_v4 = vsel %vm2662_vm6, %v2621_v2, %v2661_v61 }
 0x39c   : > { %v2630_v1 = vsel %vm2593_vm3, %v2629_v60, %v2625_v55 }
 0x39d   : > { %v2571_v32 = vpop.permute.xlu1 %2570  ;;  %v2665_v9 = vsel %vm2664_vm7, %v2630_v1, %v2663_v4 }
 0x39e   : > { %v2638_v50 = vrot.slane %v2571_v32, %v2591_v43 }
 0x3a0   : > { %v2639_v3 = vsel %vm2593_vm3, %v2638_v50, %v2634_v59 }
 0x3a1   : > { %v2577_v57 = vpop.permute.xlu1 %2576  ;;  %v2667_v7 = vsel %vm2666_vm8, %v2639_v3, %v2665_v9 }
 0x3a2   : > { %v2647_v62 = vrot.slane %v2577_v57, %v2591_v43 }
 0x3a4   : > { %v2648_v5 = vsel %vm2593_vm3, %v2647_v62, %v2643_v63 }
 0x3a5   : > { %v2583_v6 = vpop.permute.xlu1 %2582  ;;  %v2669_v11 = vsel %vm2668_vm9, %v2648_v5, %v2667_v7 }
 0x3a6   : > { %v2656_v10 = vrot.slane %v2583_v6, %v2591_v43 }
 0x3a8   : > { %v2657_v12 = vsel %vm2593_vm3, %v2656_v10, %v2652_v8 }
 0x3a9   : > { %v2671_v13 = vsel %vm2670_vm10, %v2657_v12, %v2669_v11 }
 0x3aa   : > { %2673 = vst.msk [vmem:[%s425_s9] sm:$0xff] %vm2410_vm2, %v2671_v13 }
 0x3ab PF: > { %p12_p10 = scmp.ge.s32.totalorder %s3978_s22, 15   ;;  %s4378_s18 = smov %s3921_s19 }
 0x3ac   : > { %s4379_s19 = smov %s3987_s25  ;;  %s4380_s20 = smov %s3978_s22 }
 0x3ad   :  { %14 = sbr.rel (!%p12_p10) target bundleno = 2 (0x2), region = 120 }

// kernel: _lambda_.2
= control target key start
LH: loop header
LB: loop body
LE: loop exit
PB: predicated region body
PF: predicated region fallthrough
CT: control target
= control target key end

     0   :  { %s5678_s30 = smov 0   ;;  %s5680_s10 = smov 0   ;;  %s7396_s0 = inlined_call_operand.vmem [shape: f32[2,32,768], index: 0, kind: input, shape index: {}]   ;;  %s7397_s1 = inlined_call_operand.vmem [shape: f32[2,32,20], index: 1, kind: input, shape index: {}]   ;;  %s7398_s2 = inlined_call_operand.vmem [shape: f32[2,16,32], index: 2, kind: input, shape index: {}]   ;;  %s7399_s3 = inlined_call_operand.vmem [shape: f32[2,1664,16], index: 3, kind: input, shape index: {}]   ;;  %s7400_s4 = inlined_call_operand.vmem [shape: f32[768,128], index: 4, kind: input, shape index: {}]   ;;  %s7401_s5 = inlined_call_operand.vmem [shape: f32[1,128], index: 5, kind: input, shape index: {}]   ;;  %s7402_s6 = inlined_call_operand.vmem [shape: f32[128,128], index: 6, kind: input, shape index: {}]   ;;  %s7403_s7 = inlined_call_operand.vmem [shape: f32[20,128], index: 7, kind: input, shape index: {}]   ;;  %s7404_s8 = inlined_call_operand.vmem [shape: f32[1,128], index: 8, kind: input, shape index: {}]   ;;  %s7405_s9 = inlined_call_operand.vmem [shape: f32[208,2,8,128], index: 9, kind: output, shape index: {}]  }
   0x1   :  { %s5682_s11 = smov 0  }
   0x2 LB: > { %s5691_s12 = sadd.s32 4294967295, %s5626_s11   ;;  %s5693_s13 = sadd.s32 1, %s5626_s11   ;;  %s5626_s11 = sphi %s5682_s11, %s7409_s11   ;;  %s5622_s10 = sphi %s5680_s10, %s7408_s10   ;;  %s5618_s30 = sphi %s5678_s30, %s7407_s30  }
   0x3   : > { %s232_s14 = ssub.s32 %s5626_s11, %s5693_s13  ;;  %s235_s15 = sadd.s32 1, %s5622_s10 }
   0x4   : > { %p233_p0 = scmp.eq.s32.totalorder %s232_s14, 0  ;;  %p245_p1 = scmp.ne.s32.totalorder %s5622_s10, %s5618_s30 }
   0x5   : > { %p246_p2 = scmp.eq.s32.totalorder %s5691_s12, 1  ;;  %p4432_p3 = scmp.ge.s32.totalorder %s5626_s11, 1 }
   0x6   : > { %s5701_s16 = scalar_select %p233_p0, %s5622_s10, %s235_s15  }
   0x7   : > { %p5703_p4 = por %p246_p2, %p245_p1  ;;  %p317_p5 = scmp.lt.s32.totalorder %s5626_s11, 3 }
   0x9   : > { %p318_p6 = pnand %p4432_p3, %p317_p5 }
   0xa   : > { %v427_v0 = vld [vmem:[%s7400_s4 + $0x80] sm:$0xff] (!%p318_p6)  ;;  %v428_v1 = vld [vmem:[%s7400_s4 + $0x88] sm:$0xff] (!%p318_p6)  ;;  %v429_v11 = vld [vmem:[%s7400_s4 + $0x90] sm:$0xff] (!%p318_p6)  ;;  %p367_p7 = scmp.lt.s32.totalorder (!%p318_p6), %s5691_s12, 1  ;;  %vm771_vm0 = vcmask (!%p318_p6), 261120   ;;  %vm958_vm1 = vcmask (!%p318_p6), 1043456  }
   0xb   : > { %321 = sbr.rel (%p318_p6) target bundleno = 1301 (0x515), region = 56  ;;  %v411_v2 = vld [vmem:[%s7400_s4] sm:$0xff] (!%p318_p6)  ;;  %v5420_v3 = vpack.c.bf16 (!%p318_p6), %v428_v1, %v427_v0  ;;  %v412_v4 = vld [vmem:[%s7400_s4 + $0x8] sm:$0xff] (!%p318_p6)  ;;  %v430_v13 = vld [vmem:[%s7400_s4 + $0x98] sm:$0xff] (!%p318_p6)  ;;  %vm951_vm2 = vcmask (!%p318_p6), 162816   ;;  %vm1327_vm3 = vcmask (!%p318_p6), 130048  }
   0xc   : > { %v459_v5 = vld [vmem:[%s7400_s4 + $0x180] sm:$0xff] (!%p318_p6)  ;;  %v460_v6 = vld [vmem:[%s7400_s4 + $0x188] sm:$0xff] (!%p318_p6)  ;;  %v5422_v7 = vpack.c.bf16 (!%p318_p6), %v412_v4, %v411_v2  ;;  %v413_v14 = vld [vmem:[%s7400_s4 + $0x10] sm:$0xff] (!%p318_p6)  ;;  %v5424_v16 = vpack.c.bf16 (!%p318_p6), %v430_v13, %v429_v11 }
   0xd   : > { %v5452_v8 = vpack.c.bf16 (!%p318_p6), %v460_v6, %v459_v5  ;;  %v443_v9 = vld [vmem:[%s7400_s4 + $0x100] sm:$0xff] (!%p318_p6)  ;;  %v444_v10 = vld [vmem:[%s7400_s4 + $0x108] sm:$0xff] (!%p318_p6)  ;;  %5421 = vmatprep.subr.bf16.mxu0 (!%p318_p6), %v5420_v3  ;;  %v414_v15 = vld [vmem:[%s7400_s4 + $0x18] sm:$0xff] (!%p318_p6) }
   0xe   : > { %v5454_v12 = vpack.c.bf16 (!%p318_p6), %v444_v10, %v443_v9  ;;  %5423 = vmatpush3.bf16.msra.mxu0 (!%p318_p6), %v5422_v7  ;;  %v5426_v17 = vpack.c.bf16 (!%p318_p6), %v414_v15, %v413_v14  ;;  %v461_v18 = vld [vmem:[%s7400_s4 + $0x190] sm:$0xff] (!%p318_p6)  ;;  %v462_v19 = vld [vmem:[%s7400_s4 + $0x198] sm:$0xff] (!%p318_p6)  ;;  %v431_v23 = vld [vmem:[%s7400_s4 + $0xa0] sm:$0xff] (!%p318_p6) }
   0xf   : > { %5453 = vmatprep.subr.bf16.mxu1 (!%p318_p6), %v5452_v8  ;;  %v445_v20 = vld [vmem:[%s7400_s4 + $0x110] sm:$0xff] (!%p318_p6)  ;;  %v5456_v21 = vpack.c.bf16 (!%p318_p6), %v462_v19, %v461_v18  ;;  %v446_v22 = vld [vmem:[%s7400_s4 + $0x118] sm:$0xff] (!%p318_p6)  ;;  %v432_v24 = vld [vmem:[%s7400_s4 + $0xa8] sm:$0xff] (!%p318_p6)  ;;  %5425 = vmatprep.subr.bf16.mxu0 (!%p318_p6), %v5424_v16 }
  0x10   : > { %5455 = vmatpush3.bf16.msra.mxu1 (!%p318_p6), %v5454_v12  ;;  %v5458_v25 = vpack.c.bf16 (!%p318_p6), %v446_v22, %v445_v20  ;;  %v5428_v26 = vpack.c.bf16 (!%p318_p6), %v432_v24, %v431_v23  ;;  %v415_v27 = vld [vmem:[%s7400_s4 + $0x20] sm:$0xff] (!%p318_p6)  ;;  %v416_v28 = vld [vmem:[%s7400_s4 + $0x28] sm:$0xff] (!%p318_p6)  ;;  %v433_v35 = vld [vmem:[%s7400_s4 + $0xb0] sm:$0xff] (!%p318_p6) }
  0x11   : > { %v463_v29 = vld [vmem:[%s7400_s4 + $0x1a0] sm:$0xff] (!%p318_p6)  ;;  %5457 = vmatprep.subr.bf16.mxu1 (!%p318_p6), %v5456_v21  ;;  %v464_v30 = vld [vmem:[%s7400_s4 + $0x1a8] sm:$0xff] (!%p318_p6)  ;;  %v5430_v33 = vpack.c.bf16 (!%p318_p6), %v416_v28, %v415_v27  ;;  %v434_v36 = vld [vmem:[%s7400_s4 + $0xb8] sm:$0xff] (!%p318_p6) }
  0x12   : > { %v447_v31 = vld [vmem:[%s7400_s4 + $0x120] sm:$0xff]  ;;  %v448_v32 = vld [vmem:[%s7400_s4 + $0x128] sm:$0xff]  ;;  %5427 = vmatpush3.bf16.msra.mxu0 %v5426_v17  ;;  %v5460_v34 = vpack.c.bf16 %v464_v30, %v463_v29  ;;  %v417_v37 = vld [vmem:[%s7400_s4 + $0x30] sm:$0xff]  ;;  %v5432_v39 = vpack.c.bf16 %v434_v36, %v433_v35  ;;  %s5801_s18 = scalar_select %p367_p7, %s5691_s12, 1 }
  0x13   : > { %5429 = vmatprep.subr.bf16.mxu0 %v5428_v26  ;;  %v5462_v38 = vpack.c.bf16 %v448_v32, %v447_v31  ;;  %v418_v40 = vld [vmem:[%s7400_s4 + $0x38] sm:$0xff]  ;;  %v465_v41 = vld [vmem:[%s7400_s4 + $0x1b0] sm:$0xff]  ;;  %v435_v46 = vld [vmem:[%s7400_s4 + $0xc0] sm:$0xff] }
  0x14   : > { %5459 = vmatpush3.bf16.msra.mxu1 %v5458_v25  ;;  %v466_v42 = vld [vmem:[%s7400_s4 + $0x1b8] sm:$0xff]  ;;  %v449_v44 = vld [vmem:[%s7400_s4 + $0x130] sm:$0xff]  ;;  %v436_v47 = vld [vmem:[%s7400_s4 + $0xc8] sm:$0xff]  ;;  %v5434_v48 = vpack.c.bf16 %v418_v40, %v417_v37  ;;  %s5577_s23 = smul.u32 192, %s5801_s18  ;;  %s4660_s24 = sshll.u32 %s5801_s18, 4 }
  0x15   : > { %5461 = vmatprep.subr.bf16.mxu1 %v5460_v34  ;;  %v5464_v43 = vpack.c.bf16 %v466_v42, %v465_v41  ;;  %v450_v45 = vld [vmem:[%s7400_s4 + $0x138] sm:$0xff]  ;;  %v467_v49 = vld [vmem:[%s7400_s4 + $0x1c0] sm:$0xff]  ;;  %v468_v50 = vld [vmem:[%s7400_s4 + $0x1c8] sm:$0xff]  ;;  %v5436_v52 = vpack.c.bf16 %v436_v47, %v435_v46  ;;  %s6035_s26 = scalar_lea.vmem %s7398_s2, %s4660_s24 }
  0x16   : > { %5431 = vmatpush3.bf16.msra.mxu0 %v5430_v33  ;;  %v5466_v51 = vpack.c.bf16 %v450_v45, %v449_v44  ;;  %v419_v53 = vld [vmem:[%s7400_s4 + $0x40] sm:$0xff]  ;;  %v420_v54 = vld [vmem:[%s7400_s4 + $0x48] sm:$0xff]  ;;  %v5468_v56 = vpack.c.bf16 %v468_v50, %v467_v49  ;;  %v437_v58 = vld [vmem:[%s7400_s4 + $0xd0] sm:$0xff]  ;;  %s5858_s29 = scalar_lea.vmem %s7396_s0, %s5577_s23  ;;  %s4656_s23 = sshll.u32 (%p5703_p4), %s5691_s12, 3 }
  0x17   : > { %5433 = vmatprep.subr.bf16.mxu0 %v5432_v39  ;;  %v451_v55 = vld [vmem:[%s7400_s4 + $0x140] sm:$0xff]  ;;  %v452_v57 = vld [vmem:[%s7400_s4 + $0x148] sm:$0xff]  ;;  %v438_v59 = vld [vmem:[%s7400_s4 + $0xd8] sm:$0xff]  ;;  %v5438_v62 = vpack.c.bf16 %v420_v54, %v419_v53  ;;  %s6971_s27 = scalar_lea.vmem (%p5703_p4), %s7405_s9, %s4656_s23 }
  0x18   : > { %5463 = vmatpush3.bf16.msra.mxu1 %v5462_v38  ;;  %v469_v60 = vld [vmem:[%s7400_s4 + $0x1d0] sm:$0xff]  ;;  %v470_v61 = vld [vmem:[%s7400_s4 + $0x1d8] sm:$0xff]  ;;  %v5470_v63 = vpack.c.bf16 %v452_v57, %v451_v55  ;;  %v5440_v0 = vpack.c.bf16 %v438_v59, %v437_v58  ;;  %v439_v6 = vld [vmem:[%s7400_s4 + $0xe0] sm:$0xff] }
  0x19   : > { %5465 = vmatprep.subr.bf16.mxu1 %v5464_v43  ;;  %v421_v1 = vld [vmem:[%s7400_s4 + $0x50] sm:$0xff]  ;;  %v422_v2 = vld [vmem:[%s7400_s4 + $0x58] sm:$0xff]  ;;  %v5472_v4 = vpack.c.bf16 %v470_v61, %v469_v60  ;;  %v440_v7 = vld [vmem:[%s7400_s4 + $0xe8] sm:$0xff] }
  0x1a   : > { %5435 = vmatpush3.bf16.msra.mxu0 %v5434_v48  ;;  %v453_v3 = vld [vmem:[%s7400_s4 + $0x150] sm:$0xff]  ;;  %v454_v5 = vld [vmem:[%s7400_s4 + $0x158] sm:$0xff]  ;;  %v471_v8 = vld [vmem:[%s7400_s4 + $0x1e0] sm:$0xff]  ;;  %v5442_v10 = vpack.c.bf16 %v422_v2, %v421_v1  ;;  %v5444_v14 = vpack.c.bf16 %v440_v7, %v439_v6 }
  0x1b   : > { %5437 = vmatprep.subr.bf16.mxu0 %v5436_v52  ;;  %v472_v9 = vld [vmem:[%s7400_s4 + $0x1e8] sm:$0xff]  ;;  %v423_v11 = vld [vmem:[%s7400_s4 + $0x60] sm:$0xff]  ;;  %v5474_v13 = vpack.c.bf16 %v454_v5, %v453_v3  ;;  %v441_v19 = vld [vmem:[%s7400_s4 + $0xf0] sm:$0xff] }
  0x1c   : > { %5467 = vmatpush3.bf16.msra.mxu1 %v5466_v51  ;;  %v388_v12 = vld [vmem:[%s5858_s29 + $0x8] sm:$0xff]  ;;  %v455_v16 = vld [vmem:[%s7400_s4 + $0x160] sm:$0xff]  ;;  %v5476_v18 = vpack.c.bf16 %v472_v9, %v471_v8  ;;  %v442_v20 = vld [vmem:[%s7400_s4 + $0xf8] sm:$0xff] }
  0x1d   : > { %5469 = vmatprep.subr.bf16.mxu1 %v5468_v56  ;;  %v424_v15 = vld [vmem:[%s7400_s4 + $0x68] sm:$0xff]  ;;  %578 = vmatprep.mubr.f32.mxu0 %v388_v12  ;;  %v390_v21 = vld [vmem:[%s5858_s29 + $0x18] sm:$0xff]  ;;  %v473_v22 = vld [vmem:[%s7400_s4 + $0x1f0] sm:$0xff]  ;;  %v5448_v26 = vpack.c.bf16 %v442_v20, %v441_v19 }
  0x1e   : > { %5439 = vmatpush3.bf16.msra.mxu0 %v5438_v62  ;;  %v456_v17 = vld [vmem:[%s7400_s4 + $0x168] sm:$0xff]  ;;  %v474_v23 = vld [vmem:[%s7400_s4 + $0x1f8] sm:$0xff]  ;;  %663 = vmatprep.mubr.f32.mxu1 %v390_v21  ;;  %v5446_v24 = vpack.c.bf16 %v424_v15, %v423_v11  ;;  %v425_v27 = vld [vmem:[%s7400_s4 + $0x70] sm:$0xff] }
  0x1f   : > { %5441 = vmatprep.subr.bf16.mxu0 %v5440_v0  ;;  %v5478_v25 = vpack.c.bf16 %v456_v17, %v455_v16  ;;  %v426_v28 = vld [vmem:[%s7400_s4 + $0x78] sm:$0xff]  ;;  %v457_v29 = vld [vmem:[%s7400_s4 + $0x170] sm:$0xff]  ;;  %v5480_v30 = vpack.c.bf16 %v474_v23, %v473_v22  ;;  %v491_v32 = vld [vmem:[%s7400_s4 + $0x280] sm:$0xff] }
  0x20   : > { %5471 = vmatpush3.bf16.msra.mxu1 %v5470_v63  ;;  %v458_v31 = vld [vmem:[%s7400_s4 + $0x178] sm:$0xff]  ;;  %v492_v33 = vld [vmem:[%s7400_s4 + $0x288] sm:$0xff]  ;;  %v5450_v34 = vpack.c.bf16 %v426_v28, %v425_v27  ;;  %v475_v37 = vld [vmem:[%s7400_s4 + $0x200] sm:$0xff] }
  0x21   : > { %5473 = vmatprep.subr.bf16.mxu1 %v5472_v4  ;;  %v5482_v35 = vpack.c.bf16 %v458_v31, %v457_v29  ;;  %v5484_v36 = vpack.c.bf16 %v492_v33, %v491_v32  ;;  %v476_v38 = vld [vmem:[%s7400_s4 + $0x208] sm:$0xff]  ;;  %v493_v39 = vld [vmem:[%s7400_s4 + $0x290] sm:$0xff]  ;;  %v494_v40 = vld [vmem:[%s7400_s4 + $0x298] sm:$0xff] }
  0x22   : > { %5443 = vmatpush3.bf16.msra.mxu0 %v5442_v10  ;;  %v387_v41 = vld [vmem:[%s5858_s29] sm:$0xff]  ;;  %v5486_v42 = vpack.c.bf16 %v476_v38, %v475_v37  ;;  %v389_v43 = vld [vmem:[%s5858_s29 + $0x10] sm:$0xff]  ;;  %v5488_v44 = vpack.c.bf16 %v494_v40, %v493_v39  ;;  %v478_v46 = vld [vmem:[%s7400_s4 + $0x218] sm:$0xff] }
  0x23   : > { %5445 = vmatprep.subr.bf16.mxu0 %v5444_v14  ;;  %v477_v45 = vld [vmem:[%s7400_s4 + $0x210] sm:$0xff]  ;;  %v495_v47 = vld [vmem:[%s7400_s4 + $0x2a0] sm:$0xff]  ;;  %v496_v48 = vld [vmem:[%s7400_s4 + $0x2a8] sm:$0xff] }
  0x24   : > { %5475 = vmatpush3.bf16.msra.mxu1 %v5474_v13  ;;  %v394_v49 = vld [vmem:[%s5858_s29 + $0x38] sm:$0xff]  ;;  %v396_v50 = vld [vmem:[%s5858_s29 + $0x48] sm:$0xff]  ;;  %v5490_v51 = vpack.c.bf16 %v478_v46, %v477_v45  ;;  %v393_v52 = vld [vmem:[%s5858_s29 + $0x30] sm:$0xff]  ;;  %v5492_v53 = vpack.c.bf16 %v496_v48, %v495_v47 }
  0x25   : > { %5477 = vmatprep.subr.bf16.mxu1 %v5476_v18  ;;  %v479_v54 = vld [vmem:[%s7400_s4 + $0x220] sm:$0xff]  ;;  %v480_v55 = vld [vmem:[%s7400_s4 + $0x228] sm:$0xff]  ;;  %v497_v57 = vld [vmem:[%s7400_s4 + $0x2b0] sm:$0xff] }
  0x26   : > { %5447 = vmatpush3.bf16.msra.mxu0 %v5446_v24  ;;  %v395_v56 = vld [vmem:[%s5858_s29 + $0x40] sm:$0xff]  ;;  %v498_v58 = vld [vmem:[%s7400_s4 + $0x2b8] sm:$0xff]  ;;  %v400_v59 = vld [vmem:[%s5858_s29 + $0x68] sm:$0xff]  ;;  %v5494_v61 = vpack.c.bf16 %v480_v55, %v479_v54 }
  0x27   : > { %5449 = vmatprep.subr.bf16.mxu0 %v5448_v26  ;;  %v402_v60 = vld [vmem:[%s5858_s29 + $0x78] sm:$0xff]  ;;  %v399_v62 = vld [vmem:[%s5858_s29 + $0x60] sm:$0xff]  ;;  %v5496_v63 = vpack.c.bf16 %v498_v58, %v497_v57  ;;  %v481_v0 = vld [vmem:[%s7400_s4 + $0x230] sm:$0xff] }
  0x28   : > { %5479 = vmatpush3.bf16.msra.mxu1 %v5478_v25  ;;  %v482_v1 = vld [vmem:[%s7400_s4 + $0x238] sm:$0xff]  ;;  %v401_v2 = vld [vmem:[%s5858_s29 + $0x70] sm:$0xff]  ;;  %v499_v3 = vld [vmem:[%s7400_s4 + $0x2c0] sm:$0xff] }
  0x29   : > { %5481 = vmatprep.subr.bf16.mxu1 %v5480_v30  ;;  %v500_v4 = vld [vmem:[%s7400_s4 + $0x2c8] sm:$0xff]  ;;  %v406_v5 = vld [vmem:[%s5858_s29 + $0x98] sm:$0xff]  ;;  %v5498_v7 = vpack.c.bf16 %v482_v1, %v481_v0  ;;  %v405_v8 = vld [vmem:[%s5858_s29 + $0x90] sm:$0xff] }
  0x2a   : > { %5451 = vmatpush3.bf16.msra.mxu0 %v5450_v34  ;;  %v408_v6 = vld [vmem:[%s5858_s29 + $0xa8] sm:$0xff]  ;;  %v5500_v9 = vpack.c.bf16 %v500_v4, %v499_v3  ;;  %v483_v10 = vld [vmem:[%s7400_s4 + $0x240] sm:$0xff]  ;;  %v501_v13 = vld [vmem:[%s7400_s4 + $0x2d0] sm:$0xff] }
  0x2b   : > { %5485 = vmatprep.subr.bf16.mxu0 %v5484_v36  ;;  %v484_v11 = vld [vmem:[%s7400_s4 + $0x248] sm:$0xff]  ;;  %v407_v12 = vld [vmem:[%s5858_s29 + $0xa0] sm:$0xff]  ;;  %v502_v14 = vld [vmem:[%s7400_s4 + $0x2d8] sm:$0xff] }
  0x2c   : > { %5483 = vmatpush3.bf16.msra.mxu1 %v5482_v35  ;;  %v392_v15 = vld [vmem:[%s5858_s29 + $0x28] sm:$0xff]  ;;  %v5502_v16 = vpack.c.bf16 %v484_v11, %v483_v10  ;;  %v5504_v17 = vpack.c.bf16 %v502_v14, %v501_v13  ;;  %v485_v18 = vld [vmem:[%s7400_s4 + $0x250] sm:$0xff]  ;;  %v486_v19 = vld [vmem:[%s7400_s4 + $0x258] sm:$0xff] }
  0x2d   : > { %579 = vmatmul.mubr.f32.vlgmr.msra.gmra.mrb[0].mxu0 %v387_v41  ;;  %v503_v20 = vld [vmem:[%s7400_s4 + $0x2e0] sm:$0xff]  ;;  %v504_v21 = vld [vmem:[%s7400_s4 + $0x2e8] sm:$0xff]  ;;  %v5506_v22 = vpack.c.bf16 %v486_v19, %v485_v18  ;;  %v505_v26 = vld [vmem:[%s7400_s4 + $0x2f0] sm:$0xff] }
  0x2e   : > { %5487 = vmatpush3.bf16.msra.mxu0 %v5486_v42  ;;  %583 = vmatprep.mubr.f32.mxu0 %v394_v49  ;;  %v5508_v23 = vpack.c.bf16 %v504_v21, %v503_v20  ;;  %v487_v24 = vld [vmem:[%s7400_s4 + $0x260] sm:$0xff]  ;;  %v488_v25 = vld [vmem:[%s7400_s4 + $0x268] sm:$0xff]  ;;  %v506_v27 = vld [vmem:[%s7400_s4 + $0x2f8] sm:$0xff] }
  0x2f   : > { %664 = vmatmul.mubr.f32.vlgmr.msra.gmra.mrb[0].mxu1 %v389_v43  ;;  %5489 = vmatprep.subr.bf16.mxu0 %v5488_v44  ;;  %v5510_v28 = vpack.c.bf16 %v488_v25, %v487_v24  ;;  %v5512_v29 = vpack.c.bf16 %v506_v27, %v505_v26  ;;  %v489_v30 = vld [vmem:[%s7400_s4 + $0x270] sm:$0xff]  ;;  %v490_v31 = vld [vmem:[%s7400_s4 + $0x278] sm:$0xff]  ;;  %v391_v33 = vld [vmem:[%s5858_s29 + $0x20] sm:$0xff] }
  0x30   : > { %668 = vmatprep.mubr.f32.mxu1 %v396_v50  ;;  %v5514_v32 = vpack.c.bf16 %v490_v31, %v489_v30  ;;  %v398_v34 = vld [vmem:[%s5858_s29 + $0x58] sm:$0xff]  ;;  %v397_v35 = vld [vmem:[%s5858_s29 + $0x50] sm:$0xff]  ;;  %v404_v36 = vld [vmem:[%s5858_s29 + $0x88] sm:$0xff] }
  0x31   : > { %584 = vmatmul.mubr.f32.gmra.mrb[2].mxu0 %v393_v52  ;;  %v403_v37 = vld [vmem:[%s5858_s29 + $0x80] sm:$0xff]  ;;  %v410_v38 = vld [vmem:[%s5858_s29 + $0xb8] sm:$0xff]  ;;  %v409_v39 = vld [vmem:[%s5858_s29 + $0xb0] sm:$0xff]  ;;  %s4659_s29 = sshll.u32 %s5801_s18, 5 }
  0x32   : > { %5491 = vmatpush3.bf16.msra.mxu0 %v5490_v51  ;;  %588 = vmatprep.mubr.f32.mxu0 %v400_v59  ;;  %v6038_v40 = vld [vmem:[%s6035_s26] sm:$0xff]  ;;  %s376_s15 = scalar_lea.vmem %s7397_s1, %s4659_s29  ;;  %s5578_s29 = smul.u32 1664, %s5801_s18 }
  0x33   : > { %669 = vmatmul.mubr.f32.gmra.mrb[2].mxu1 %v395_v56  ;;  %5493 = vmatprep.subr.bf16.mxu0 %v5492_v53  ;;  %v4439_v42 = vld [vmem:[%s7401_s5] ss:$0 sm:$0xff]  ;;  %v854_v27 = vld [vmem:[%s376_s15 + $0x8] sm:$0xff]  ;;  %v855_v31 = vld [vmem:[%s376_s15 + $0x10] sm:$0xff]  ;;  %s364_s18 = sand.u32 1, %s5618_s30  }
  0x34   : > { %673 = vmatprep.mubr.f32.mxu1 %v402_v60  ;;  %v853_v26 = vld [vmem:[%s376_s15] sm:$0xff]  ;;  %s5576_s19 = smul.u32 1664, %s364_s18 }
  0x35   : > { %589 = vmatmul.mubr.f32.gmra.mrb[4].mxu0 %v399_v62  ;;  %v5524_v30 = vpack.c.bf16 %v854_v27, %v853_v26 }
  0x36   : > { %5495 = vmatpush3.bf16.msra.mxu0 %v5494_v61  ;;  %593 = vmatprep.mubr.f32.mxu0 %v406_v5  ;;  %s6542_s30 = scalar_lea.vmem [#allocation2], %s5576_s19 }
  0x37   : > { %674 = vmatmul.mubr.f32.gmra.mrb[4].mxu1 %v401_v2  ;;  %5497 = vmatprep.subr.bf16.mxu0 %v5496_v63 }
  0x38   : > { %678 = vmatprep.mubr.f32.mxu1 %v408_v6 }
  0x39   : > { %594 = vmatmul.mubr.f32.gmra.mrb[6].mxu0 %v405_v8 }
  0x3a   : > { %5499 = vmatpush3.bf16.msra.mxu0 %v5498_v7  ;;  %748 = vmatprep.mubr.f32.mxu0 %v392_v15 }
  0x3b   : > { %679 = vmatmul.mubr.f32.gmra.mrb[6].mxu1 %v407_v12  ;;  %5501 = vmatprep.subr.bf16.mxu0 %v5500_v9 }
  0x3c   : > { %5046 = vmatprep.mubr.msk.f32.mxu1 %vm771_vm0, %v6038_v40 }
  0x3e   : > { %5503 = vmatpush3.bf16.msra.mxu0 %v5502_v16 }
  0x3f   : > { %5505 = vmatprep.subr.bf16.mxu0 %v5504_v17 }
  0x42   : > { %5507 = vmatpush3.bf16.msra.mxu0 %v5506_v22 }
  0x43   : > { %5509 = vmatprep.subr.bf16.mxu0 %v5508_v23 }
  0x46   : > { %5511 = vmatpush3.bf16.msra.mxu0 %v5510_v28 }
  0x47   : > { %5513 = vmatprep.subr.bf16.mxu0 %v5512_v29 }
  0x4a   : > { %5515 = vmatpush3.bf16.msra.mxu0 %v5514_v32  ;;  %v856_v32 = vld [vmem:[%s376_s15 + $0x18] sm:$0xff]  ;;  %s6115_s15 = scalar_lea.vmem %s7399_s3, %s5578_s29 }
  0x4b   : > { %v1122_v26 = vld [vmem:[%s6115_s15 + $0x50] sm:$0xff]  ;;  %v1232_v27 = vld [vmem:[%s6115_s15 + $0x3c0] sm:$0xff] }
  0x4d   : > { %749 = vmatmul.mubr.f32.vlgmr.msra.gmra.mrb[8].mxu0 %v391_v33  ;;  %v770_v33 = vld [vmem:[%s6035_s26 + $0x8] sm:$0xff] }
  0x4e   : > { %753 = vmatprep.mubr.f32.mxu0 %v398_v34  ;;  %v5528_v34 = vpack.c.bf16 %v856_v32, %v855_v31  ;;  %v1234_v31 = vld [vmem:[%s6115_s15 + $0x3d0] sm:$0xff]  ;;  %v1125_v32 = vld [vmem:[%s6115_s15 + $0x68] sm:$0xff] }
  0x51   : > { %754 = vmatmul.mubr.f32.gmra.mrb[10].mxu0 %v397_v35  ;;  %v948_v35 = vld [vmem:[%s7403_s7] sm:$0xff] }
  0x52   : > { %758 = vmatprep.mubr.f32.mxu0 %v404_v36  ;;  %v949_v36 = vld [vmem:[%s7403_s7 + $0x8] sm:$0xff] }
  0x55   : > { %759 = vmatmul.mubr.f32.gmra.mrb[12].mxu0 %v403_v37  ;;  %v5532_v37 = vpack.c.bf16 %v949_v36, %v948_v35  ;;  %v1236_v35 = vld [vmem:[%s6115_s15 + $0x3e0] sm:$0xff]  ;;  %v1127_v36 = vld [vmem:[%s6115_s15 + $0x78] sm:$0xff] }
  0x56   : > { %763 = vmatprep.mubr.f32.mxu0 %v410_v38  ;;  %v950_v38 = vld [vmem:[%s7403_s7 + $0x10] sm:$0xf] }
  0x59   : > { %764 = vmatmul.mubr.f32.gmra.mrb[14].mxu0 %v409_v39  ;;  %v932_v39 = vld [vmem:[%s7402_s6] sm:$0xff] }
 0x100   : > { %v4693_v41 = vpop.f32.mrb[0].mxu0 }
 0x101   : > { %v4694_v43 = vpop.f32.mrb[1].mxu0 }
 0x102   : > { %v4737_v44 = vpop.f32.mrb[0].mxu1  ;;  %v4695_v45 = vadd.f32 %v4694_v43, %v4693_v41 }
 0x103   : > { %v4738_v46 = vpop.f32.mrb[1].mxu1 }
 0x104   : > { %v4739_v47 = vadd.f32 %v4738_v46, %v4737_v44  ;;  %v581_v48 = vadd.f32 %v4695_v45, %v4439_v42  ;;  %v4696_v49 = vpop.f32.mrb[2].mxu0  ;;  %v934_v44 = vld [vmem:[%s7402_s6 + $0x10] sm:$0xff]  ;;  %v935_v45 = vld [vmem:[%s7402_s6 + $0x18] sm:$0xff] }
 0x105   : > { %v4697_v50 = vpop.f32.mrb[3].mxu0 }
 0x106   : > { %v4740_v51 = vpop.f32.mrb[2].mxu1  ;;  %v666_v52 = vadd.f32 %v4739_v47, %v581_v48  ;;  %v4698_v53 = vadd.f32 %v4697_v50, %v4696_v49  ;;  %v5540_v48 = vpack.c.bf16 %v935_v45, %v934_v44  ;;  %v936_v49 = vld [vmem:[%s7402_s6 + $0x20] sm:$0xff]  ;;  %v937_v50 = vld [vmem:[%s7402_s6 + $0x28] sm:$0xff]  ;;  %v1131_v44 = vld [vmem:[%s6115_s15 + $0x98] sm:$0xff] }
 0x107   : > { %v4741_v54 = vpop.f32.mrb[3].mxu1  ;;  %v1241_v45 = vld [vmem:[%s6115_s15 + $0x408] sm:$0xff] }
 0x108   : > { %v4742_v55 = vadd.f32 %v4741_v54, %v4740_v51  ;;  %v586_v56 = vadd.f32 %v4698_v53, %v4439_v42  ;;  %v4699_v57 = vpop.f32.mrb[4].mxu0  ;;  %v5544_v51 = vpack.c.bf16 %v937_v50, %v936_v49  ;;  %v939_v53 = vld [vmem:[%s7402_s6 + $0x38] sm:$0xff]  ;;  %v1134_v50 = vld [vmem:[%s6115_s15 + $0xb0] sm:$0xff] }
 0x109   : > { %v4700_v58 = vpop.f32.mrb[5].mxu0  ;;  %v1243_v49 = vld [vmem:[%s6115_s15 + $0x418] sm:$0xff] }
 0x10a   : > { %v4743_v59 = vpop.f32.mrb[4].mxu1  ;;  %v671_v60 = vadd.f32 %v4742_v55, %v586_v56  ;;  %v4701_v61 = vadd.f32 %v4700_v58, %v4699_v57  ;;  %v940_v55 = vld [vmem:[%s7402_s6 + $0x40] sm:$0xff]  ;;  %v941_v56 = vld [vmem:[%s7402_s6 + $0x48] sm:$0xff]  ;;  %v942_v58 = vld [vmem:[%s7402_s6 + $0x50] sm:$0xff] }
 0x10b   : > { %v4744_v62 = vpop.f32.mrb[5].mxu1  ;;  %v5552_v57 = vpack.c.bf16 %v941_v56, %v940_v55  ;;  %v1246_v55 = vld [vmem:[%s6115_s15 + $0x430] sm:$0xff]  ;;  %v1137_v56 = vld [vmem:[%s6115_s15 + $0xc8] sm:$0xff] }
 0x10c   : > { %v4745_v63 = vadd.f32 %v4744_v62, %v4743_v59  ;;  %v591_v0 = vadd.f32 %v4701_v61, %v4439_v42  ;;  %v4702_v1 = vpop.f32.mrb[6].mxu0  ;;  %v943_v59 = vld [vmem:[%s7402_s6 + $0x58] sm:$0xff]  ;;  %v944_v61 = vld [vmem:[%s7402_s6 + $0x60] sm:$0xff]  ;;  %v945_v62 = vld [vmem:[%s7402_s6 + $0x68] sm:$0xff] }
 0x10d   : > { %v4703_v2 = vpop.f32.mrb[7].mxu0 }
 0x10e   : > { %v4746_v3 = vpop.f32.mrb[6].mxu1  ;;  %v676_v4 = vadd.f32 %v4745_v63, %v591_v0  ;;  %v4704_v5 = vadd.f32 %v4703_v2, %v4702_v1  ;;  %v5560_v63 = vpack.c.bf16 %v945_v62, %v944_v61  ;;  %v946_v0 = vld [vmem:[%s7402_s6 + $0x70] sm:$0xff]  ;;  %v947_v1 = vld [vmem:[%s7402_s6 + $0x78] sm:$0xff]  ;;  %v1249_v61 = vld [vmem:[%s6115_s15 + $0x448] sm:$0xff] }
 0x10f   : > { %v4747_v6 = vpop.f32.mrb[7].mxu1  ;;  %v5564_v2 = vpack.c.bf16 %v947_v1, %v946_v0  ;;  %v1140_v62 = vld [vmem:[%s6115_s15 + $0xe0] sm:$0xff]  ;;  %v1141_v0 = vld [vmem:[%s6115_s15 + $0xe8] sm:$0xff]  ;;  %v1251_v1 = vld [vmem:[%s6115_s15 + $0x458] sm:$0xff] }
 0x110   : > { %v4748_v7 = vadd.f32 %v4747_v6, %v4746_v3  ;;  %v596_v8 = vadd.f32 %v4704_v5, %v4439_v42  ;;  %v1112_v3 = vld [vmem:[%s6115_s15] sm:$0xff] }
 0x111   : > { %5108 = vmatprep.mubr.msk.f32.mxu0 %vm1327_vm3, %v1112_v3  ;;  %v1252_v3 = vld [vmem:[%s6115_s15 + $0x460] sm:$0xff] }
 0x112   : > { %v681_v9 = vadd.f32 %v4748_v7, %v596_v8  ;;  %v1113_v8 = vld [vmem:[%s6115_s15 + $0x8] sm:$0xff] }
 0x120   : > { %v4781_v10 = vpop.f32.mrb[8].mxu0 }
 0x121   : > { %v4782_v11 = vpop.f32.mrb[9].mxu0 }
 0x122   : > { %v4783_v12 = vadd.f32 %v4782_v11, %v4781_v10  ;;  %v1114_v10 = vld [vmem:[%s6115_s15 + $0x10] sm:$0xff]  ;;  %v1224_v11 = vld [vmem:[%s6115_s15 + $0x380] sm:$0xff] }
 0x124   : > { %v751_v13 = vadd.f32 %v4783_v12, %v666_v52  ;;  %v4784_v14 = vpop.f32.mrb[10].mxu0  ;;  %v938_v52 = vld [vmem:[%s7402_s6 + $0x30] sm:$0xff]  ;;  %v1115_v12 = vld [vmem:[%s6115_s15 + $0x18] sm:$0xff] }
 0x125   : > { %v4785_v15 = vpop.f32.mrb[11].mxu0  ;;  %v5548_v54 = vpack.c.bf16 %v939_v53, %v938_v52  ;;  %v1135_v52 = vld [vmem:[%s6115_s15 + $0xb8] sm:$0xff]  ;;  %v1245_v53 = vld [vmem:[%s6115_s15 + $0x428] sm:$0xff] }
 0x126   : > { %v4786_v16 = vadd.f32 %v4785_v15, %v4784_v14  ;;  %v1116_v14 = vld [vmem:[%s6115_s15 + $0x20] sm:$0xff]  ;;  %v1226_v15 = vld [vmem:[%s6115_s15 + $0x390] sm:$0xff] }
 0x128   : > { %v756_v17 = vadd.f32 %v4786_v16, %v671_v60  ;;  %v4787_v18 = vpop.f32.mrb[12].mxu0  ;;  %v5556_v60 = vpack.c.bf16 %v943_v59, %v942_v58  ;;  %v1117_v16 = vld [vmem:[%s6115_s15 + $0x28] sm:$0xff]  ;;  %v1138_v58 = vld [vmem:[%s6115_s15 + $0xd0] sm:$0xff]  ;;  %v1248_v59 = vld [vmem:[%s6115_s15 + $0x440] sm:$0xff] }
 0x129   : > { %v4788_v19 = vpop.f32.mrb[13].mxu0 }
 0x12a   : > { %v4789_v20 = vadd.f32 %v4788_v19, %v4787_v18  ;;  %v5516_v21 = vpack.c.bf16 %v756_v17, %v751_v13  ;;  %v1225_v13 = vld [vmem:[%s6115_s15 + $0x388] sm:$0xff]  ;;  %v1227_v17 = vld [vmem:[%s6115_s15 + $0x398] sm:$0xff]  ;;  %v1118_v18 = vld [vmem:[%s6115_s15 + $0x30] sm:$0xff] }
 0x12b   : > { %v1228_v19 = vld [vmem:[%s6115_s15 + $0x3a0] sm:$0xff] }
 0x12c   : > { %v761_v22 = vadd.f32 %v4789_v20, %v676_v4  ;;  %v4790_v23 = vpop.f32.mrb[14].mxu0  ;;  %5517 = vmatprep.subr.bf16.mxu1 %v5516_v21  ;;  %v1222_v4 = vld [vmem:[%s6115_s15 + $0x370] sm:$0xff]  ;;  %v1119_v20 = vld [vmem:[%s6115_s15 + $0x38] sm:$0xff] }
 0x12d   : > { %v4791_v24 = vpop.f32.mrb[15].mxu0  ;;  %5519 = vmatpush3.bf16.msra.mxu1 %v5516_v21  ;;  %v1229_v21 = vld [vmem:[%s6115_s15 + $0x3a8] sm:$0xff] }
 0x12e   : > { %v4792_v25 = vadd.f32 %v4791_v24, %v4790_v23  ;;  %v1230_v23 = vld [vmem:[%s6115_s15 + $0x3b0] sm:$0xff]  ;;  %v1121_v24 = vld [vmem:[%s6115_s15 + $0x48] sm:$0xff] }
 0x130   : > { %v766_v28 = vadd.f32 %v4792_v25, %v681_v9  ;;  %v1223_v9 = vld [vmem:[%s6115_s15 + $0x378] sm:$0xff] }
 0x131   : > { %v1231_v25 = vld [vmem:[%s6115_s15 + $0x3b8] sm:$0xff] }
 0x132   : > { %v5520_v29 = vpack.c.bf16 %v766_v28, %v761_v22  ;;  %v1120_v22 = vld [vmem:[%s6115_s15 + $0x40] sm:$0xff]  ;;  %v1123_v28 = vld [vmem:[%s6115_s15 + $0x58] sm:$0xff] }
 0x134   : > { %5521 = vmatprep.subr.bf16.mxu1 %v5520_v29 }
 0x135   : > { %5523 = vmatpush3.bf16.msra.mxu1 %v5520_v29  ;;  %v1233_v29 = vld [vmem:[%s6115_s15 + $0x3c8] sm:$0xff] }
 0x136   : > { %5525 = vmatprep.subr.bf16.mxu1 %v5524_v30 }
 0x138   : > { %5047 = vmatmul.mubr.msk.f32.vlgmr.msra.gmra.mrb[8].mxu1 %vm771_vm0, %v770_v33 }
 0x139   : > { %5527 = vmatpush3.bf16.msra.mxu1 %v5524_v30  ;;  %5057 = vmatprep.mubr.msk.f32.mxu1 %vm771_vm0, %v6038_v40  ;;  %v933_v40 = vld [vmem:[%s7402_s6 + $0x8] sm:$0xff]  ;;  %v1124_v30 = vld [vmem:[%s6115_s15 + $0x60] sm:$0xff] }
 0x13a   : > { %5529 = vmatprep.subr.bf16.mxu1 %v5528_v34  ;;  %v5536_v41 = vpack.c.bf16 %v933_v40, %v932_v39  ;;  %v1238_v39 = vld [vmem:[%s6115_s15 + $0x3f0] sm:$0xff]  ;;  %v1129_v40 = vld [vmem:[%s6115_s15 + $0x88] sm:$0xff] }
 0x13d   : > { %5531 = vmatpush3.bf16.msra.mxu1 %v5528_v34  ;;  %v1126_v34 = vld [vmem:[%s6115_s15 + $0x70] sm:$0xff] }
 0x13e   : > { %5533 = vmatprep.subr.bf16.mxu1 %v5532_v37 }
 0x140   : > { %5058 = vmatmul.mubr.msk.f32.vlgmr.msra.gmra.mrb[10].mxu1 %vm771_vm0, %v770_v33  ;;  %v1235_v33 = vld [vmem:[%s6115_s15 + $0x3d8] sm:$0xff] }
 0x141   : > { %5535 = vmatpush3.bf16.msra.mxu1 %v5532_v37  ;;  %v1237_v37 = vld [vmem:[%s6115_s15 + $0x3e8] sm:$0xff] }
 0x142   : > { %5064 = vmatprep.subr.msk.mxu1 %vm958_vm1, %v950_v38 }
 0x145   : > { %5065 = vmatpush3.msk.msra.mxu1 %vm958_vm1, %v950_v38  ;;  %v1128_v38 = vld [vmem:[%s6115_s15 + $0x80] sm:$0xff] }
 0x146   : > { %5537 = vmatprep.subr.bf16.mxu1 %v5536_v41 }
 0x20b   : > { %v5048_v42 = vpop.f32.mrb[8].mxu1 }
 0x20c   : > { %v844_v43 = vpop.f32.mrb[9].mxu1 }
 0x213   : > { %v5059_v46 = vpop.f32.mrb[10].mxu1 }
 0x214   : > { %v923_v47 = vpop.f32.mrb[11].mxu1 }
 0x215   : > { %5066 = vmatprep.mubr.msk.f32.mxu1 %vm951_vm2, %v923_v47  ;;  %v1242_v47 = vld [vmem:[%s6115_s15 + $0x410] sm:$0xff] }
 0x216   : > { %5067 = vmatmul.mubr.msk.f32.vlgmr.msra.gmra.mrb[12].mxu1 %vm951_vm2, %v5059_v46  ;;  %v1132_v46 = vld [vmem:[%s6115_s15 + $0xa0] sm:$0xff] }
 0x217   : > { %5539 = vmatpush3.bf16.msra.mxu1 %v5536_v41  ;;  %5101 = vmatprep.mubr.f32.mxu1 %v844_v43  ;;  %v1239_v41 = vld [vmem:[%s6115_s15 + $0x3f8] sm:$0xff]  ;;  %v1240_v43 = vld [vmem:[%s6115_s15 + $0x400] sm:$0xff] }
 0x218   : > { %5541 = vmatprep.subr.bf16.mxu1 %v5540_v48 }
 0x21b   : > { %5543 = vmatpush3.bf16.msra.mxu1 %v5540_v48  ;;  %v1133_v48 = vld [vmem:[%s6115_s15 + $0xa8] sm:$0xff] }
 0x21c   : > { %5545 = vmatprep.subr.bf16.mxu1 %v5544_v51 }
 0x21f   : > { %5547 = vmatpush3.bf16.msra.mxu1 %v5544_v51  ;;  %v1244_v51 = vld [vmem:[%s6115_s15 + $0x420] sm:$0xff] }
 0x220   : > { %5549 = vmatprep.subr.bf16.mxu1 %v5548_v54 }
 0x223   : > { %5551 = vmatpush3.bf16.msra.mxu1 %v5548_v54  ;;  %v1136_v54 = vld [vmem:[%s6115_s15 + $0xc0] sm:$0xff] }
 0x224   : > { %5553 = vmatprep.subr.bf16.mxu1 %v5552_v57 }
 0x227   : > { %5555 = vmatpush3.bf16.msra.mxu1 %v5552_v57  ;;  %v1247_v57 = vld [vmem:[%s6115_s15 + $0x438] sm:$0xff] }
 0x228   : > { %5557 = vmatprep.subr.bf16.mxu1 %v5556_v60 }
 0x22b   : > { %5559 = vmatpush3.bf16.msra.mxu1 %v5556_v60  ;;  %v1139_v60 = vld [vmem:[%s6115_s15 + $0xd8] sm:$0xff] }
 0x22c   : > { %5561 = vmatprep.subr.bf16.mxu1 %v5560_v63 }
 0x22f   : > { %5563 = vmatpush3.bf16.msra.mxu1 %v5560_v63  ;;  %v1250_v63 = vld [vmem:[%s6115_s15 + $0x450] sm:$0xff] }
 0x230   : > { %5565 = vmatprep.subr.bf16.mxu1 %v5564_v2 }
 0x233   : > { %5567 = vmatpush3.bf16.msra.mxu1 %v5564_v2  ;;  %v1142_v2 = vld [vmem:[%s6115_s15 + $0xf0] sm:$0xff] }
 0x236   : > { %5102 = vmatmul.mubr.f32.vlgmr.msra.gmra.mrb[12].mxu1 %v5048_v42  ;;  %v1130_v42 = vld [vmem:[%s6115_s15 + $0x90] sm:$0xff] }
 0x237   : > { %5273 = vmatprep.mubr.msk.f32.mxu1 %vm1327_vm3, %v1222_v4  ;;  %v1143_v4 = vld [vmem:[%s6115_s15 + $0xf8] sm:$0xff] }
 0x309   : > { %v5103_v5 = vpop.f32.mrb[12].mxu1 }
 0x30a   : > { %v1103_v6 = vpop.f32.mrb[13].mxu1 }
 0x30b   : > { %v5568_v7 = vpack.c.bf16 %v5103_v5, %v1103_v6  ;;  %v1253_v5 = vld [vmem:[%s6115_s15 + $0x468] sm:$0xff]  ;;  %v1144_v6 = vld [vmem:[%s6115_s15 + $0x100] sm:$0xff] }
 0x30d   : > { %5569 = vmatprep.subr.bf16.mxu0 %v5568_v7  ;;  %5572 = vmatprep.subr.bf16.mxu1 %v5568_v7 }
 0x30e   : > { %5571 = vmatpush3.bf16.msra.mxu0 %v5568_v7  ;;  %5573 = vmatpush3.bf16.msra.mxu1 %v5568_v7  ;;  %v1254_v7 = vld [vmem:[%s6115_s15 + $0x470] sm:$0xff] }
 0x311   : > { %5109 = vmatmul.mubr.msk.f32.vlgmr.msra.gmra.mrb[16].mxu0 %vm1327_vm3, %v1113_v8  ;;  %5274 = vmatmul.mubr.msk.f32.vlgmr.msra.gmra.mrb[14].mxu1 %vm1327_vm3, %v1223_v9  ;;  %v1145_v8 = vld [vmem:[%s6115_s15 + $0x108] sm:$0xff]  ;;  %v1255_v9 = vld [vmem:[%s6115_s15 + $0x478] sm:$0xff] }
 0x312   : > { %5111 = vmatprep.mubr.msk.f32.mxu0 %vm1327_vm3, %v1114_v10  ;;  %5276 = vmatprep.mubr.msk.f32.mxu1 %vm1327_vm3, %v1224_v11  ;;  %v1146_v10 = vld [vmem:[%s6115_s15 + $0x110] sm:$0xff]  ;;  %v1256_v11 = vld [vmem:[%s6115_s15 + $0x480] sm:$0xff] }
 0x315   : > { %5112 = vmatmul.mubr.msk.f32.gmra.mrb[18].mxu0 %vm1327_vm3, %v1115_v12  ;;  %5277 = vmatmul.mubr.msk.f32.gmra.mrb[16].mxu1 %vm1327_vm3, %v1225_v13  ;;  %v1147_v12 = vld [vmem:[%s6115_s15 + $0x118] sm:$0xff]  ;;  %v1257_v13 = vld [vmem:[%s6115_s15 + $0x488] sm:$0xff] }
 0x316   : > { %5114 = vmatprep.mubr.msk.f32.mxu0 %vm1327_vm3, %v1116_v14  ;;  %5279 = vmatprep.mubr.msk.f32.mxu1 %vm1327_vm3, %v1226_v15  ;;  %v1148_v14 = vld [vmem:[%s6115_s15 + $0x120] sm:$0xff]  ;;  %v1258_v15 = vld [vmem:[%s6115_s15 + $0x490] sm:$0xff] }
 0x319   : > { %5115 = vmatmul.mubr.msk.f32.gmra.mrb[20].mxu0 %vm1327_vm3, %v1117_v16  ;;  %5280 = vmatmul.mubr.msk.f32.gmra.mrb[18].mxu1 %vm1327_vm3, %v1227_v17  ;;  %v1149_v16 = vld [vmem:[%s6115_s15 + $0x128] sm:$0xff]  ;;  %v1259_v17 = vld [vmem:[%s6115_s15 + $0x498] sm:$0xff] }
 0x31a   : > { %5117 = vmatprep.mubr.msk.f32.mxu0 %vm1327_vm3, %v1118_v18  ;;  %5282 = vmatprep.mubr.msk.f32.mxu1 %vm1327_vm3, %v1228_v19  ;;  %v1150_v18 = vld [vmem:[%s6115_s15 + $0x130] sm:$0xff]  ;;  %v1260_v19 = vld [vmem:[%s6115_s15 + $0x4a0] sm:$0xff] }
 0x31d   : > { %5118 = vmatmul.mubr.msk.f32.gmra.mrb[22].mxu0 %vm1327_vm3, %v1119_v20  ;;  %5283 = vmatmul.mubr.msk.f32.gmra.mrb[20].mxu1 %vm1327_vm3, %v1229_v21  ;;  %v1151_v20 = vld [vmem:[%s6115_s15 + $0x138] sm:$0xff]  ;;  %v1261_v21 = vld [vmem:[%s6115_s15 + $0x4a8] sm:$0xff] }
 0x31e   : > { %5120 = vmatprep.mubr.msk.f32.mxu0 %vm1327_vm3, %v1120_v22  ;;  %5285 = vmatprep.mubr.msk.f32.mxu1 %vm1327_vm3, %v1230_v23  ;;  %v1152_v22 = vld [vmem:[%s6115_s15 + $0x140] sm:$0xff]  ;;  %v1262_v23 = vld [vmem:[%s6115_s15 + $0x4b0] sm:$0xff] }
 0x321   : > { %5121 = vmatmul.mubr.msk.f32.gmra.mrb[24].mxu0 %vm1327_vm3, %v1121_v24  ;;  %5286 = vmatmul.mubr.msk.f32.gmra.mrb[22].mxu1 %vm1327_vm3, %v1231_v25  ;;  %v1153_v24 = vld [vmem:[%s6115_s15 + $0x148] sm:$0xff]  ;;  %v1263_v25 = vld [vmem:[%s6115_s15 + $0x4b8] sm:$0xff] }
 0x322   : > { %5123 = vmatprep.mubr.msk.f32.mxu0 %vm1327_vm3, %v1122_v26  ;;  %5288 = vmatprep.mubr.msk.f32.mxu1 %vm1327_vm3, %v1232_v27  ;;  %v1154_v26 = vld [vmem:[%s6115_s15 + $0x150] sm:$0xff]  ;;  %v1264_v27 = vld [vmem:[%s6115_s15 + $0x4c0] sm:$0xff] }
 0x325   : > { %5124 = vmatmul.mubr.msk.f32.gmra.mrb[26].mxu0 %vm1327_vm3, %v1123_v28  ;;  %5289 = vmatmul.mubr.msk.f32.gmra.mrb[24].mxu1 %vm1327_vm3, %v1233_v29  ;;  %v1155_v28 = vld [vmem:[%s6115_s15 + $0x158] sm:$0xff]  ;;  %v1265_v29 = vld [vmem:[%s6115_s15 + $0x4c8] sm:$0xff] }
 0x326   : > { %5126 = vmatprep.mubr.msk.f32.mxu0 %vm1327_vm3, %v1124_v30  ;;  %5291 = vmatprep.mubr.msk.f32.mxu1 %vm1327_vm3, %v1234_v31  ;;  %v1156_v30 = vld [vmem:[%s6115_s15 + $0x160] sm:$0xff]  ;;  %v1266_v31 = vld [vmem:[%s6115_s15 + $0x4d0] sm:$0xff] }
 0x329   : > { %5127 = vmatmul.mubr.msk.f32.gmra.mrb[28].mxu0 %vm1327_vm3, %v1125_v32  ;;  %5292 = vmatmul.mubr.msk.f32.gmra.mrb[26].mxu1 %vm1327_vm3, %v1235_v33  ;;  %v1157_v32 = vld [vmem:[%s6115_s15 + $0x168] sm:$0xff]  ;;  %v1267_v33 = vld [vmem:[%s6115_s15 + $0x4d8] sm:$0xff] }
 0x32a   : > { %5129 = vmatprep.mubr.msk.f32.mxu0 %vm1327_vm3, %v1126_v34  ;;  %5294 = vmatprep.mubr.msk.f32.mxu1 %vm1327_vm3, %v1236_v35  ;;  %v1158_v34 = vld [vmem:[%s6115_s15 + $0x170] sm:$0xff]  ;;  %v1268_v35 = vld [vmem:[%s6115_s15 + $0x4e0] sm:$0xff] }
 0x32d   : > { %5130 = vmatmul.mubr.msk.f32.gmra.mrb[30].mxu0 %vm1327_vm3, %v1127_v36  ;;  %5295 = vmatmul.mubr.msk.f32.gmra.mrb[28].mxu1 %vm1327_vm3, %v1237_v37  ;;  %v1159_v36 = vld [vmem:[%s6115_s15 + $0x178] sm:$0xff]  ;;  %v1269_v37 = vld [vmem:[%s6115_s15 + $0x4e8] sm:$0xff] }
 0x32e   : > { %5132 = vmatprep.mubr.msk.f32.mxu0 %vm1327_vm3, %v1128_v38  ;;  %5297 = vmatprep.mubr.msk.f32.mxu1 %vm1327_vm3, %v1238_v39  ;;  %v1160_v38 = vld [vmem:[%s6115_s15 + $0x180] sm:$0xff]  ;;  %v1270_v39 = vld [vmem:[%s6115_s15 + $0x4f0] sm:$0xff] }
 0x331   : > { %5133 = vmatmul.mubr.msk.f32.gmra.mrb[32].mxu0 %vm1327_vm3, %v1129_v40  ;;  %5298 = vmatmul.mubr.msk.f32.gmra.mrb[30].mxu1 %vm1327_vm3, %v1239_v41  ;;  %v1161_v40 = vld [vmem:[%s6115_s15 + $0x188] sm:$0xff]  ;;  %v1271_v41 = vld [vmem:[%s6115_s15 + $0x4f8] sm:$0xff] }
 0x332   : > { %5135 = vmatprep.mubr.msk.f32.mxu0 %vm1327_vm3, %v1130_v42  ;;  %5300 = vmatprep.mubr.msk.f32.mxu1 %vm1327_vm3, %v1240_v43  ;;  %v1162_v42 = vld [vmem:[%s6115_s15 + $0x190] sm:$0xff]  ;;  %v1272_v43 = vld [vmem:[%s6115_s15 + $0x500] sm:$0xff] }
 0x335   : > { %5136 = vmatmul.mubr.msk.f32.gmra.mrb[34].mxu0 %vm1327_vm3, %v1131_v44  ;;  %5301 = vmatmul.mubr.msk.f32.gmra.mrb[32].mxu1 %vm1327_vm3, %v1241_v45  ;;  %v1163_v44 = vld [vmem:[%s6115_s15 + $0x198] sm:$0xff]  ;;  %v1273_v45 = vld [vmem:[%s6115_s15 + $0x508] sm:$0xff] }
 0x336   : > { %5138 = vmatprep.mubr.msk.f32.mxu0 %vm1327_vm3, %v1132_v46  ;;  %5303 = vmatprep.mubr.msk.f32.mxu1 %vm1327_vm3, %v1242_v47  ;;  %v1164_v46 = vld [vmem:[%s6115_s15 + $0x1a0] sm:$0xff]  ;;  %v1274_v47 = vld [vmem:[%s6115_s15 + $0x510] sm:$0xff] }
 0x339   : > { %5139 = vmatmul.mubr.msk.f32.gmra.mrb[36].mxu0 %vm1327_vm3, %v1133_v48  ;;  %5304 = vmatmul.mubr.msk.f32.gmra.mrb[34].mxu1 %vm1327_vm3, %v1243_v49  ;;  %v1165_v48 = vld [vmem:[%s6115_s15 + $0x1a8] sm:$0xff]  ;;  %v1275_v49 = vld [vmem:[%s6115_s15 + $0x518] sm:$0xff] }
 0x33a   : > { %5141 = vmatprep.mubr.msk.f32.mxu0 %vm1327_vm3, %v1134_v50  ;;  %5306 = vmatprep.mubr.msk.f32.mxu1 %vm1327_vm3, %v1244_v51  ;;  %v1166_v50 = vld [vmem:[%s6115_s15 + $0x1b0] sm:$0xff]  ;;  %v1276_v51 = vld [vmem:[%s6115_s15 + $0x520] sm:$0xff] }
 0x33d   : > { %5142 = vmatmul.mubr.msk.f32.gmra.mrb[38].mxu0 %vm1327_vm3, %v1135_v52  ;;  %5307 = vmatmul.mubr.msk.f32.gmra.mrb[36].mxu1 %vm1327_vm3, %v1245_v53  ;;  %v1167_v52 = vld [vmem:[%s6115_s15 + $0x1b8] sm:$0xff]  ;;  %v1277_v53 = vld [vmem:[%s6115_s15 + $0x528] sm:$0xff] }
 0x33e   : > { %5144 = vmatprep.mubr.msk.f32.mxu0 %vm1327_vm3, %v1136_v54  ;;  %5309 = vmatprep.mubr.msk.f32.mxu1 %vm1327_vm3, %v1246_v55  ;;  %v1168_v54 = vld [vmem:[%s6115_s15 + $0x1c0] sm:$0xff]  ;;  %v1278_v55 = vld [vmem:[%s6115_s15 + $0x530] sm:$0xff] }
 0x341   : > { %5145 = vmatmul.mubr.msk.f32.gmra.mrb[40].mxu0 %vm1327_vm3, %v1137_v56  ;;  %5310 = vmatmul.mubr.msk.f32.gmra.mrb[38].mxu1 %vm1327_vm3, %v1247_v57  ;;  %v1169_v56 = vld [vmem:[%s6115_s15 + $0x1c8] sm:$0xff]  ;;  %v1279_v57 = vld [vmem:[%s6115_s15 + $0x538] sm:$0xff] }
 0x342   : > { %5147 = vmatprep.mubr.msk.f32.mxu0 %vm1327_vm3, %v1138_v58  ;;  %5312 = vmatprep.mubr.msk.f32.mxu1 %vm1327_vm3, %v1248_v59  ;;  %v1170_v58 = vld [vmem:[%s6115_s15 + $0x1d0] sm:$0xff]  ;;  %v1280_v59 = vld [vmem:[%s6115_s15 + $0x540] sm:$0xff] }
 0x345   : > { %5148 = vmatmul.mubr.msk.f32.gmra.mrb[42].mxu0 %vm1327_vm3, %v1139_v60  ;;  %5313 = vmatmul.mubr.msk.f32.gmra.mrb[40].mxu1 %vm1327_vm3, %v1249_v61  ;;  %v1171_v60 = vld [vmem:[%s6115_s15 + $0x1d8] sm:$0xff]  ;;  %v1281_v61 = vld [vmem:[%s6115_s15 + $0x548] sm:$0xff] }
 0x346   : > { %5150 = vmatprep.mubr.msk.f32.mxu0 %vm1327_vm3, %v1140_v62  ;;  %5315 = vmatprep.mubr.msk.f32.mxu1 %vm1327_vm3, %v1250_v63  ;;  %v1172_v62 = vld [vmem:[%s6115_s15 + $0x1e0] sm:$0xff]  ;;  %v1282_v63 = vld [vmem:[%s6115_s15 + $0x550] sm:$0xff] }
 0x349   : > { %5151 = vmatmul.mubr.msk.f32.gmra.mrb[44].mxu0 %vm1327_vm3, %v1141_v0  ;;  %5316 = vmatmul.mubr.msk.f32.gmra.mrb[42].mxu1 %vm1327_vm3, %v1251_v1  ;;  %v1173_v0 = vld [vmem:[%s6115_s15 + $0x1e8] sm:$0xff]  ;;  %v1283_v1 = vld [vmem:[%s6115_s15 + $0x558] sm:$0xff] }
 0x34a   : > { %5153 = vmatprep.mubr.msk.f32.mxu0 %vm1327_vm3, %v1142_v2  ;;  %5318 = vmatprep.mubr.msk.f32.mxu1 %vm1327_vm3, %v1252_v3  ;;  %v1174_v2 = vld [vmem:[%s6115_s15 + $0x1f0] sm:$0xff]  ;;  %v1284_v3 = vld [vmem:[%s6115_s15 + $0x560] sm:$0xff] }
 0x34d   : > { %5154 = vmatmul.mubr.msk.f32.gmra.mrb[46].mxu0 %vm1327_vm3, %v1143_v4  ;;  %5319 = vmatmul.mubr.msk.f32.gmra.mrb[44].mxu1 %vm1327_vm3, %v1253_v5  ;;  %v1175_v4 = vld [vmem:[%s6115_s15 + $0x1f8] sm:$0xff]  ;;  %v1285_v5 = vld [vmem:[%s6115_s15 + $0x568] sm:$0xff] }
 0x34e   : > { %5156 = vmatprep.mubr.msk.f32.mxu0 %vm1327_vm3, %v1144_v6  ;;  %5321 = vmatprep.mubr.msk.f32.mxu1 %vm1327_vm3, %v1254_v7  ;;  %v1176_v6 = vld [vmem:[%s6115_s15 + $0x200] sm:$0xff]  ;;  %v1286_v7 = vld [vmem:[%s6115_s15 + $0x570] sm:$0xff] }
 0x351   : > { %5157 = vmatmul.mubr.msk.f32.gmra.mrb[48].mxu0 %vm1327_vm3, %v1145_v8  ;;  %5322 = vmatmul.mubr.msk.f32.gmra.mrb[46].mxu1 %vm1327_vm3, %v1255_v9  ;;  %v1177_v8 = vld [vmem:[%s6115_s15 + $0x208] sm:$0xff]  ;;  %v1287_v9 = vld [vmem:[%s6115_s15 + $0x578] sm:$0xff] }
 0x352   : > { %5159 = vmatprep.mubr.msk.f32.mxu0 %vm1327_vm3, %v1146_v10  ;;  %5324 = vmatprep.mubr.msk.f32.mxu1 %vm1327_vm3, %v1256_v11  ;;  %v1178_v10 = vld [vmem:[%s6115_s15 + $0x210] sm:$0xff]  ;;  %v1288_v11 = vld [vmem:[%s6115_s15 + $0x580] sm:$0xff] }
 0x355   : > { %5160 = vmatmul.mubr.msk.f32.gmra.mrb[50].mxu0 %vm1327_vm3, %v1147_v12  ;;  %5325 = vmatmul.mubr.msk.f32.gmra.mrb[48].mxu1 %vm1327_vm3, %v1257_v13  ;;  %v1179_v12 = vld [vmem:[%s6115_s15 + $0x218] sm:$0xff]  ;;  %v1289_v13 = vld [vmem:[%s6115_s15 + $0x588] sm:$0xff] }
 0x356   : > { %5162 = vmatprep.mubr.msk.f32.mxu0 %vm1327_vm3, %v1148_v14  ;;  %5327 = vmatprep.mubr.msk.f32.mxu1 %vm1327_vm3, %v1258_v15  ;;  %v1180_v14 = vld [vmem:[%s6115_s15 + $0x220] sm:$0xff]  ;;  %v1290_v15 = vld [vmem:[%s6115_s15 + $0x590] sm:$0xff] }
 0x359   : > { %5163 = vmatmul.mubr.msk.f32.gmra.mrb[52].mxu0 %vm1327_vm3, %v1149_v16  ;;  %5328 = vmatmul.mubr.msk.f32.gmra.mrb[50].mxu1 %vm1327_vm3, %v1259_v17  ;;  %v1181_v16 = vld [vmem:[%s6115_s15 + $0x228] sm:$0xff]  ;;  %v1291_v17 = vld [vmem:[%s6115_s15 + $0x598] sm:$0xff] }
 0x35a   : > { %5165 = vmatprep.mubr.msk.f32.mxu0 %vm1327_vm3, %v1150_v18  ;;  %5330 = vmatprep.mubr.msk.f32.mxu1 %vm1327_vm3, %v1260_v19  ;;  %v1182_v18 = vld [vmem:[%s6115_s15 + $0x230] sm:$0xff]  ;;  %v1292_v19 = vld [vmem:[%s6115_s15 + $0x5a0] sm:$0xff] }
 0x35d   : > { %5166 = vmatmul.mubr.msk.f32.gmra.mrb[54].mxu0 %vm1327_vm3, %v1151_v20  ;;  %5331 = vmatmul.mubr.msk.f32.gmra.mrb[52].mxu1 %vm1327_vm3, %v1261_v21  ;;  %v1183_v20 = vld [vmem:[%s6115_s15 + $0x238] sm:$0xff]  ;;  %v1293_v21 = vld [vmem:[%s6115_s15 + $0x5a8] sm:$0xff] }
 0x35e   : > { %5168 = vmatprep.mubr.msk.f32.mxu0 %vm1327_vm3, %v1152_v22  ;;  %5333 = vmatprep.mubr.msk.f32.mxu1 %vm1327_vm3, %v1262_v23  ;;  %v1184_v22 = vld [vmem:[%s6115_s15 + $0x240] sm:$0xff]  ;;  %v1294_v23 = vld [vmem:[%s6115_s15 + $0x5b0] sm:$0xff] }
 0x361   : > { %5169 = vmatmul.mubr.msk.f32.gmra.mrb[56].mxu0 %vm1327_vm3, %v1153_v24  ;;  %5334 = vmatmul.mubr.msk.f32.gmra.mrb[54].mxu1 %vm1327_vm3, %v1263_v25  ;;  %v1185_v24 = vld [vmem:[%s6115_s15 + $0x248] sm:$0xff]  ;;  %v1295_v25 = vld [vmem:[%s6115_s15 + $0x5b8] sm:$0xff] }
 0x362   : > { %5171 = vmatprep.mubr.msk.f32.mxu0 %vm1327_vm3, %v1154_v26  ;;  %5336 = vmatprep.mubr.msk.f32.mxu1 %vm1327_vm3, %v1264_v27  ;;  %v1186_v26 = vld [vmem:[%s6115_s15 + $0x250] sm:$0xff]  ;;  %v1296_v27 = vld [vmem:[%s6115_s15 + $0x5c0] sm:$0xff] }
 0x365   : > { %5172 = vmatmul.mubr.msk.f32.gmra.mrb[58].mxu0 %vm1327_vm3, %v1155_v28  ;;  %5337 = vmatmul.mubr.msk.f32.gmra.mrb[56].mxu1 %vm1327_vm3, %v1265_v29  ;;  %v1187_v28 = vld [vmem:[%s6115_s15 + $0x258] sm:$0xff]  ;;  %v1297_v29 = vld [vmem:[%s6115_s15 + $0x5c8] sm:$0xff] }
 0x366   : > { %5174 = vmatprep.mubr.msk.f32.mxu0 %vm1327_vm3, %v1156_v30  ;;  %5339 = vmatprep.mubr.msk.f32.mxu1 %vm1327_vm3, %v1266_v31  ;;  %v1188_v30 = vld [vmem:[%s6115_s15 + $0x260] sm:$0xff]  ;;  %v1298_v31 = vld [vmem:[%s6115_s15 + $0x5d0] sm:$0xff] }
 0x369   : > { %5175 = vmatmul.mubr.msk.f32.gmra.mrb[60].mxu0 %vm1327_vm3, %v1157_v32  ;;  %5340 = vmatmul.mubr.msk.f32.gmra.mrb[58].mxu1 %vm1327_vm3, %v1267_v33  ;;  %v1189_v32 = vld [vmem:[%s6115_s15 + $0x268] sm:$0xff]  ;;  %v1299_v33 = vld [vmem:[%s6115_s15 + $0x5d8] sm:$0xff] }
 0x36a   : > { %5177 = vmatprep.mubr.msk.f32.mxu0 %vm1327_vm3, %v1158_v34  ;;  %5342 = vmatprep.mubr.msk.f32.mxu1 %vm1327_vm3, %v1268_v35  ;;  %v1190_v34 = vld [vmem:[%s6115_s15 + $0x270] sm:$0xff]  ;;  %v1300_v35 = vld [vmem:[%s6115_s15 + $0x5e0] sm:$0xff] }
 0x36d   : > { %5178 = vmatmul.mubr.msk.f32.gmra.mrb[62].mxu0 %vm1327_vm3, %v1159_v36  ;;  %5343 = vmatmul.mubr.msk.f32.gmra.mrb[60].mxu1 %vm1327_vm3, %v1269_v37  ;;  %v1191_v36 = vld [vmem:[%s6115_s15 + $0x278] sm:$0xff]  ;;  %v1301_v37 = vld [vmem:[%s6115_s15 + $0x5e8] sm:$0xff] }
 0x36e   : > { %5180 = vmatprep.mubr.msk.f32.mxu0 %vm1327_vm3, %v1160_v38  ;;  %5345 = vmatprep.mubr.msk.f32.mxu1 %vm1327_vm3, %v1270_v39  ;;  %v1192_v38 = vld [vmem:[%s6115_s15 + $0x280] sm:$0xff]  ;;  %v1302_v39 = vld [vmem:[%s6115_s15 + $0x5f0] sm:$0xff] }
 0x371   : > { %5181 = vmatmul.mubr.msk.f32.gmra.mrb[64].mxu0 %vm1327_vm3, %v1161_v40  ;;  %5346 = vmatmul.mubr.msk.f32.gmra.mrb[62].mxu1 %vm1327_vm3, %v1271_v41  ;;  %v1193_v40 = vld [vmem:[%s6115_s15 + $0x288] sm:$0xff]  ;;  %v1303_v41 = vld [vmem:[%s6115_s15 + $0x5f8] sm:$0xff] }
 0x372   : > { %5183 = vmatprep.mubr.msk.f32.mxu0 %vm1327_vm3, %v1162_v42  ;;  %5348 = vmatprep.mubr.msk.f32.mxu1 %vm1327_vm3, %v1272_v43  ;;  %v1194_v42 = vld [vmem:[%s6115_s15 + $0x290] sm:$0xff]  ;;  %v1304_v43 = vld [vmem:[%s6115_s15 + $0x600] sm:$0xff] }
 0x375   : > { %5184 = vmatmul.mubr.msk.f32.gmra.mrb[66].mxu0 %vm1327_vm3, %v1163_v44  ;;  %5349 = vmatmul.mubr.msk.f32.gmra.mrb[64].mxu1 %vm1327_vm3, %v1273_v45  ;;  %v1195_v44 = vld [vmem:[%s6115_s15 + $0x298] sm:$0xff]  ;;  %v1305_v45 = vld [vmem:[%s6115_s15 + $0x608] sm:$0xff] }
 0x376   : > { %5186 = vmatprep.mubr.msk.f32.mxu0 %vm1327_vm3, %v1164_v46  ;;  %5351 = vmatprep.mubr.msk.f32.mxu1 %vm1327_vm3, %v1274_v47  ;;  %v1196_v46 = vld [vmem:[%s6115_s15 + $0x2a0] sm:$0xff]  ;;  %v1306_v47 = vld [vmem:[%s6115_s15 + $0x610] sm:$0xff] }
 0x379   : > { %5187 = vmatmul.mubr.msk.f32.gmra.mrb[68].mxu0 %vm1327_vm3, %v1165_v48  ;;  %5352 = vmatmul.mubr.msk.f32.gmra.mrb[66].mxu1 %vm1327_vm3, %v1275_v49  ;;  %v1197_v48 = vld [vmem:[%s6115_s15 + $0x2a8] sm:$0xff]  ;;  %v1307_v49 = vld [vmem:[%s6115_s15 + $0x618] sm:$0xff] }
 0x37a   : > { %5189 = vmatprep.mubr.msk.f32.mxu0 %vm1327_vm3, %v1166_v50  ;;  %5354 = vmatprep.mubr.msk.f32.mxu1 %vm1327_vm3, %v1276_v51  ;;  %v1198_v50 = vld [vmem:[%s6115_s15 + $0x2b0] sm:$0xff]  ;;  %v1308_v51 = vld [vmem:[%s6115_s15 + $0x620] sm:$0xff] }
 0x37d   : > { %5190 = vmatmul.mubr.msk.f32.gmra.mrb[70].mxu0 %vm1327_vm3, %v1167_v52  ;;  %5355 = vmatmul.mubr.msk.f32.gmra.mrb[68].mxu1 %vm1327_vm3, %v1277_v53  ;;  %v1199_v52 = vld [vmem:[%s6115_s15 + $0x2b8] sm:$0xff]  ;;  %v1309_v53 = vld [vmem:[%s6115_s15 + $0x628] sm:$0xff] }
 0x37e   : > { %5192 = vmatprep.mubr.msk.f32.mxu0 %vm1327_vm3, %v1168_v54  ;;  %5357 = vmatprep.mubr.msk.f32.mxu1 %vm1327_vm3, %v1278_v55  ;;  %v1200_v54 = vld [vmem:[%s6115_s15 + $0x2c0] sm:$0xff]  ;;  %v1310_v55 = vld [vmem:[%s6115_s15 + $0x630] sm:$0xff] }
 0x381   : > { %5193 = vmatmul.mubr.msk.f32.gmra.mrb[72].mxu0 %vm1327_vm3, %v1169_v56  ;;  %5358 = vmatmul.mubr.msk.f32.gmra.mrb[70].mxu1 %vm1327_vm3, %v1279_v57  ;;  %v1201_v56 = vld [vmem:[%s6115_s15 + $0x2c8] sm:$0xff]  ;;  %v1311_v57 = vld [vmem:[%s6115_s15 + $0x638] sm:$0xff] }
 0x382   : > { %5195 = vmatprep.mubr.msk.f32.mxu0 %vm1327_vm3, %v1170_v58  ;;  %5360 = vmatprep.mubr.msk.f32.mxu1 %vm1327_vm3, %v1280_v59  ;;  %v1202_v58 = vld [vmem:[%s6115_s15 + $0x2d0] sm:$0xff]  ;;  %v1312_v59 = vld [vmem:[%s6115_s15 + $0x640] sm:$0xff] }
 0x385   : > { %5196 = vmatmul.mubr.msk.f32.gmra.mrb[74].mxu0 %vm1327_vm3, %v1171_v60  ;;  %5361 = vmatmul.mubr.msk.f32.gmra.mrb[72].mxu1 %vm1327_vm3, %v1281_v61  ;;  %v1203_v60 = vld [vmem:[%s6115_s15 + $0x2d8] sm:$0xff]  ;;  %v1313_v61 = vld [vmem:[%s6115_s15 + $0x648] sm:$0xff] }
 0x386   : > { %5198 = vmatprep.mubr.msk.f32.mxu0 %vm1327_vm3, %v1172_v62  ;;  %5363 = vmatprep.mubr.msk.f32.mxu1 %vm1327_vm3, %v1282_v63  ;;  %v1204_v62 = vld [vmem:[%s6115_s15 + $0x2e0] sm:$0xff]  ;;  %v1314_v63 = vld [vmem:[%s6115_s15 + $0x650] sm:$0xff] }
 0x389   : > { %5199 = vmatmul.mubr.msk.f32.gmra.mrb[76].mxu0 %vm1327_vm3, %v1173_v0  ;;  %5364 = vmatmul.mubr.msk.f32.gmra.mrb[74].mxu1 %vm1327_vm3, %v1283_v1  ;;  %v1205_v0 = vld [vmem:[%s6115_s15 + $0x2e8] sm:$0xff]  ;;  %v1315_v1 = vld [vmem:[%s6115_s15 + $0x658] sm:$0xff] }
 0x38a   : > { %5201 = vmatprep.mubr.msk.f32.mxu0 %vm1327_vm3, %v1174_v2  ;;  %5366 = vmatprep.mubr.msk.f32.mxu1 %vm1327_vm3, %v1284_v3  ;;  %v1206_v2 = vld [vmem:[%s6115_s15 + $0x2f0] sm:$0xff]  ;;  %v1316_v3 = vld [vmem:[%s6115_s15 + $0x660] sm:$0xff] }
 0x38d   : > { %5202 = vmatmul.mubr.msk.f32.gmra.mrb[78].mxu0 %vm1327_vm3, %v1175_v4  ;;  %5367 = vmatmul.mubr.msk.f32.gmra.mrb[76].mxu1 %vm1327_vm3, %v1285_v5  ;;  %v1207_v4 = vld [vmem:[%s6115_s15 + $0x2f8] sm:$0xff]  ;;  %v1317_v5 = vld [vmem:[%s6115_s15 + $0x668] sm:$0xff] }
 0x38e   : > { %5204 = vmatprep.mubr.msk.f32.mxu0 %vm1327_vm3, %v1176_v6  ;;  %5369 = vmatprep.mubr.msk.f32.mxu1 %vm1327_vm3, %v1286_v7  ;;  %v1208_v6 = vld [vmem:[%s6115_s15 + $0x300] sm:$0xff]  ;;  %v1318_v7 = vld [vmem:[%s6115_s15 + $0x670] sm:$0xff] }
 0x391   : > { %5205 = vmatmul.mubr.msk.f32.gmra.mrb[80].mxu0 %vm1327_vm3, %v1177_v8  ;;  %5370 = vmatmul.mubr.msk.f32.gmra.mrb[78].mxu1 %vm1327_vm3, %v1287_v9  ;;  %v1209_v8 = vld [vmem:[%s6115_s15 + $0x308] sm:$0xff]  ;;  %v1319_v9 = vld [vmem:[%s6115_s15 + $0x678] sm:$0xff] }
 0x392   : > { %5207 = vmatprep.mubr.msk.f32.mxu0 %vm1327_vm3, %v1178_v10  ;;  %5372 = vmatprep.mubr.msk.f32.mxu1 %vm1327_vm3, %v1288_v11  ;;  %v1210_v10 = vld [vmem:[%s6115_s15 + $0x310] sm:$0xff]  ;;  %v1211_v11 = vld [vmem:[%s6115_s15 + $0x318] sm:$0xff] }
 0x395   : > { %5208 = vmatmul.mubr.msk.f32.gmra.mrb[82].mxu0 %vm1327_vm3, %v1179_v12  ;;  %5373 = vmatmul.mubr.msk.f32.gmra.mrb[80].mxu1 %vm1327_vm3, %v1289_v13  ;;  %v1212_v12 = vld [vmem:[%s6115_s15 + $0x320] sm:$0xff]  ;;  %v1213_v13 = vld [vmem:[%s6115_s15 + $0x328] sm:$0xff] }
 0x396   : > { %5210 = vmatprep.mubr.msk.f32.mxu0 %vm1327_vm3, %v1180_v14  ;;  %5375 = vmatprep.mubr.msk.f32.mxu1 %vm1327_vm3, %v1290_v15  ;;  %v1214_v14 = vld [vmem:[%s6115_s15 + $0x330] sm:$0xff]  ;;  %v1215_v15 = vld [vmem:[%s6115_s15 + $0x338] sm:$0xff] }
 0x399   : > { %5211 = vmatmul.mubr.msk.f32.gmra.mrb[84].mxu0 %vm1327_vm3, %v1181_v16  ;;  %5376 = vmatmul.mubr.msk.f32.gmra.mrb[82].mxu1 %vm1327_vm3, %v1291_v17  ;;  %v1216_v16 = vld [vmem:[%s6115_s15 + $0x340] sm:$0xff]  ;;  %v1217_v17 = vld [vmem:[%s6115_s15 + $0x348] sm:$0xff] }
 0x39a   : > { %5213 = vmatprep.mubr.msk.f32.mxu0 %vm1327_vm3, %v1182_v18  ;;  %5378 = vmatprep.mubr.msk.f32.mxu1 %vm1327_vm3, %v1292_v19  ;;  %v1218_v18 = vld [vmem:[%s6115_s15 + $0x350] sm:$0xff]  ;;  %v6530_v19 = vld [vmem:[%s7404_s8] ss:$0 sm:$0xff] }
 0x39d   : > { %5214 = vmatmul.mubr.msk.f32.gmra.mrb[86].mxu0 %vm1327_vm3, %v1183_v20  ;;  %5379 = vmatmul.mubr.msk.f32.gmra.mrb[84].mxu1 %vm1327_vm3, %v1293_v21  ;;  %v1219_v20 = vld [vmem:[%s6115_s15 + $0x358] sm:$0xff]  ;;  %v1220_v21 = vld [vmem:[%s6115_s15 + $0x360] sm:$0xff] }
 0x39e   : > { %5216 = vmatprep.mubr.msk.f32.mxu0 %vm1327_vm3, %v1184_v22  ;;  %5381 = vmatprep.mubr.msk.f32.mxu1 %vm1327_vm3, %v1294_v23 }
 0x3a1   : > { %5217 = vmatmul.mubr.msk.f32.gmra.mrb[88].mxu0 %vm1327_vm3, %v1185_v24  ;;  %5382 = vmatmul.mubr.msk.f32.gmra.mrb[86].mxu1 %vm1327_vm3, %v1295_v25 }
 0x3a2   : > { %5219 = vmatprep.mubr.msk.f32.mxu0 %vm1327_vm3, %v1186_v26  ;;  %5384 = vmatprep.mubr.msk.f32.mxu1 %vm1327_vm3, %v1296_v27 }
 0x3a5   : > { %5220 = vmatmul.mubr.msk.f32.gmra.mrb[90].mxu0 %vm1327_vm3, %v1187_v28  ;;  %5385 = vmatmul.mubr.msk.f32.gmra.mrb[88].mxu1 %vm1327_vm3, %v1297_v29  ;;  %v1221_v29 = vld [vmem:[%s6115_s15 + $0x368] sm:$0xff] }
 0x3a6   : > { %5222 = vmatprep.mubr.msk.f32.mxu0 %vm1327_vm3, %v1188_v30  ;;  %5387 = vmatprep.mubr.msk.f32.mxu1 %vm1327_vm3, %v1298_v31 }
 0x3a9   : > { %5223 = vmatmul.mubr.msk.f32.gmra.mrb[92].mxu0 %vm1327_vm3, %v1189_v32  ;;  %5388 = vmatmul.mubr.msk.f32.gmra.mrb[90].mxu1 %vm1327_vm3, %v1299_v33 }
 0x3aa   : > { %5225 = vmatprep.mubr.msk.f32.mxu0 %vm1327_vm3, %v1190_v34  ;;  %5390 = vmatprep.mubr.msk.f32.mxu1 %vm1327_vm3, %v1300_v35 }
 0x3ad   : > { %5226 = vmatmul.mubr.msk.f32.gmra.mrb[94].mxu0 %vm1327_vm3, %v1191_v36  ;;  %5391 = vmatmul.mubr.msk.f32.gmra.mrb[92].mxu1 %vm1327_vm3, %v1301_v37 }
 0x3ae   : > { %5228 = vmatprep.mubr.msk.f32.mxu0 %vm1327_vm3, %v1192_v38  ;;  %5393 = vmatprep.mubr.msk.f32.mxu1 %vm1327_vm3, %v1302_v39 }
 0x3b1   : > { %5229 = vmatmul.mubr.msk.f32.gmra.mrb[96].mxu0 %vm1327_vm3, %v1193_v40  ;;  %5394 = vmatmul.mubr.msk.f32.gmra.mrb[94].mxu1 %vm1327_vm3, %v1303_v41 }
 0x3b2   : > { %5231 = vmatprep.mubr.msk.f32.mxu0 %vm1327_vm3, %v1194_v42  ;;  %5396 = vmatprep.mubr.msk.f32.mxu1 %vm1327_vm3, %v1304_v43 }
 0x3b5   : > { %5232 = vmatmul.mubr.msk.f32.gmra.mrb[98].mxu0 %vm1327_vm3, %v1195_v44  ;;  %5397 = vmatmul.mubr.msk.f32.gmra.mrb[96].mxu1 %vm1327_vm3, %v1305_v45 }
 0x3b6   : > { %5234 = vmatprep.mubr.msk.f32.mxu0 %vm1327_vm3, %v1196_v46  ;;  %5399 = vmatprep.mubr.msk.f32.mxu1 %vm1327_vm3, %v1306_v47 }
 0x3b9   : > { %5235 = vmatmul.mubr.msk.f32.gmra.mrb[100].mxu0 %vm1327_vm3, %v1197_v48  ;;  %5400 = vmatmul.mubr.msk.f32.gmra.mrb[98].mxu1 %vm1327_vm3, %v1307_v49 }
 0x3ba   : > { %5237 = vmatprep.mubr.msk.f32.mxu0 %vm1327_vm3, %v1198_v50  ;;  %5402 = vmatprep.mubr.msk.f32.mxu1 %vm1327_vm3, %v1308_v51 }
 0x3bd   : > { %5238 = vmatmul.mubr.msk.f32.gmra.mrb[102].mxu0 %vm1327_vm3, %v1199_v52  ;;  %5403 = vmatmul.mubr.msk.f32.gmra.mrb[100].mxu1 %vm1327_vm3, %v1309_v53 }
 0x3be   : > { %5240 = vmatprep.mubr.msk.f32.mxu0 %vm1327_vm3, %v1200_v54  ;;  %5405 = vmatprep.mubr.msk.f32.mxu1 %vm1327_vm3, %v1310_v55 }
 0x3c1   : > { %5241 = vmatmul.mubr.msk.f32.gmra.mrb[104].mxu0 %vm1327_vm3, %v1201_v56  ;;  %5406 = vmatmul.mubr.msk.f32.gmra.mrb[102].mxu1 %vm1327_vm3, %v1311_v57 }
 0x3c2   : > { %5243 = vmatprep.mubr.msk.f32.mxu0 %vm1327_vm3, %v1202_v58  ;;  %5408 = vmatprep.mubr.msk.f32.mxu1 %vm1327_vm3, %v1312_v59 }
 0x3c5   : > { %5244 = vmatmul.mubr.msk.f32.gmra.mrb[106].mxu0 %vm1327_vm3, %v1203_v60  ;;  %5409 = vmatmul.mubr.msk.f32.gmra.mrb[104].mxu1 %vm1327_vm3, %v1313_v61 }
 0x3c6   : > { %5246 = vmatprep.mubr.msk.f32.mxu0 %vm1327_vm3, %v1204_v62  ;;  %5411 = vmatprep.mubr.msk.f32.mxu1 %vm1327_vm3, %v1314_v63 }
 0x3c9   : > { %5247 = vmatmul.mubr.msk.f32.gmra.mrb[108].mxu0 %vm1327_vm3, %v1205_v0  ;;  %5412 = vmatmul.mubr.msk.f32.gmra.mrb[106].mxu1 %vm1327_vm3, %v1315_v1 }
 0x3ca   : > { %5249 = vmatprep.mubr.msk.f32.mxu0 %vm1327_vm3, %v1206_v2  ;;  %5414 = vmatprep.mubr.msk.f32.mxu1 %vm1327_vm3, %v1316_v3 }
 0x3cd   : > { %5250 = vmatmul.mubr.msk.f32.gmra.mrb[110].mxu0 %vm1327_vm3, %v1207_v4  ;;  %5415 = vmatmul.mubr.msk.f32.gmra.mrb[108].mxu1 %vm1327_vm3, %v1317_v5 }
 0x3ce   : > { %5252 = vmatprep.mubr.msk.f32.mxu0 %vm1327_vm3, %v1208_v6  ;;  %5417 = vmatprep.mubr.msk.f32.mxu1 %vm1327_vm3, %v1318_v7 }
 0x3d1   : > { %5253 = vmatmul.mubr.msk.f32.gmra.mrb[112].mxu0 %vm1327_vm3, %v1209_v8  ;;  %5418 = vmatmul.mubr.msk.f32.gmra.mrb[110].mxu1 %vm1327_vm3, %v1319_v9 }
 0x3d2   : > { %5255 = vmatprep.mubr.msk.f32.mxu0 %vm1327_vm3, %v1210_v10 }
 0x3d5   : > { %5256 = vmatmul.mubr.msk.f32.gmra.mrb[114].mxu0 %vm1327_vm3, %v1211_v11 }
 0x3d6   : > { %5258 = vmatprep.mubr.msk.f32.mxu0 %vm1327_vm3, %v1212_v12 }
 0x3d9   : > { %5259 = vmatmul.mubr.msk.f32.gmra.mrb[116].mxu0 %vm1327_vm3, %v1213_v13 }
 0x3da   : > { %5261 = vmatprep.mubr.msk.f32.mxu0 %vm1327_vm3, %v1214_v14 }
 0x3dd   : > { %5262 = vmatmul.mubr.msk.f32.gmra.mrb[118].mxu0 %vm1327_vm3, %v1215_v15 }
 0x3de   : > { %5264 = vmatprep.mubr.msk.f32.mxu0 %vm1327_vm3, %v1216_v16 }
 0x3e1   : > { %5265 = vmatmul.mubr.msk.f32.gmra.mrb[120].mxu0 %vm1327_vm3, %v1217_v17 }
 0x3e2   : > { %5267 = vmatprep.mubr.msk.f32.mxu0 %vm1327_vm3, %v1218_v18 }
 0x3e4   : > { %v5110_v22 = vpop.f32.mrb[16].mxu0  ;;  %v5275_v23 = vpop.f32.mrb[14].mxu1 }
 0x3e5   : > { %v2024_v24 = vadd.f32 %v5110_v22, %v6530_v19  ;;  %v2018_v25 = vpop.f32.mrb[17].mxu0  ;;  %5268 = vmatmul.mubr.msk.f32.gmra.mrb[122].mxu0 %vm1327_vm3, %v1219_v20  ;;  %v2574_v26 = vadd.f32 %v5275_v23, %v6530_v19  ;;  %v2568_v27 = vpop.f32.mrb[15].mxu1 }
 0x3e6   : > { %v2019_v28 = vadd.f32 %v6530_v19, %v2018_v25  ;;  %5270 = vmatprep.mubr.msk.f32.mxu0 %vm1327_vm3, %v1220_v21  ;;  %v2569_v30 = vadd.f32 %v6530_v19, %v2568_v27 }
 0x3e7   : > { %v3058_v31 = vmax.f32 %v2024_v24, 0.0  ;;  %v3168_v32 = vmax.f32 %v2574_v26, 0.0 }
 0x3e8   : > { %v3057_v33 = vmax.f32 %v2019_v28, 0.0  ;;  %v5113_v34 = vpop.f32.mrb[18].mxu0  ;;  %v3167_v35 = vmax.f32 %v2569_v30, 0.0  ;;  %v5278_v36 = vpop.f32.mrb[16].mxu1 }
 0x3e9   : > { %3266 = vst [vmem:[%s6542_s30 + $0x8] sm:$0xff] %v3058_v31  ;;  %v2034_v37 = vadd.f32 %v5113_v34, %v6530_v19  ;;  %v2028_v38 = vpop.f32.mrb[19].mxu0  ;;  %5271 = vmatmul.mubr.msk.f32.gmra.mrb[124].mxu0 %vm1327_vm3, %v1221_v29  ;;  %3376 = vst [vmem:[%s6542_s30 + $0x378] sm:$0xff] %v3168_v32  ;;  %v2584_v39 = vadd.f32 %v5278_v36, %v6530_v19  ;;  %v2578_v40 = vpop.f32.mrb[17].mxu1 }
 0x3ea   : > { %3265 = vst [vmem:[%s6542_s30] sm:$0xff] %v3057_v33  ;;  %v2029_v41 = vadd.f32 %v6530_v19, %v2028_v38  ;;  %3375 = vst [vmem:[%s6542_s30 + $0x370] sm:$0xff] %v3167_v35  ;;  %v2579_v42 = vadd.f32 %v6530_v19, %v2578_v40 }
 0x3eb   : > { %v3060_v43 = vmax.f32 %v2034_v37, 0.0  ;;  %v3170_v44 = vmax.f32 %v2584_v39, 0.0 }
 0x3ec   : > { %v3059_v45 = vmax.f32 %v2029_v41, 0.0  ;;  %v5116_v46 = vpop.f32.mrb[20].mxu0  ;;  %v3169_v47 = vmax.f32 %v2579_v42, 0.0  ;;  %v5281_v48 = vpop.f32.mrb[18].mxu1 }
 0x3ed   : > { %3268 = vst [vmem:[%s6542_s30 + $0x18] sm:$0xff] %v3060_v43  ;;  %v2044_v49 = vadd.f32 %v5116_v46, %v6530_v19  ;;  %v2038_v50 = vpop.f32.mrb[21].mxu0  ;;  %3378 = vst [vmem:[%s6542_s30 + $0x388] sm:$0xff] %v3170_v44  ;;  %v2594_v51 = vadd.f32 %v5281_v48, %v6530_v19  ;;  %v2588_v52 = vpop.f32.mrb[19].mxu1 }
 0x3ee   : > { %3267 = vst [vmem:[%s6542_s30 + $0x10] sm:$0xff] %v3059_v45  ;;  %v2039_v53 = vadd.f32 %v6530_v19, %v2038_v50  ;;  %3377 = vst [vmem:[%s6542_s30 + $0x380] sm:$0xff] %v3169_v47  ;;  %v2589_v54 = vadd.f32 %v6530_v19, %v2588_v52 }
 0x3ef   : > { %v3062_v55 = vmax.f32 %v2044_v49, 0.0  ;;  %v3172_v56 = vmax.f32 %v2594_v51, 0.0 }
 0x3f0   : > { %v3061_v57 = vmax.f32 %v2039_v53, 0.0  ;;  %v5119_v58 = vpop.f32.mrb[22].mxu0  ;;  %v3171_v59 = vmax.f32 %v2589_v54, 0.0  ;;  %v5284_v60 = vpop.f32.mrb[20].mxu1 }
 0x3f1   : > { %3270 = vst [vmem:[%s6542_s30 + $0x28] sm:$0xff] %v3062_v55  ;;  %v2054_v61 = vadd.f32 %v5119_v58, %v6530_v19  ;;  %v2048_v62 = vpop.f32.mrb[23].mxu0  ;;  %3380 = vst [vmem:[%s6542_s30 + $0x398] sm:$0xff] %v3172_v56  ;;  %v2604_v63 = vadd.f32 %v5284_v60, %v6530_v19  ;;  %v2598_v0 = vpop.f32.mrb[21].mxu1 }
 0x3f2   : > { %3269 = vst [vmem:[%s6542_s30 + $0x20] sm:$0xff] %v3061_v57  ;;  %v2049_v1 = vadd.f32 %v6530_v19, %v2048_v62  ;;  %3379 = vst [vmem:[%s6542_s30 + $0x390] sm:$0xff] %v3171_v59  ;;  %v2599_v2 = vadd.f32 %v6530_v19, %v2598_v0 }
 0x3f3   : > { %v3064_v3 = vmax.f32 %v2054_v61, 0.0  ;;  %v3174_v4 = vmax.f32 %v2604_v63, 0.0 }
 0x3f4   : > { %v3063_v5 = vmax.f32 %v2049_v1, 0.0  ;;  %v5122_v6 = vpop.f32.mrb[24].mxu0  ;;  %v3173_v7 = vmax.f32 %v2599_v2, 0.0  ;;  %v5287_v8 = vpop.f32.mrb[22].mxu1 }
 0x3f5   : > { %3272 = vst [vmem:[%s6542_s30 + $0x38] sm:$0xff] %v3064_v3  ;;  %v2064_v9 = vadd.f32 %v5122_v6, %v6530_v19  ;;  %v2058_v10 = vpop.f32.mrb[25].mxu0  ;;  %3382 = vst [vmem:[%s6542_s30 + $0x3a8] sm:$0xff] %v3174_v4  ;;  %v2614_v11 = vadd.f32 %v5287_v8, %v6530_v19  ;;  %v2608_v12 = vpop.f32.mrb[23].mxu1 }
 0x3f6   : > { %3271 = vst [vmem:[%s6542_s30 + $0x30] sm:$0xff] %v3063_v5  ;;  %v2059_v13 = vadd.f32 %v6530_v19, %v2058_v10  ;;  %3381 = vst [vmem:[%s6542_s30 + $0x3a0] sm:$0xff] %v3173_v7  ;;  %v2609_v14 = vadd.f32 %v6530_v19, %v2608_v12 }
 0x3f7   : > { %v3066_v15 = vmax.f32 %v2064_v9, 0.0  ;;  %v3176_v16 = vmax.f32 %v2614_v11, 0.0 }
 0x3f8   : > { %v3065_v17 = vmax.f32 %v2059_v13, 0.0  ;;  %v5125_v18 = vpop.f32.mrb[26].mxu0  ;;  %v3175_v20 = vmax.f32 %v2609_v14, 0.0  ;;  %v5290_v21 = vpop.f32.mrb[24].mxu1 }
 0x3f9   : > { %3274 = vst [vmem:[%s6542_s30 + $0x48] sm:$0xff] %v3066_v15  ;;  %v2074_v22 = vadd.f32 %v5125_v18, %v6530_v19  ;;  %v2068_v23 = vpop.f32.mrb[27].mxu0  ;;  %3384 = vst [vmem:[%s6542_s30 + $0x3b8] sm:$0xff] %v3176_v16  ;;  %v2624_v24 = vadd.f32 %v5290_v21, %v6530_v19  ;;  %v2618_v25 = vpop.f32.mrb[25].mxu1 }
 0x3fa   : > { %3273 = vst [vmem:[%s6542_s30 + $0x40] sm:$0xff] %v3065_v17  ;;  %v2069_v26 = vadd.f32 %v6530_v19, %v2068_v23  ;;  %3383 = vst [vmem:[%s6542_s30 + $0x3b0] sm:$0xff] %v3175_v20  ;;  %v2619_v27 = vadd.f32 %v6530_v19, %v2618_v25 }
 0x3fb   : > { %v3068_v28 = vmax.f32 %v2074_v22, 0.0  ;;  %v3178_v29 = vmax.f32 %v2624_v24, 0.0 }
 0x3fc   : > { %v3067_v30 = vmax.f32 %v2069_v26, 0.0  ;;  %v5128_v31 = vpop.f32.mrb[28].mxu0  ;;  %v3177_v32 = vmax.f32 %v2619_v27, 0.0  ;;  %v5293_v33 = vpop.f32.mrb[26].mxu1 }
 0x3fd   : > { %3276 = vst [vmem:[%s6542_s30 + $0x58] sm:$0xff] %v3068_v28  ;;  %v2084_v34 = vadd.f32 %v5128_v31, %v6530_v19  ;;  %v2078_v35 = vpop.f32.mrb[29].mxu0  ;;  %3386 = vst [vmem:[%s6542_s30 + $0x3c8] sm:$0xff] %v3178_v29  ;;  %v2634_v36 = vadd.f32 %v5293_v33, %v6530_v19  ;;  %v2628_v37 = vpop.f32.mrb[27].mxu1 }
 0x3fe   : > { %3275 = vst [vmem:[%s6542_s30 + $0x50] sm:$0xff] %v3067_v30  ;;  %v2079_v38 = vadd.f32 %v6530_v19, %v2078_v35  ;;  %3385 = vst [vmem:[%s6542_s30 + $0x3c0] sm:$0xff] %v3177_v32  ;;  %v2629_v39 = vadd.f32 %v6530_v19, %v2628_v37 }
 0x3ff   : > { %v3070_v40 = vmax.f32 %v2084_v34, 0.0  ;;  %v3180_v41 = vmax.f32 %v2634_v36, 0.0 }
 0x400   : > { %v3069_v42 = vmax.f32 %v2079_v38, 0.0  ;;  %v5131_v43 = vpop.f32.mrb[30].mxu0  ;;  %v3179_v44 = vmax.f32 %v2629_v39, 0.0  ;;  %v5296_v45 = vpop.f32.mrb[28].mxu1 }
 0x401   : > { %3278 = vst [vmem:[%s6542_s30 + $0x68] sm:$0xff] %v3070_v40  ;;  %v2094_v46 = vadd.f32 %v5131_v43, %v6530_v19  ;;  %v2088_v47 = vpop.f32.mrb[31].mxu0  ;;  %3388 = vst [vmem:[%s6542_s30 + $0x3d8] sm:$0xff] %v3180_v41  ;;  %v2644_v48 = vadd.f32 %v5296_v45, %v6530_v19  ;;  %v2638_v49 = vpop.f32.mrb[29].mxu1 }
 0x402   : > { %3277 = vst [vmem:[%s6542_s30 + $0x60] sm:$0xff] %v3069_v42  ;;  %v2089_v50 = vadd.f32 %v6530_v19, %v2088_v47  ;;  %3387 = vst [vmem:[%s6542_s30 + $0x3d0] sm:$0xff] %v3179_v44  ;;  %v2639_v51 = vadd.f32 %v6530_v19, %v2638_v49 }
 0x403   : > { %v3072_v52 = vmax.f32 %v2094_v46, 0.0  ;;  %v3182_v53 = vmax.f32 %v2644_v48, 0.0 }
 0x404   : > { %v3071_v54 = vmax.f32 %v2089_v50, 0.0  ;;  %v5134_v55 = vpop.f32.mrb[32].mxu0  ;;  %v3181_v56 = vmax.f32 %v2639_v51, 0.0  ;;  %v5299_v57 = vpop.f32.mrb[30].mxu1 }
 0x405   : > { %3280 = vst [vmem:[%s6542_s30 + $0x78] sm:$0xff] %v3072_v52  ;;  %v2104_v58 = vadd.f32 %v5134_v55, %v6530_v19  ;;  %v2098_v59 = vpop.f32.mrb[33].mxu0  ;;  %3390 = vst [vmem:[%s6542_s30 + $0x3e8] sm:$0xff] %v3182_v53  ;;  %v2654_v60 = vadd.f32 %v5299_v57, %v6530_v19  ;;  %v2648_v61 = vpop.f32.mrb[31].mxu1 }
 0x406   : > { %3279 = vst [vmem:[%s6542_s30 + $0x70] sm:$0xff] %v3071_v54  ;;  %v2099_v62 = vadd.f32 %v6530_v19, %v2098_v59  ;;  %3389 = vst [vmem:[%s6542_s30 + $0x3e0] sm:$0xff] %v3181_v56  ;;  %v2649_v63 = vadd.f32 %v6530_v19, %v2648_v61 }
 0x407   : > { %v3074_v0 = vmax.f32 %v2104_v58, 0.0  ;;  %v3184_v1 = vmax.f32 %v2654_v60, 0.0 }
 0x408   : > { %v3073_v2 = vmax.f32 %v2099_v62, 0.0  ;;  %v5137_v3 = vpop.f32.mrb[34].mxu0  ;;  %v3183_v4 = vmax.f32 %v2649_v63, 0.0  ;;  %v5302_v5 = vpop.f32.mrb[32].mxu1 }
 0x409   : > { %3282 = vst [vmem:[%s6542_s30 + $0x88] sm:$0xff] %v3074_v0  ;;  %v2114_v6 = vadd.f32 %v5137_v3, %v6530_v19  ;;  %v2108_v7 = vpop.f32.mrb[35].mxu0  ;;  %3392 = vst [vmem:[%s6542_s30 + $0x3f8] sm:$0xff] %v3184_v1  ;;  %v2664_v8 = vadd.f32 %v5302_v5, %v6530_v19  ;;  %v2658_v9 = vpop.f32.mrb[33].mxu1 }
 0x40a   : > { %3281 = vst [vmem:[%s6542_s30 + $0x80] sm:$0xff] %v3073_v2  ;;  %v2109_v10 = vadd.f32 %v6530_v19, %v2108_v7  ;;  %3391 = vst [vmem:[%s6542_s30 + $0x3f0] sm:$0xff] %v3183_v4  ;;  %v2659_v11 = vadd.f32 %v6530_v19, %v2658_v9 }
 0x40b   : > { %v3076_v12 = vmax.f32 %v2114_v6, 0.0  ;;  %v3186_v13 = vmax.f32 %v2664_v8, 0.0 }
 0x40c   : > { %v3075_v14 = vmax.f32 %v2109_v10, 0.0  ;;  %v5140_v15 = vpop.f32.mrb[36].mxu0  ;;  %v3185_v16 = vmax.f32 %v2659_v11, 0.0  ;;  %v5305_v17 = vpop.f32.mrb[34].mxu1 }
 0x40d   : > { %3284 = vst [vmem:[%s6542_s30 + $0x98] sm:$0xff] %v3076_v12  ;;  %v2124_v18 = vadd.f32 %v5140_v15, %v6530_v19  ;;  %v2118_v20 = vpop.f32.mrb[37].mxu0  ;;  %3394 = vst [vmem:[%s6542_s30 + $0x408] sm:$0xff] %v3186_v13  ;;  %v2674_v21 = vadd.f32 %v5305_v17, %v6530_v19  ;;  %v2668_v22 = vpop.f32.mrb[35].mxu1 }
 0x40e   : > { %3283 = vst [vmem:[%s6542_s30 + $0x90] sm:$0xff] %v3075_v14  ;;  %v2119_v23 = vadd.f32 %v6530_v19, %v2118_v20  ;;  %3393 = vst [vmem:[%s6542_s30 + $0x400] sm:$0xff] %v3185_v16  ;;  %v2669_v24 = vadd.f32 %v6530_v19, %v2668_v22 }
 0x40f   : > { %v3078_v25 = vmax.f32 %v2124_v18, 0.0  ;;  %v3188_v26 = vmax.f32 %v2674_v21, 0.0 }
 0x410   : > { %v3077_v27 = vmax.f32 %v2119_v23, 0.0  ;;  %v5143_v28 = vpop.f32.mrb[38].mxu0  ;;  %v3187_v29 = vmax.f32 %v2669_v24, 0.0  ;;  %v5308_v30 = vpop.f32.mrb[36].mxu1 }
 0x411   : > { %3286 = vst [vmem:[%s6542_s30 + $0xa8] sm:$0xff] %v3078_v25  ;;  %v2134_v31 = vadd.f32 %v5143_v28, %v6530_v19  ;;  %v2128_v32 = vpop.f32.mrb[39].mxu0  ;;  %3396 = vst [vmem:[%s6542_s30 + $0x418] sm:$0xff] %v3188_v26  ;;  %v2684_v33 = vadd.f32 %v5308_v30, %v6530_v19  ;;  %v2678_v34 = vpop.f32.mrb[37].mxu1 }
 0x412   : > { %3285 = vst [vmem:[%s6542_s30 + $0xa0] sm:$0xff] %v3077_v27  ;;  %v2129_v35 = vadd.f32 %v6530_v19, %v2128_v32  ;;  %3395 = vst [vmem:[%s6542_s30 + $0x410] sm:$0xff] %v3187_v29  ;;  %v2679_v36 = vadd.f32 %v6530_v19, %v2678_v34 }
 0x413   : > { %v3080_v37 = vmax.f32 %v2134_v31, 0.0  ;;  %v3190_v38 = vmax.f32 %v2684_v33, 0.0 }
 0x414   : > { %v3079_v39 = vmax.f32 %v2129_v35, 0.0  ;;  %v5146_v40 = vpop.f32.mrb[40].mxu0  ;;  %v3189_v41 = vmax.f32 %v2679_v36, 0.0  ;;  %v5311_v42 = vpop.f32.mrb[38].mxu1 }
 0x415   : > { %3288 = vst [vmem:[%s6542_s30 + $0xb8] sm:$0xff] %v3080_v37  ;;  %v2144_v43 = vadd.f32 %v5146_v40, %v6530_v19  ;;  %v2138_v44 = vpop.f32.mrb[41].mxu0  ;;  %3398 = vst [vmem:[%s6542_s30 + $0x428] sm:$0xff] %v3190_v38  ;;  %v2694_v45 = vadd.f32 %v5311_v42, %v6530_v19  ;;  %v2688_v46 = vpop.f32.mrb[39].mxu1 }
 0x416   : > { %3287 = vst [vmem:[%s6542_s30 + $0xb0] sm:$0xff] %v3079_v39  ;;  %v2139_v47 = vadd.f32 %v6530_v19, %v2138_v44  ;;  %3397 = vst [vmem:[%s6542_s30 + $0x420] sm:$0xff] %v3189_v41  ;;  %v2689_v48 = vadd.f32 %v6530_v19, %v2688_v46 }
 0x417   : > { %v3082_v49 = vmax.f32 %v2144_v43, 0.0  ;;  %v3192_v50 = vmax.f32 %v2694_v45, 0.0 }
 0x418   : > { %v3081_v51 = vmax.f32 %v2139_v47, 0.0  ;;  %v5149_v52 = vpop.f32.mrb[42].mxu0  ;;  %v3191_v53 = vmax.f32 %v2689_v48, 0.0  ;;  %v5314_v54 = vpop.f32.mrb[40].mxu1 }
 0x419   : > { %3290 = vst [vmem:[%s6542_s30 + $0xc8] sm:$0xff] %v3082_v49  ;;  %v2154_v55 = vadd.f32 %v5149_v52, %v6530_v19  ;;  %v2148_v56 = vpop.f32.mrb[43].mxu0  ;;  %3400 = vst [vmem:[%s6542_s30 + $0x438] sm:$0xff] %v3192_v50  ;;  %v2704_v57 = vadd.f32 %v5314_v54, %v6530_v19  ;;  %v2698_v58 = vpop.f32.mrb[41].mxu1 }
 0x41a   : > { %3289 = vst [vmem:[%s6542_s30 + $0xc0] sm:$0xff] %v3081_v51  ;;  %v2149_v59 = vadd.f32 %v6530_v19, %v2148_v56  ;;  %3399 = vst [vmem:[%s6542_s30 + $0x430] sm:$0xff] %v3191_v53  ;;  %v2699_v60 = vadd.f32 %v6530_v19, %v2698_v58 }
 0x41b   : > { %v3084_v61 = vmax.f32 %v2154_v55, 0.0  ;;  %v3194_v62 = vmax.f32 %v2704_v57, 0.0 }
 0x41c   : > { %v3083_v63 = vmax.f32 %v2149_v59, 0.0  ;;  %v5152_v0 = vpop.f32.mrb[44].mxu0  ;;  %v3193_v1 = vmax.f32 %v2699_v60, 0.0  ;;  %v5317_v2 = vpop.f32.mrb[42].mxu1 }
 0x41d   : > { %3292 = vst [vmem:[%s6542_s30 + $0xd8] sm:$0xff] %v3084_v61  ;;  %v2164_v3 = vadd.f32 %v5152_v0, %v6530_v19  ;;  %v2158_v4 = vpop.f32.mrb[45].mxu0  ;;  %3402 = vst [vmem:[%s6542_s30 + $0x448] sm:$0xff] %v3194_v62  ;;  %v2714_v5 = vadd.f32 %v5317_v2, %v6530_v19  ;;  %v2708_v6 = vpop.f32.mrb[43].mxu1 }
 0x41e   : > { %3291 = vst [vmem:[%s6542_s30 + $0xd0] sm:$0xff] %v3083_v63  ;;  %v2159_v7 = vadd.f32 %v6530_v19, %v2158_v4  ;;  %3401 = vst [vmem:[%s6542_s30 + $0x440] sm:$0xff] %v3193_v1  ;;  %v2709_v8 = vadd.f32 %v6530_v19, %v2708_v6 }
 0x41f   : > { %v3086_v9 = vmax.f32 %v2164_v3, 0.0  ;;  %v3196_v10 = vmax.f32 %v2714_v5, 0.0 }
 0x420   : > { %v3085_v11 = vmax.f32 %v2159_v7, 0.0  ;;  %v5155_v12 = vpop.f32.mrb[46].mxu0  ;;  %v3195_v13 = vmax.f32 %v2709_v8, 0.0  ;;  %v5320_v14 = vpop.f32.mrb[44].mxu1 }
 0x421   : > { %3294 = vst [vmem:[%s6542_s30 + $0xe8] sm:$0xff] %v3086_v9  ;;  %v2174_v15 = vadd.f32 %v5155_v12, %v6530_v19  ;;  %v2168_v16 = vpop.f32.mrb[47].mxu0  ;;  %3404 = vst [vmem:[%s6542_s30 + $0x458] sm:$0xff] %v3196_v10  ;;  %v2724_v17 = vadd.f32 %v5320_v14, %v6530_v19  ;;  %v2718_v18 = vpop.f32.mrb[45].mxu1 }
 0x422   : > { %3293 = vst [vmem:[%s6542_s30 + $0xe0] sm:$0xff] %v3085_v11  ;;  %v2169_v20 = vadd.f32 %v6530_v19, %v2168_v16  ;;  %3403 = vst [vmem:[%s6542_s30 + $0x450] sm:$0xff] %v3195_v13  ;;  %v2719_v21 = vadd.f32 %v6530_v19, %v2718_v18 }
 0x423   : > { %v3088_v22 = vmax.f32 %v2174_v15, 0.0  ;;  %v3198_v23 = vmax.f32 %v2724_v17, 0.0 }
 0x424   : > { %v3087_v24 = vmax.f32 %v2169_v20, 0.0  ;;  %v5158_v25 = vpop.f32.mrb[48].mxu0  ;;  %v3197_v26 = vmax.f32 %v2719_v21, 0.0  ;;  %v5323_v27 = vpop.f32.mrb[46].mxu1 }
 0x425   : > { %3296 = vst [vmem:[%s6542_s30 + $0xf8] sm:$0xff] %v3088_v22  ;;  %v2184_v28 = vadd.f32 %v5158_v25, %v6530_v19  ;;  %v2178_v29 = vpop.f32.mrb[49].mxu0  ;;  %3406 = vst [vmem:[%s6542_s30 + $0x468] sm:$0xff] %v3198_v23  ;;  %v2734_v30 = vadd.f32 %v5323_v27, %v6530_v19  ;;  %v2728_v31 = vpop.f32.mrb[47].mxu1 }
 0x426   : > { %3295 = vst [vmem:[%s6542_s30 + $0xf0] sm:$0xff] %v3087_v24  ;;  %v2179_v32 = vadd.f32 %v6530_v19, %v2178_v29  ;;  %3405 = vst [vmem:[%s6542_s30 + $0x460] sm:$0xff] %v3197_v26  ;;  %v2729_v33 = vadd.f32 %v6530_v19, %v2728_v31 }
 0x427   : > { %v3090_v34 = vmax.f32 %v2184_v28, 0.0  ;;  %v3200_v35 = vmax.f32 %v2734_v30, 0.0 }
 0x428   : > { %v3089_v36 = vmax.f32 %v2179_v32, 0.0  ;;  %v5161_v37 = vpop.f32.mrb[50].mxu0  ;;  %v3199_v38 = vmax.f32 %v2729_v33, 0.0  ;;  %v5326_v39 = vpop.f32.mrb[48].mxu1 }
 0x429   : > { %3298 = vst [vmem:[%s6542_s30 + $0x108] sm:$0xff] %v3090_v34  ;;  %v2194_v40 = vadd.f32 %v5161_v37, %v6530_v19  ;;  %v2188_v41 = vpop.f32.mrb[51].mxu0  ;;  %3408 = vst [vmem:[%s6542_s30 + $0x478] sm:$0xff] %v3200_v35  ;;  %v2744_v42 = vadd.f32 %v5326_v39, %v6530_v19  ;;  %v2738_v43 = vpop.f32.mrb[49].mxu1 }
 0x42a   : > { %3297 = vst [vmem:[%s6542_s30 + $0x100] sm:$0xff] %v3089_v36  ;;  %v2189_v44 = vadd.f32 %v6530_v19, %v2188_v41  ;;  %3407 = vst [vmem:[%s6542_s30 + $0x470] sm:$0xff] %v3199_v38  ;;  %v2739_v45 = vadd.f32 %v6530_v19, %v2738_v43 }
 0x42b   : > { %v3092_v46 = vmax.f32 %v2194_v40, 0.0  ;;  %v3202_v47 = vmax.f32 %v2744_v42, 0.0 }
 0x42c   : > { %v3091_v48 = vmax.f32 %v2189_v44, 0.0  ;;  %v5164_v49 = vpop.f32.mrb[52].mxu0  ;;  %v3201_v50 = vmax.f32 %v2739_v45, 0.0  ;;  %v5329_v51 = vpop.f32.mrb[50].mxu1 }
 0x42d   : > { %3300 = vst [vmem:[%s6542_s30 + $0x118] sm:$0xff] %v3092_v46  ;;  %v2204_v52 = vadd.f32 %v5164_v49, %v6530_v19  ;;  %v2198_v53 = vpop.f32.mrb[53].mxu0  ;;  %3410 = vst [vmem:[%s6542_s30 + $0x488] sm:$0xff] %v3202_v47  ;;  %v2754_v54 = vadd.f32 %v5329_v51, %v6530_v19  ;;  %v2748_v55 = vpop.f32.mrb[51].mxu1 }
 0x42e   : > { %3299 = vst [vmem:[%s6542_s30 + $0x110] sm:$0xff] %v3091_v48  ;;  %v2199_v56 = vadd.f32 %v6530_v19, %v2198_v53  ;;  %3409 = vst [vmem:[%s6542_s30 + $0x480] sm:$0xff] %v3201_v50  ;;  %v2749_v57 = vadd.f32 %v6530_v19, %v2748_v55 }
 0x42f   : > { %v3094_v58 = vmax.f32 %v2204_v52, 0.0  ;;  %v3204_v59 = vmax.f32 %v2754_v54, 0.0 }
 0x430   : > { %v3093_v60 = vmax.f32 %v2199_v56, 0.0  ;;  %v5167_v61 = vpop.f32.mrb[54].mxu0  ;;  %v3203_v62 = vmax.f32 %v2749_v57, 0.0  ;;  %v5332_v63 = vpop.f32.mrb[52].mxu1 }
 0x431   : > { %3302 = vst [vmem:[%s6542_s30 + $0x128] sm:$0xff] %v3094_v58  ;;  %v2214_v0 = vadd.f32 %v5167_v61, %v6530_v19  ;;  %v2208_v1 = vpop.f32.mrb[55].mxu0  ;;  %3412 = vst [vmem:[%s6542_s30 + $0x498] sm:$0xff] %v3204_v59  ;;  %v2764_v2 = vadd.f32 %v5332_v63, %v6530_v19  ;;  %v2758_v3 = vpop.f32.mrb[53].mxu1 }
 0x432   : > { %3301 = vst [vmem:[%s6542_s30 + $0x120] sm:$0xff] %v3093_v60  ;;  %v2209_v4 = vadd.f32 %v6530_v19, %v2208_v1  ;;  %3411 = vst [vmem:[%s6542_s30 + $0x490] sm:$0xff] %v3203_v62  ;;  %v2759_v5 = vadd.f32 %v6530_v19, %v2758_v3 }
 0x433   : > { %v3096_v6 = vmax.f32 %v2214_v0, 0.0  ;;  %v3206_v7 = vmax.f32 %v2764_v2, 0.0 }
 0x434   : > { %v3095_v8 = vmax.f32 %v2209_v4, 0.0  ;;  %v5170_v9 = vpop.f32.mrb[56].mxu0  ;;  %v3205_v10 = vmax.f32 %v2759_v5, 0.0  ;;  %v5335_v11 = vpop.f32.mrb[54].mxu1 }
 0x435   : > { %3304 = vst [vmem:[%s6542_s30 + $0x138] sm:$0xff] %v3096_v6  ;;  %v2224_v12 = vadd.f32 %v5170_v9, %v6530_v19  ;;  %v2218_v13 = vpop.f32.mrb[57].mxu0  ;;  %3414 = vst [vmem:[%s6542_s30 + $0x4a8] sm:$0xff] %v3206_v7  ;;  %v2774_v14 = vadd.f32 %v5335_v11, %v6530_v19  ;;  %v2768_v15 = vpop.f32.mrb[55].mxu1 }
 0x436   : > { %3303 = vst [vmem:[%s6542_s30 + $0x130] sm:$0xff] %v3095_v8  ;;  %v2219_v16 = vadd.f32 %v6530_v19, %v2218_v13  ;;  %3413 = vst [vmem:[%s6542_s30 + $0x4a0] sm:$0xff] %v3205_v10  ;;  %v2769_v17 = vadd.f32 %v6530_v19, %v2768_v15 }
 0x437   : > { %v3098_v18 = vmax.f32 %v2224_v12, 0.0  ;;  %v3208_v20 = vmax.f32 %v2774_v14, 0.0 }
 0x438   : > { %v3097_v21 = vmax.f32 %v2219_v16, 0.0  ;;  %v5173_v22 = vpop.f32.mrb[58].mxu0  ;;  %v3207_v23 = vmax.f32 %v2769_v17, 0.0  ;;  %v5338_v24 = vpop.f32.mrb[56].mxu1 }
 0x439   : > { %3306 = vst [vmem:[%s6542_s30 + $0x148] sm:$0xff] %v3098_v18  ;;  %v2234_v25 = vadd.f32 %v5173_v22, %v6530_v19  ;;  %v2228_v26 = vpop.f32.mrb[59].mxu0  ;;  %3416 = vst [vmem:[%s6542_s30 + $0x4b8] sm:$0xff] %v3208_v20  ;;  %v2784_v27 = vadd.f32 %v5338_v24, %v6530_v19  ;;  %v2778_v28 = vpop.f32.mrb[57].mxu1 }
 0x43a   : > { %3305 = vst [vmem:[%s6542_s30 + $0x140] sm:$0xff] %v3097_v21  ;;  %v2229_v29 = vadd.f32 %v6530_v19, %v2228_v26  ;;  %3415 = vst [vmem:[%s6542_s30 + $0x4b0] sm:$0xff] %v3207_v23  ;;  %v2779_v30 = vadd.f32 %v6530_v19, %v2778_v28 }
 0x43b   : > { %v3100_v31 = vmax.f32 %v2234_v25, 0.0  ;;  %v3210_v32 = vmax.f32 %v2784_v27, 0.0 }
 0x43c   : > { %v3099_v33 = vmax.f32 %v2229_v29, 0.0  ;;  %v5176_v34 = vpop.f32.mrb[60].mxu0  ;;  %v3209_v35 = vmax.f32 %v2779_v30, 0.0  ;;  %v5341_v36 = vpop.f32.mrb[58].mxu1 }
 0x43d   : > { %3308 = vst [vmem:[%s6542_s30 + $0x158] sm:$0xff] %v3100_v31  ;;  %v2244_v37 = vadd.f32 %v5176_v34, %v6530_v19  ;;  %v2238_v38 = vpop.f32.mrb[61].mxu0  ;;  %3418 = vst [vmem:[%s6542_s30 + $0x4c8] sm:$0xff] %v3210_v32  ;;  %v2794_v39 = vadd.f32 %v5341_v36, %v6530_v19  ;;  %v2788_v40 = vpop.f32.mrb[59].mxu1 }
 0x43e   : > { %3307 = vst [vmem:[%s6542_s30 + $0x150] sm:$0xff] %v3099_v33  ;;  %v2239_v41 = vadd.f32 %v6530_v19, %v2238_v38  ;;  %3417 = vst [vmem:[%s6542_s30 + $0x4c0] sm:$0xff] %v3209_v35  ;;  %v2789_v42 = vadd.f32 %v6530_v19, %v2788_v40 }
 0x43f   : > { %v3102_v43 = vmax.f32 %v2244_v37, 0.0  ;;  %v3212_v44 = vmax.f32 %v2794_v39, 0.0 }
 0x440   : > { %v3101_v45 = vmax.f32 %v2239_v41, 0.0  ;;  %v5179_v46 = vpop.f32.mrb[62].mxu0  ;;  %v3211_v47 = vmax.f32 %v2789_v42, 0.0  ;;  %v5344_v48 = vpop.f32.mrb[60].mxu1 }
 0x441   : > { %3310 = vst [vmem:[%s6542_s30 + $0x168] sm:$0xff] %v3102_v43  ;;  %v2254_v49 = vadd.f32 %v5179_v46, %v6530_v19  ;;  %v2248_v50 = vpop.f32.mrb[63].mxu0  ;;  %3420 = vst [vmem:[%s6542_s30 + $0x4d8] sm:$0xff] %v3212_v44  ;;  %v2804_v51 = vadd.f32 %v5344_v48, %v6530_v19  ;;  %v2798_v52 = vpop.f32.mrb[61].mxu1 }
 0x442   : > { %3309 = vst [vmem:[%s6542_s30 + $0x160] sm:$0xff] %v3101_v45  ;;  %v2249_v53 = vadd.f32 %v6530_v19, %v2248_v50  ;;  %3419 = vst [vmem:[%s6542_s30 + $0x4d0] sm:$0xff] %v3211_v47  ;;  %v2799_v54 = vadd.f32 %v6530_v19, %v2798_v52 }
 0x443   : > { %v3104_v55 = vmax.f32 %v2254_v49, 0.0  ;;  %v3214_v56 = vmax.f32 %v2804_v51, 0.0 }
 0x444   : > { %v3103_v57 = vmax.f32 %v2249_v53, 0.0  ;;  %v5182_v58 = vpop.f32.mrb[64].mxu0  ;;  %v3213_v59 = vmax.f32 %v2799_v54, 0.0  ;;  %v5347_v60 = vpop.f32.mrb[62].mxu1 }
 0x445   : > { %3312 = vst [vmem:[%s6542_s30 + $0x178] sm:$0xff] %v3104_v55  ;;  %v2264_v61 = vadd.f32 %v5182_v58, %v6530_v19  ;;  %v2258_v62 = vpop.f32.mrb[65].mxu0  ;;  %3422 = vst [vmem:[%s6542_s30 + $0x4e8] sm:$0xff] %v3214_v56  ;;  %v2814_v63 = vadd.f32 %v5347_v60, %v6530_v19  ;;  %v2808_v0 = vpop.f32.mrb[63].mxu1 }
 0x446   : > { %3311 = vst [vmem:[%s6542_s30 + $0x170] sm:$0xff] %v3103_v57  ;;  %v2259_v1 = vadd.f32 %v6530_v19, %v2258_v62  ;;  %3421 = vst [vmem:[%s6542_s30 + $0x4e0] sm:$0xff] %v3213_v59  ;;  %v2809_v2 = vadd.f32 %v6530_v19, %v2808_v0 }
 0x447   : > { %v3106_v3 = vmax.f32 %v2264_v61, 0.0  ;;  %v3216_v4 = vmax.f32 %v2814_v63, 0.0 }
 0x448   : > { %v3105_v5 = vmax.f32 %v2259_v1, 0.0  ;;  %v5185_v6 = vpop.f32.mrb[66].mxu0  ;;  %v3215_v7 = vmax.f32 %v2809_v2, 0.0  ;;  %v5350_v8 = vpop.f32.mrb[64].mxu1 }
 0x449   : > { %3314 = vst [vmem:[%s6542_s30 + $0x188] sm:$0xff] %v3106_v3  ;;  %v2274_v9 = vadd.f32 %v5185_v6, %v6530_v19  ;;  %v2268_v10 = vpop.f32.mrb[67].mxu0  ;;  %3424 = vst [vmem:[%s6542_s30 + $0x4f8] sm:$0xff] %v3216_v4  ;;  %v2824_v11 = vadd.f32 %v5350_v8, %v6530_v19  ;;  %v2818_v12 = vpop.f32.mrb[65].mxu1 }
 0x44a   : > { %3313 = vst [vmem:[%s6542_s30 + $0x180] sm:$0xff] %v3105_v5  ;;  %v2269_v13 = vadd.f32 %v6530_v19, %v2268_v10  ;;  %3423 = vst [vmem:[%s6542_s30 + $0x4f0] sm:$0xff] %v3215_v7  ;;  %v2819_v14 = vadd.f32 %v6530_v19, %v2818_v12 }
 0x44b   : > { %v3108_v15 = vmax.f32 %v2274_v9, 0.0  ;;  %v3218_v16 = vmax.f32 %v2824_v11, 0.0 }
 0x44c   : > { %v3107_v17 = vmax.f32 %v2269_v13, 0.0  ;;  %v5188_v18 = vpop.f32.mrb[68].mxu0  ;;  %v3217_v20 = vmax.f32 %v2819_v14, 0.0  ;;  %v5353_v21 = vpop.f32.mrb[66].mxu1 }
 0x44d   : > { %3316 = vst [vmem:[%s6542_s30 + $0x198] sm:$0xff] %v3108_v15  ;;  %v2284_v22 = vadd.f32 %v5188_v18, %v6530_v19  ;;  %v2278_v23 = vpop.f32.mrb[69].mxu0  ;;  %3426 = vst [vmem:[%s6542_s30 + $0x508] sm:$0xff] %v3218_v16  ;;  %v2834_v24 = vadd.f32 %v5353_v21, %v6530_v19  ;;  %v2828_v25 = vpop.f32.mrb[67].mxu1 }
 0x44e   : > { %3315 = vst [vmem:[%s6542_s30 + $0x190] sm:$0xff] %v3107_v17  ;;  %v2279_v26 = vadd.f32 %v6530_v19, %v2278_v23  ;;  %3425 = vst [vmem:[%s6542_s30 + $0x500] sm:$0xff] %v3217_v20  ;;  %v2829_v27 = vadd.f32 %v6530_v19, %v2828_v25 }
 0x44f   : > { %v3110_v28 = vmax.f32 %v2284_v22, 0.0  ;;  %v3220_v29 = vmax.f32 %v2834_v24, 0.0  ;;  %v6795_v24 = vld [vmem:[%s7404_s8] ss:$0 sm:$0xff] }
 0x450   : > { %v3109_v30 = vmax.f32 %v2279_v26, 0.0  ;;  %v5191_v31 = vpop.f32.mrb[70].mxu0  ;;  %v3219_v32 = vmax.f32 %v2829_v27, 0.0  ;;  %v5356_v33 = vpop.f32.mrb[68].mxu1 }
 0x451   : > { %3318 = vst [vmem:[%s6542_s30 + $0x1a8] sm:$0xff] %v3110_v28  ;;  %v2294_v34 = vadd.f32 %v5191_v31, %v6530_v19  ;;  %v2288_v35 = vpop.f32.mrb[71].mxu0  ;;  %3428 = vst [vmem:[%s6542_s30 + $0x518] sm:$0xff] %v3220_v29  ;;  %v2844_v36 = vadd.f32 %v5356_v33, %v6530_v19  ;;  %v2838_v37 = vpop.f32.mrb[69].mxu1 }
 0x452   : > { %3317 = vst [vmem:[%s6542_s30 + $0x1a0] sm:$0xff] %v3109_v30  ;;  %v2289_v38 = vadd.f32 %v6530_v19, %v2288_v35  ;;  %3427 = vst [vmem:[%s6542_s30 + $0x510] sm:$0xff] %v3219_v32  ;;  %v2839_v39 = vadd.f32 %v6530_v19, %v2838_v37 }
 0x453   : > { %v3112_v40 = vmax.f32 %v2294_v34, 0.0  ;;  %v3222_v41 = vmax.f32 %v2844_v36, 0.0 }
 0x454   : > { %v3111_v42 = vmax.f32 %v2289_v38, 0.0  ;;  %v5194_v43 = vpop.f32.mrb[72].mxu0  ;;  %v3221_v44 = vmax.f32 %v2839_v39, 0.0  ;;  %v5359_v45 = vpop.f32.mrb[70].mxu1 }
 0x455   : > { %3320 = vst [vmem:[%s6542_s30 + $0x1b8] sm:$0xff] %v3112_v40  ;;  %v2304_v46 = vadd.f32 %v5194_v43, %v6530_v19  ;;  %v2298_v47 = vpop.f32.mrb[73].mxu0  ;;  %3430 = vst [vmem:[%s6542_s30 + $0x528] sm:$0xff] %v3222_v41  ;;  %v2854_v48 = vadd.f32 %v5359_v45, %v6530_v19  ;;  %v2848_v49 = vpop.f32.mrb[71].mxu1 }
 0x456   : > { %3319 = vst [vmem:[%s6542_s30 + $0x1b0] sm:$0xff] %v3111_v42  ;;  %v2299_v50 = vadd.f32 %v6530_v19, %v2298_v47  ;;  %3429 = vst [vmem:[%s6542_s30 + $0x520] sm:$0xff] %v3221_v44  ;;  %v2849_v51 = vadd.f32 %v6530_v19, %v2848_v49 }
 0x457   : > { %v3114_v52 = vmax.f32 %v2304_v46, 0.0  ;;  %v3224_v53 = vmax.f32 %v2854_v48, 0.0 }
 0x458   : > { %v3113_v54 = vmax.f32 %v2299_v50, 0.0  ;;  %v5197_v55 = vpop.f32.mrb[74].mxu0  ;;  %v3223_v56 = vmax.f32 %v2849_v51, 0.0  ;;  %v5362_v57 = vpop.f32.mrb[72].mxu1 }
 0x459   : > { %3322 = vst [vmem:[%s6542_s30 + $0x1c8] sm:$0xff] %v3114_v52  ;;  %v2314_v58 = vadd.f32 %v5197_v55, %v6530_v19  ;;  %v2308_v59 = vpop.f32.mrb[75].mxu0  ;;  %3432 = vst [vmem:[%s6542_s30 + $0x538] sm:$0xff] %v3224_v53  ;;  %v2864_v60 = vadd.f32 %v5362_v57, %v6530_v19  ;;  %v2858_v61 = vpop.f32.mrb[73].mxu1 }
 0x45a   : > { %3321 = vst [vmem:[%s6542_s30 + $0x1c0] sm:$0xff] %v3113_v54  ;;  %v2309_v62 = vadd.f32 %v6530_v19, %v2308_v59  ;;  %3431 = vst [vmem:[%s6542_s30 + $0x530] sm:$0xff] %v3223_v56  ;;  %v2859_v63 = vadd.f32 %v6530_v19, %v2858_v61 }
 0x45b   : > { %v3116_v0 = vmax.f32 %v2314_v58, 0.0  ;;  %v3226_v1 = vmax.f32 %v2864_v60, 0.0 }
 0x45c   : > { %v3115_v2 = vmax.f32 %v2309_v62, 0.0  ;;  %v5200_v3 = vpop.f32.mrb[76].mxu0  ;;  %v3225_v4 = vmax.f32 %v2859_v63, 0.0  ;;  %v5365_v5 = vpop.f32.mrb[74].mxu1 }
 0x45d   : > { %3324 = vst [vmem:[%s6542_s30 + $0x1d8] sm:$0xff] %v3116_v0  ;;  %v2324_v6 = vadd.f32 %v5200_v3, %v6530_v19  ;;  %v2318_v7 = vpop.f32.mrb[77].mxu0  ;;  %3434 = vst [vmem:[%s6542_s30 + $0x548] sm:$0xff] %v3226_v1  ;;  %v2874_v8 = vadd.f32 %v5365_v5, %v6530_v19  ;;  %v2868_v9 = vpop.f32.mrb[75].mxu1 }
 0x45e   : > { %3323 = vst [vmem:[%s6542_s30 + $0x1d0] sm:$0xff] %v3115_v2  ;;  %v2319_v10 = vadd.f32 %v6530_v19, %v2318_v7  ;;  %3433 = vst [vmem:[%s6542_s30 + $0x540] sm:$0xff] %v3225_v4  ;;  %v2869_v11 = vadd.f32 %v6530_v19, %v2868_v9 }
 0x45f   : > { %v3118_v12 = vmax.f32 %v2324_v6, 0.0  ;;  %v3228_v13 = vmax.f32 %v2874_v8, 0.0 }
 0x460   : > { %v3117_v14 = vmax.f32 %v2319_v10, 0.0  ;;  %v5203_v15 = vpop.f32.mrb[78].mxu0  ;;  %v3227_v16 = vmax.f32 %v2869_v11, 0.0  ;;  %v5368_v17 = vpop.f32.mrb[76].mxu1 }
 0x461   : > { %3326 = vst [vmem:[%s6542_s30 + $0x1e8] sm:$0xff] %v3118_v12  ;;  %v2334_v18 = vadd.f32 %v5203_v15, %v6530_v19  ;;  %v2328_v20 = vpop.f32.mrb[79].mxu0  ;;  %3436 = vst [vmem:[%s6542_s30 + $0x558] sm:$0xff] %v3228_v13  ;;  %v2884_v21 = vadd.f32 %v5368_v17, %v6530_v19  ;;  %v2878_v22 = vpop.f32.mrb[77].mxu1 }
 0x462   : > { %3325 = vst [vmem:[%s6542_s30 + $0x1e0] sm:$0xff] %v3117_v14  ;;  %v2329_v23 = vadd.f32 %v6530_v19, %v2328_v20  ;;  %3435 = vst [vmem:[%s6542_s30 + $0x550] sm:$0xff] %v3227_v16  ;;  %v2879_v25 = vadd.f32 %v6795_v24, %v2878_v22 }
 0x463   : > { %v3120_v26 = vmax.f32 %v2334_v18, 0.0  ;;  %v3230_v27 = vmax.f32 %v2884_v21, 0.0 }
 0x464   : > { %v3119_v28 = vmax.f32 %v2329_v23, 0.0  ;;  %v5206_v29 = vpop.f32.mrb[80].mxu0  ;;  %v3229_v30 = vmax.f32 %v2879_v25, 0.0  ;;  %v5371_v31 = vpop.f32.mrb[78].mxu1 }
 0x465   : > { %3328 = vst [vmem:[%s6542_s30 + $0x1f8] sm:$0xff] %v3120_v26  ;;  %v2344_v19 = vadd.f32 %v6795_v24, %v5206_v29  ;;  %v2338_v32 = vpop.f32.mrb[81].mxu0  ;;  %3438 = vst [vmem:[%s6542_s30 + $0x568] sm:$0xff] %v3230_v27  ;;  %v2894_v33 = vadd.f32 %v6795_v24, %v5371_v31  ;;  %v2888_v34 = vpop.f32.mrb[79].mxu1 }
 0x466   : > { %3327 = vst [vmem:[%s6542_s30 + $0x1f0] sm:$0xff] %v3119_v28  ;;  %v2339_v35 = vadd.f32 %v6795_v24, %v2338_v32  ;;  %3437 = vst [vmem:[%s6542_s30 + $0x560] sm:$0xff] %v3229_v30  ;;  %v2889_v36 = vadd.f32 %v6795_v24, %v2888_v34 }
 0x467   : > { %v3122_v37 = vmax.f32 %v2344_v19, 0.0  ;;  %v3232_v38 = vmax.f32 %v2894_v33, 0.0 }
 0x468   : > { %v3121_v39 = vmax.f32 %v2339_v35, 0.0  ;;  %v5209_v40 = vpop.f32.mrb[82].mxu0  ;;  %v3231_v41 = vmax.f32 %v2889_v36, 0.0  ;;  %v5374_v42 = vpop.f32.mrb[80].mxu1 }
 0x469   : > { %3330 = vst [vmem:[%s6542_s30 + $0x208] sm:$0xff] %v3122_v37  ;;  %v2354_v43 = vadd.f32 %v6795_v24, %v5209_v40  ;;  %v2348_v44 = vpop.f32.mrb[83].mxu0  ;;  %3440 = vst [vmem:[%s6542_s30 + $0x578] sm:$0xff] %v3232_v38  ;;  %v2904_v45 = vadd.f32 %v6795_v24, %v5374_v42  ;;  %v2898_v46 = vpop.f32.mrb[81].mxu1 }
 0x46a   : > { %3329 = vst [vmem:[%s6542_s30 + $0x200] sm:$0xff] %v3121_v39  ;;  %v2349_v47 = vadd.f32 %v6795_v24, %v2348_v44  ;;  %3439 = vst [vmem:[%s6542_s30 + $0x570] sm:$0xff] %v3231_v41  ;;  %v2899_v48 = vadd.f32 %v6795_v24, %v2898_v46 }
 0x46b   : > { %v3124_v49 = vmax.f32 %v2354_v43, 0.0  ;;  %v3234_v50 = vmax.f32 %v2904_v45, 0.0 }
 0x46c   : > { %v3123_v51 = vmax.f32 %v2349_v47, 0.0  ;;  %v5212_v52 = vpop.f32.mrb[84].mxu0  ;;  %v3233_v53 = vmax.f32 %v2899_v48, 0.0  ;;  %v5377_v54 = vpop.f32.mrb[82].mxu1 }
 0x46d   : > { %3332 = vst [vmem:[%s6542_s30 + $0x218] sm:$0xff] %v3124_v49  ;;  %v2364_v55 = vadd.f32 %v6795_v24, %v5212_v52  ;;  %v2358_v56 = vpop.f32.mrb[85].mxu0  ;;  %3442 = vst [vmem:[%s6542_s30 + $0x588] sm:$0xff] %v3234_v50  ;;  %v2914_v57 = vadd.f32 %v6795_v24, %v5377_v54  ;;  %v2908_v58 = vpop.f32.mrb[83].mxu1 }
 0x46e   : > { %3331 = vst [vmem:[%s6542_s30 + $0x210] sm:$0xff] %v3123_v51  ;;  %v2359_v59 = vadd.f32 %v6795_v24, %v2358_v56  ;;  %3441 = vst [vmem:[%s6542_s30 + $0x580] sm:$0xff] %v3233_v53  ;;  %v2909_v60 = vadd.f32 %v6795_v24, %v2908_v58 }
 0x46f   : > { %v3126_v61 = vmax.f32 %v2364_v55, 0.0  ;;  %v3236_v62 = vmax.f32 %v2914_v57, 0.0 }
 0x470   : > { %v3125_v63 = vmax.f32 %v2359_v59, 0.0  ;;  %v5215_v0 = vpop.f32.mrb[86].mxu0  ;;  %v3235_v1 = vmax.f32 %v2909_v60, 0.0  ;;  %v5380_v2 = vpop.f32.mrb[84].mxu1 }
 0x471   : > { %3334 = vst [vmem:[%s6542_s30 + $0x228] sm:$0xff] %v3126_v61  ;;  %v2374_v3 = vadd.f32 %v6795_v24, %v5215_v0  ;;  %v2368_v4 = vpop.f32.mrb[87].mxu0  ;;  %3444 = vst [vmem:[%s6542_s30 + $0x598] sm:$0xff] %v3236_v62  ;;  %v2924_v5 = vadd.f32 %v6795_v24, %v5380_v2  ;;  %v2918_v6 = vpop.f32.mrb[85].mxu1 }
 0x472   : > { %3333 = vst [vmem:[%s6542_s30 + $0x220] sm:$0xff] %v3125_v63  ;;  %v2369_v7 = vadd.f32 %v6795_v24, %v2368_v4  ;;  %3443 = vst [vmem:[%s6542_s30 + $0x590] sm:$0xff] %v3235_v1  ;;  %v2919_v8 = vadd.f32 %v6795_v24, %v2918_v6 }
 0x473   : > { %v3128_v9 = vmax.f32 %v2374_v3, 0.0  ;;  %v3238_v10 = vmax.f32 %v2924_v5, 0.0 }
 0x474   : > { %v3127_v11 = vmax.f32 %v2369_v7, 0.0  ;;  %v5218_v12 = vpop.f32.mrb[88].mxu0  ;;  %v3237_v13 = vmax.f32 %v2919_v8, 0.0  ;;  %v5383_v14 = vpop.f32.mrb[86].mxu1 }
 0x475   : > { %3336 = vst [vmem:[%s6542_s30 + $0x238] sm:$0xff] %v3128_v9  ;;  %v2384_v15 = vadd.f32 %v6795_v24, %v5218_v12  ;;  %v2378_v16 = vpop.f32.mrb[89].mxu0  ;;  %3446 = vst [vmem:[%s6542_s30 + $0x5a8] sm:$0xff] %v3238_v10  ;;  %v2934_v17 = vadd.f32 %v6795_v24, %v5383_v14  ;;  %v2928_v18 = vpop.f32.mrb[87].mxu1 }
 0x476   : > { %3335 = vst [vmem:[%s6542_s30 + $0x230] sm:$0xff] %v3127_v11  ;;  %v2379_v20 = vadd.f32 %v6795_v24, %v2378_v16  ;;  %3445 = vst [vmem:[%s6542_s30 + $0x5a0] sm:$0xff] %v3237_v13  ;;  %v2929_v21 = vadd.f32 %v6795_v24, %v2928_v18 }
 0x477   : > { %v3130_v22 = vmax.f32 %v2384_v15, 0.0  ;;  %v3240_v23 = vmax.f32 %v2934_v17, 0.0 }
 0x478   : > { %v3129_v25 = vmax.f32 %v2379_v20, 0.0  ;;  %v5221_v26 = vpop.f32.mrb[90].mxu0  ;;  %v3239_v27 = vmax.f32 %v2929_v21, 0.0  ;;  %v5386_v28 = vpop.f32.mrb[88].mxu1 }
 0x479   : > { %3338 = vst [vmem:[%s6542_s30 + $0x248] sm:$0xff] %v3130_v22  ;;  %v2394_v29 = vadd.f32 %v6795_v24, %v5221_v26  ;;  %v2388_v30 = vpop.f32.mrb[91].mxu0  ;;  %3448 = vst [vmem:[%s6542_s30 + $0x5b8] sm:$0xff] %v3240_v23  ;;  %v2944_v31 = vadd.f32 %v6795_v24, %v5386_v28  ;;  %v2938_v19 = vpop.f32.mrb[89].mxu1 }
 0x47a   : > { %3337 = vst [vmem:[%s6542_s30 + $0x240] sm:$0xff] %v3129_v25  ;;  %v2389_v32 = vadd.f32 %v6795_v24, %v2388_v30  ;;  %3447 = vst [vmem:[%s6542_s30 + $0x5b0] sm:$0xff] %v3239_v27  ;;  %v2939_v33 = vadd.f32 %v6795_v24, %v2938_v19 }
 0x47b   : > { %v3132_v34 = vmax.f32 %v2394_v29, 0.0  ;;  %v3242_v35 = vmax.f32 %v2944_v31, 0.0 }
 0x47c   : > { %v3131_v36 = vmax.f32 %v2389_v32, 0.0  ;;  %v5224_v37 = vpop.f32.mrb[92].mxu0  ;;  %v3241_v38 = vmax.f32 %v2939_v33, 0.0  ;;  %v5389_v39 = vpop.f32.mrb[90].mxu1 }
 0x47d   : > { %3340 = vst [vmem:[%s6542_s30 + $0x258] sm:$0xff] %v3132_v34  ;;  %v2404_v40 = vadd.f32 %v6795_v24, %v5224_v37  ;;  %v2398_v41 = vpop.f32.mrb[93].mxu0  ;;  %3450 = vst [vmem:[%s6542_s30 + $0x5c8] sm:$0xff] %v3242_v35  ;;  %v2954_v42 = vadd.f32 %v6795_v24, %v5389_v39  ;;  %v2948_v43 = vpop.f32.mrb[91].mxu1 }
 0x47e   : > { %3339 = vst [vmem:[%s6542_s30 + $0x250] sm:$0xff] %v3131_v36  ;;  %v2399_v44 = vadd.f32 %v6795_v24, %v2398_v41  ;;  %3449 = vst [vmem:[%s6542_s30 + $0x5c0] sm:$0xff] %v3241_v38  ;;  %v2949_v45 = vadd.f32 %v6795_v24, %v2948_v43 }
 0x47f   : > { %v3134_v46 = vmax.f32 %v2404_v40, 0.0  ;;  %v3244_v47 = vmax.f32 %v2954_v42, 0.0 }
 0x480   : > { %v3133_v48 = vmax.f32 %v2399_v44, 0.0  ;;  %v5227_v49 = vpop.f32.mrb[94].mxu0  ;;  %v3243_v50 = vmax.f32 %v2949_v45, 0.0  ;;  %v5392_v51 = vpop.f32.mrb[92].mxu1 }
 0x481   : > { %3342 = vst [vmem:[%s6542_s30 + $0x268] sm:$0xff] %v3134_v46  ;;  %v2414_v52 = vadd.f32 %v6795_v24, %v5227_v49  ;;  %v2408_v53 = vpop.f32.mrb[95].mxu0  ;;  %3452 = vst [vmem:[%s6542_s30 + $0x5d8] sm:$0xff] %v3244_v47  ;;  %v2964_v54 = vadd.f32 %v6795_v24, %v5392_v51  ;;  %v2958_v55 = vpop.f32.mrb[93].mxu1 }
 0x482   : > { %3341 = vst [vmem:[%s6542_s30 + $0x260] sm:$0xff] %v3133_v48  ;;  %v2409_v56 = vadd.f32 %v6795_v24, %v2408_v53  ;;  %3451 = vst [vmem:[%s6542_s30 + $0x5d0] sm:$0xff] %v3243_v50  ;;  %v2959_v57 = vadd.f32 %v6795_v24, %v2958_v55 }
 0x483   : > { %v3136_v58 = vmax.f32 %v2414_v52, 0.0  ;;  %v3246_v59 = vmax.f32 %v2964_v54, 0.0 }
 0x484   : > { %v3135_v60 = vmax.f32 %v2409_v56, 0.0  ;;  %v5230_v61 = vpop.f32.mrb[96].mxu0  ;;  %v3245_v62 = vmax.f32 %v2959_v57, 0.0  ;;  %v5395_v63 = vpop.f32.mrb[94].mxu1 }
 0x485   : > { %3344 = vst [vmem:[%s6542_s30 + $0x278] sm:$0xff] %v3136_v58  ;;  %v2424_v0 = vadd.f32 %v6795_v24, %v5230_v61  ;;  %v2418_v1 = vpop.f32.mrb[97].mxu0  ;;  %3454 = vst [vmem:[%s6542_s30 + $0x5e8] sm:$0xff] %v3246_v59  ;;  %v2974_v2 = vadd.f32 %v6795_v24, %v5395_v63  ;;  %v2968_v3 = vpop.f32.mrb[95].mxu1 }
 0x486   : > { %3343 = vst [vmem:[%s6542_s30 + $0x270] sm:$0xff] %v3135_v60  ;;  %v2419_v4 = vadd.f32 %v6795_v24, %v2418_v1  ;;  %3453 = vst [vmem:[%s6542_s30 + $0x5e0] sm:$0xff] %v3245_v62  ;;  %v2969_v5 = vadd.f32 %v6795_v24, %v2968_v3 }
 0x487   : > { %v3138_v6 = vmax.f32 %v2424_v0, 0.0  ;;  %v3248_v7 = vmax.f32 %v2974_v2, 0.0 }
 0x488   : > { %v3137_v8 = vmax.f32 %v2419_v4, 0.0  ;;  %v5233_v9 = vpop.f32.mrb[98].mxu0  ;;  %v3247_v10 = vmax.f32 %v2969_v5, 0.0  ;;  %v5398_v11 = vpop.f32.mrb[96].mxu1 }
 0x489   : > { %3346 = vst [vmem:[%s6542_s30 + $0x288] sm:$0xff] %v3138_v6  ;;  %v2434_v12 = vadd.f32 %v6795_v24, %v5233_v9  ;;  %v2428_v13 = vpop.f32.mrb[99].mxu0  ;;  %3456 = vst [vmem:[%s6542_s30 + $0x5f8] sm:$0xff] %v3248_v7  ;;  %v2984_v14 = vadd.f32 %v6795_v24, %v5398_v11  ;;  %v2978_v15 = vpop.f32.mrb[97].mxu1 }
 0x48a   : > { %3345 = vst [vmem:[%s6542_s30 + $0x280] sm:$0xff] %v3137_v8  ;;  %v2429_v16 = vadd.f32 %v6795_v24, %v2428_v13  ;;  %3455 = vst [vmem:[%s6542_s30 + $0x5f0] sm:$0xff] %v3247_v10  ;;  %v2979_v17 = vadd.f32 %v6795_v24, %v2978_v15 }
 0x48b   : > { %v3140_v18 = vmax.f32 %v2434_v12, 0.0  ;;  %v3250_v20 = vmax.f32 %v2984_v14, 0.0 }
 0x48c   : > { %v3139_v21 = vmax.f32 %v2429_v16, 0.0  ;;  %v5236_v22 = vpop.f32.mrb[100].mxu0  ;;  %v3249_v23 = vmax.f32 %v2979_v17, 0.0  ;;  %v5401_v25 = vpop.f32.mrb[98].mxu1 }
 0x48d   : > { %3348 = vst [vmem:[%s6542_s30 + $0x298] sm:$0xff] %v3140_v18  ;;  %v2444_v26 = vadd.f32 %v6795_v24, %v5236_v22  ;;  %v2438_v27 = vpop.f32.mrb[101].mxu0  ;;  %3458 = vst [vmem:[%s6542_s30 + $0x608] sm:$0xff] %v3250_v20  ;;  %v2994_v28 = vadd.f32 %v6795_v24, %v5401_v25  ;;  %v2988_v29 = vpop.f32.mrb[99].mxu1 }
 0x48e   : > { %3347 = vst [vmem:[%s6542_s30 + $0x290] sm:$0xff] %v3139_v21  ;;  %v2439_v30 = vadd.f32 %v6795_v24, %v2438_v27  ;;  %3457 = vst [vmem:[%s6542_s30 + $0x600] sm:$0xff] %v3249_v23  ;;  %v2989_v31 = vadd.f32 %v6795_v24, %v2988_v29 }
 0x48f   : > { %v3142_v19 = vmax.f32 %v2444_v26, 0.0  ;;  %v3252_v32 = vmax.f32 %v2994_v28, 0.0 }
 0x490   : > { %v3141_v33 = vmax.f32 %v2439_v30, 0.0  ;;  %v5239_v34 = vpop.f32.mrb[102].mxu0  ;;  %v3251_v35 = vmax.f32 %v2989_v31, 0.0  ;;  %v5404_v36 = vpop.f32.mrb[100].mxu1 }
 0x491   : > { %3350 = vst [vmem:[%s6542_s30 + $0x2a8] sm:$0xff] %v3142_v19  ;;  %v2454_v37 = vadd.f32 %v6795_v24, %v5239_v34  ;;  %v2448_v38 = vpop.f32.mrb[103].mxu0  ;;  %3460 = vst [vmem:[%s6542_s30 + $0x618] sm:$0xff] %v3252_v32  ;;  %v3004_v39 = vadd.f32 %v6795_v24, %v5404_v36  ;;  %v2998_v40 = vpop.f32.mrb[101].mxu1 }
 0x492   : > { %3349 = vst [vmem:[%s6542_s30 + $0x2a0] sm:$0xff] %v3141_v33  ;;  %v2449_v41 = vadd.f32 %v6795_v24, %v2448_v38  ;;  %3459 = vst [vmem:[%s6542_s30 + $0x610] sm:$0xff] %v3251_v35  ;;  %v2999_v42 = vadd.f32 %v6795_v24, %v2998_v40 }
 0x493   : > { %v3144_v43 = vmax.f32 %v2454_v37, 0.0  ;;  %v3254_v44 = vmax.f32 %v3004_v39, 0.0 }
 0x494   : > { %v3143_v45 = vmax.f32 %v2449_v41, 0.0  ;;  %v5242_v46 = vpop.f32.mrb[104].mxu0  ;;  %v3253_v47 = vmax.f32 %v2999_v42, 0.0  ;;  %v5407_v48 = vpop.f32.mrb[102].mxu1 }
 0x495   : > { %3352 = vst [vmem:[%s6542_s30 + $0x2b8] sm:$0xff] %v3144_v43  ;;  %v2464_v49 = vadd.f32 %v6795_v24, %v5242_v46  ;;  %v2458_v50 = vpop.f32.mrb[105].mxu0  ;;  %3462 = vst [vmem:[%s6542_s30 + $0x628] sm:$0xff] %v3254_v44  ;;  %v3014_v51 = vadd.f32 %v6795_v24, %v5407_v48  ;;  %v3008_v52 = vpop.f32.mrb[103].mxu1 }
 0x496   : > { %3351 = vst [vmem:[%s6542_s30 + $0x2b0] sm:$0xff] %v3143_v45  ;;  %v2459_v53 = vadd.f32 %v6795_v24, %v2458_v50  ;;  %3461 = vst [vmem:[%s6542_s30 + $0x620] sm:$0xff] %v3253_v47  ;;  %v3009_v54 = vadd.f32 %v6795_v24, %v3008_v52 }
 0x497   : > { %v3146_v55 = vmax.f32 %v2464_v49, 0.0  ;;  %v3256_v56 = vmax.f32 %v3014_v51, 0.0 }
 0x498   : > { %v3145_v57 = vmax.f32 %v2459_v53, 0.0  ;;  %v5245_v58 = vpop.f32.mrb[106].mxu0  ;;  %v3255_v59 = vmax.f32 %v3009_v54, 0.0  ;;  %v5410_v60 = vpop.f32.mrb[104].mxu1 }
 0x499   : > { %3354 = vst [vmem:[%s6542_s30 + $0x2c8] sm:$0xff] %v3146_v55  ;;  %v2474_v61 = vadd.f32 %v6795_v24, %v5245_v58  ;;  %v2468_v62 = vpop.f32.mrb[107].mxu0  ;;  %3464 = vst [vmem:[%s6542_s30 + $0x638] sm:$0xff] %v3256_v56  ;;  %v3024_v63 = vadd.f32 %v6795_v24, %v5410_v60  ;;  %v3018_v0 = vpop.f32.mrb[105].mxu1 }
 0x49a   : > { %3353 = vst [vmem:[%s6542_s30 + $0x2c0] sm:$0xff] %v3145_v57  ;;  %v2469_v1 = vadd.f32 %v6795_v24, %v2468_v62  ;;  %3463 = vst [vmem:[%s6542_s30 + $0x630] sm:$0xff] %v3255_v59  ;;  %v3019_v2 = vadd.f32 %v6795_v24, %v3018_v0 }
 0x49b   : > { %v3148_v3 = vmax.f32 %v2474_v61, 0.0  ;;  %v3258_v4 = vmax.f32 %v3024_v63, 0.0 }
 0x49c   : > { %v3147_v5 = vmax.f32 %v2469_v1, 0.0  ;;  %v5248_v6 = vpop.f32.mrb[108].mxu0  ;;  %v3257_v7 = vmax.f32 %v3019_v2, 0.0  ;;  %v5413_v8 = vpop.f32.mrb[106].mxu1 }
 0x49d   : > { %3356 = vst [vmem:[%s6542_s30 + $0x2d8] sm:$0xff] %v3148_v3  ;;  %v2484_v9 = vadd.f32 %v6795_v24, %v5248_v6  ;;  %v2478_v10 = vpop.f32.mrb[109].mxu0  ;;  %3466 = vst [vmem:[%s6542_s30 + $0x648] sm:$0xff] %v3258_v4  ;;  %v3034_v11 = vadd.f32 %v6795_v24, %v5413_v8  ;;  %v3028_v12 = vpop.f32.mrb[107].mxu1 }
 0x49e   : > { %3355 = vst [vmem:[%s6542_s30 + $0x2d0] sm:$0xff] %v3147_v5  ;;  %v2479_v13 = vadd.f32 %v6795_v24, %v2478_v10  ;;  %3465 = vst [vmem:[%s6542_s30 + $0x640] sm:$0xff] %v3257_v7  ;;  %v3029_v14 = vadd.f32 %v6795_v24, %v3028_v12 }
 0x49f   : > { %v3150_v15 = vmax.f32 %v2484_v9, 0.0  ;;  %v3260_v16 = vmax.f32 %v3034_v11, 0.0 }
 0x4a0   : > { %v3149_v17 = vmax.f32 %v2479_v13, 0.0  ;;  %v5251_v18 = vpop.f32.mrb[110].mxu0  ;;  %v3259_v20 = vmax.f32 %v3029_v14, 0.0  ;;  %v5416_v21 = vpop.f32.mrb[108].mxu1 }
 0x4a1   : > { %3358 = vst [vmem:[%s6542_s30 + $0x2e8] sm:$0xff] %v3150_v15  ;;  %v2494_v22 = vadd.f32 %v6795_v24, %v5251_v18  ;;  %v2488_v23 = vpop.f32.mrb[111].mxu0  ;;  %3468 = vst [vmem:[%s6542_s30 + $0x658] sm:$0xff] %v3260_v16  ;;  %v3044_v25 = vadd.f32 %v6795_v24, %v5416_v21  ;;  %v3038_v26 = vpop.f32.mrb[109].mxu1  ;;  %v3923_v16 = vld [vmem:[%s6542_s30] sm:$0xff] (%p5703_p4)  ;;  %v3929_v18 = vld [vmem:[%s6542_s30 + $0x18] sm:$0xff] (%p5703_p4) }
 0x4a2   : > { %3357 = vst [vmem:[%s6542_s30 + $0x2e0] sm:$0xff] %v3149_v17  ;;  %v2489_v27 = vadd.f32 %v6795_v24, %v2488_v23  ;;  %3467 = vst [vmem:[%s6542_s30 + $0x650] sm:$0xff] %v3259_v20  ;;  %v3039_v28 = vadd.f32 %v6795_v24, %v3038_v26  ;;  %v3927_v17 = vld [vmem:[%s6542_s30 + $0x10] sm:$0xff] (%p5703_p4)  ;;  %v3931_v20 = vld [vmem:[%s6542_s30 + $0x20] sm:$0xff] (%p5703_p4) }
 0x4a3   : > { %v3152_v29 = vmax.f32 %v2494_v22, 0.0  ;;  %v3262_v30 = vmax.f32 %v3044_v25, 0.0  ;;  %v3933_v21 = vld [vmem:[%s6542_s30 + $0x28] sm:$0xff] (%p5703_p4)  ;;  %3924 = vst [vmem:[%s6971_s27] sm:$0xff] (%p5703_p4), %v3923_v16  ;;  %3928 = vst [vmem:[%s6971_s27 + $0x20] sm:$0xff] (%p5703_p4), %v3927_v17  ;;  %v3935_v22 = vld [vmem:[%s6542_s30 + $0x30] sm:$0xff] (%p5703_p4) }
 0x4a4   : > { %v3151_v31 = vmax.f32 %v2489_v27, 0.0  ;;  %v5254_v19 = vpop.f32.mrb[112].mxu0  ;;  %v3261_v32 = vmax.f32 %v3039_v28, 0.0  ;;  %v5419_v33 = vpop.f32.mrb[110].mxu1  ;;  %3930 = vst [vmem:[%s6971_s27 + $0x30] sm:$0xff] (%p5703_p4), %v3929_v18  ;;  %3932 = vst [vmem:[%s6971_s27 + $0x40] sm:$0xff] (%p5703_p4), %v3931_v20 }
 0x4a5   : > { %3360 = vst [vmem:[%s6542_s30 + $0x2f8] sm:$0xff] %v3152_v29  ;;  %v2504_v34 = vadd.f32 %v6795_v24, %v5254_v19  ;;  %v2498_v35 = vpop.f32.mrb[113].mxu0  ;;  %3470 = vst [vmem:[%s6542_s30 + $0x668] sm:$0xff] %v3262_v30  ;;  %v3054_v36 = vadd.f32 %v6795_v24, %v5419_v33  ;;  %v3048_v37 = vpop.f32.mrb[111].mxu1  ;;  %v3937_v23 = vld [vmem:[%s6542_s30 + $0x38] sm:$0xff] (%p5703_p4)  ;;  %v3939_v25 = vld [vmem:[%s6542_s30 + $0x40] sm:$0xff] (%p5703_p4) }
 0x4a6   : > { %3359 = vst [vmem:[%s6542_s30 + $0x2f0] sm:$0xff] %v3151_v31  ;;  %v2499_v38 = vadd.f32 %v6795_v24, %v2498_v35  ;;  %3469 = vst [vmem:[%s6542_s30 + $0x660] sm:$0xff] %v3261_v32  ;;  %v3049_v39 = vadd.f32 %v6795_v24, %v3048_v37  ;;  %v3941_v26 = vld [vmem:[%s6542_s30 + $0x48] sm:$0xff] (%p5703_p4)  ;;  %v3943_v27 = vld [vmem:[%s6542_s30 + $0x50] sm:$0xff] (%p5703_p4) }
 0x4a7   : > { %v3154_v40 = vmax.f32 %v2504_v34, 0.0  ;;  %v3264_v41 = vmax.f32 %v3054_v36, 0.0  ;;  %3934 = vst [vmem:[%s6971_s27 + $0x50] sm:$0xff] (%p5703_p4), %v3933_v21  ;;  %3936 = vst [vmem:[%s6971_s27 + $0x60] sm:$0xff] (%p5703_p4), %v3935_v22  ;;  %v3945_v28 = vld [vmem:[%s6542_s30 + $0x58] sm:$0xff] (%p5703_p4)  ;;  %v3947_v29 = vld [vmem:[%s6542_s30 + $0x60] sm:$0xff] (%p5703_p4) }
 0x4a8   : > { %v3153_v42 = vmax.f32 %v2499_v38, 0.0  ;;  %v5257_v43 = vpop.f32.mrb[114].mxu0  ;;  %v3263_v44 = vmax.f32 %v3049_v39, 0.0  ;;  %3938 = vst [vmem:[%s6971_s27 + $0x70] sm:$0xff] (%p5703_p4), %v3937_v23  ;;  %3940 = vst [vmem:[%s6971_s27 + $0x80] sm:$0xff] (%p5703_p4), %v3939_v25  ;;  %v3949_v30 = vld [vmem:[%s6542_s30 + $0x68] sm:$0xff] (%p5703_p4) }
 0x4a9   : > { %3362 = vst [vmem:[%s6542_s30 + $0x308] sm:$0xff] %v3154_v40  ;;  %v2514_v45 = vadd.f32 %v6795_v24, %v5257_v43  ;;  %v2508_v46 = vpop.f32.mrb[115].mxu0  ;;  %3472 = vst [vmem:[%s6542_s30 + $0x678] sm:$0xff] %v3264_v41  ;;  %v3951_v31 = vld [vmem:[%s6542_s30 + $0x70] sm:$0xff] (%p5703_p4)  ;;  %v3953_v19 = vld [vmem:[%s6542_s30 + $0x78] sm:$0xff] (%p5703_p4) }
 0x4aa   : > { %3361 = vst [vmem:[%s6542_s30 + $0x300] sm:$0xff] %v3153_v42  ;;  %v2509_v47 = vadd.f32 %v6795_v24, %v2508_v46  ;;  %3471 = vst [vmem:[%s6542_s30 + $0x670] sm:$0xff] %v3263_v44  ;;  %v3955_v32 = vld [vmem:[%s6542_s30 + $0x80] sm:$0xff] (%p5703_p4)  ;;  %v3957_v33 = vld [vmem:[%s6542_s30 + $0x88] sm:$0xff] (%p5703_p4) }
 0x4ab   : > { %v3156_v48 = vmax.f32 %v2514_v45, 0.0  ;;  %3942 = vst [vmem:[%s6971_s27 + $0x90] sm:$0xff] (%p5703_p4), %v3941_v26  ;;  %3944 = vst [vmem:[%s6971_s27 + $0xa0] sm:$0xff] (%p5703_p4), %v3943_v27  ;;  %v3959_v34 = vld [vmem:[%s6542_s30 + $0x90] sm:$0xff] (%p5703_p4)  ;;  %v3961_v35 = vld [vmem:[%s6542_s30 + $0x98] sm:$0xff] (%p5703_p4) }
 0x4ac   : > { %v3155_v49 = vmax.f32 %v2509_v47, 0.0  ;;  %v5260_v50 = vpop.f32.mrb[116].mxu0  ;;  %3946 = vst [vmem:[%s6971_s27 + $0xb0] sm:$0xff] (%p5703_p4), %v3945_v28  ;;  %3948 = vst [vmem:[%s6971_s27 + $0xc0] sm:$0xff] (%p5703_p4), %v3947_v29  ;;  %v3963_v36 = vld [vmem:[%s6542_s30 + $0xa0] sm:$0xff] (%p5703_p4)  ;;  %v3965_v37 = vld [vmem:[%s6542_s30 + $0xa8] sm:$0xff] (%p5703_p4) }
 0x4ad   : > { %3364 = vst [vmem:[%s6542_s30 + $0x318] sm:$0xff] %v3156_v48  ;;  %v2524_v51 = vadd.f32 %v6795_v24, %v5260_v50  ;;  %v2518_v52 = vpop.f32.mrb[117].mxu0  ;;  %3950 = vst [vmem:[%s6971_s27 + $0xd0] sm:$0xff] (%p5703_p4), %v3949_v30  ;;  %v3967_v38 = vld [vmem:[%s6542_s30 + $0xb0] sm:$0xff] (%p5703_p4)  ;;  %v3969_v39 = vld [vmem:[%s6542_s30 + $0xb8] sm:$0xff] (%p5703_p4) }
 0x4ae   : > { %3363 = vst [vmem:[%s6542_s30 + $0x310] sm:$0xff] %v3155_v49  ;;  %v2519_v53 = vadd.f32 %v6795_v24, %v2518_v52  ;;  %3952 = vst [vmem:[%s6971_s27 + $0xe0] sm:$0xff] (%p5703_p4), %v3951_v31  ;;  %v3971_v40 = vld [vmem:[%s6542_s30 + $0xc0] sm:$0xff] (%p5703_p4)  ;;  %v3973_v41 = vld [vmem:[%s6542_s30 + $0xc8] sm:$0xff] (%p5703_p4) }
 0x4af   : > { %v3158_v54 = vmax.f32 %v2524_v51, 0.0  ;;  %3954 = vst [vmem:[%s6971_s27 + $0xf0] sm:$0xff] (%p5703_p4), %v3953_v19  ;;  %3956 = vst [vmem:[%s6971_s27 + $0x100] sm:$0xff] (%p5703_p4), %v3955_v32  ;;  %v3975_v42 = vld [vmem:[%s6542_s30 + $0xd0] sm:$0xff] (%p5703_p4)  ;;  %v3977_v43 = vld [vmem:[%s6542_s30 + $0xd8] sm:$0xff] (%p5703_p4) }
 0x4b0   : > { %v3157_v55 = vmax.f32 %v2519_v53, 0.0  ;;  %v5263_v56 = vpop.f32.mrb[118].mxu0  ;;  %3958 = vst [vmem:[%s6971_s27 + $0x110] sm:$0xff] (%p5703_p4), %v3957_v33  ;;  %3960 = vst [vmem:[%s6971_s27 + $0x120] sm:$0xff] (%p5703_p4), %v3959_v34  ;;  %v3979_v44 = vld [vmem:[%s6542_s30 + $0xe0] sm:$0xff] (%p5703_p4)  ;;  %v3981_v45 = vld [vmem:[%s6542_s30 + $0xe8] sm:$0xff] (%p5703_p4) }
 0x4b1   : > { %3366 = vst [vmem:[%s6542_s30 + $0x328] sm:$0xff] %v3158_v54  ;;  %v2534_v57 = vadd.f32 %v6795_v24, %v5263_v56  ;;  %v2528_v58 = vpop.f32.mrb[119].mxu0  ;;  %3962 = vst [vmem:[%s6971_s27 + $0x130] sm:$0xff] (%p5703_p4), %v3961_v35  ;;  %v3983_v46 = vld [vmem:[%s6542_s30 + $0xf0] sm:$0xff] (%p5703_p4)  ;;  %v3985_v47 = vld [vmem:[%s6542_s30 + $0xf8] sm:$0xff] (%p5703_p4) }
 0x4b2   : > { %3365 = vst [vmem:[%s6542_s30 + $0x320] sm:$0xff] %v3157_v55  ;;  %v2529_v59 = vadd.f32 %v6795_v24, %v2528_v58  ;;  %3964 = vst [vmem:[%s6971_s27 + $0x140] sm:$0xff] (%p5703_p4), %v3963_v36  ;;  %v3987_v48 = vld [vmem:[%s6542_s30 + $0x100] sm:$0xff] (%p5703_p4)  ;;  %v3989_v49 = vld [vmem:[%s6542_s30 + $0x108] sm:$0xff] (%p5703_p4) }
 0x4b3   : > { %v3160_v60 = vmax.f32 %v2534_v57, 0.0  ;;  %3966 = vst [vmem:[%s6971_s27 + $0x150] sm:$0xff] (%p5703_p4), %v3965_v37  ;;  %3968 = vst [vmem:[%s6971_s27 + $0x160] sm:$0xff] (%p5703_p4), %v3967_v38  ;;  %v3991_v50 = vld [vmem:[%s6542_s30 + $0x110] sm:$0xff] (%p5703_p4)  ;;  %v3993_v51 = vld [vmem:[%s6542_s30 + $0x118] sm:$0xff] (%p5703_p4) }
 0x4b4   : > { %v3159_v61 = vmax.f32 %v2529_v59, 0.0  ;;  %v5266_v62 = vpop.f32.mrb[120].mxu0  ;;  %3970 = vst [vmem:[%s6971_s27 + $0x170] sm:$0xff] (%p5703_p4), %v3969_v39  ;;  %3972 = vst [vmem:[%s6971_s27 + $0x180] sm:$0xff] (%p5703_p4), %v3971_v40  ;;  %v3995_v52 = vld [vmem:[%s6542_s30 + $0x120] sm:$0xff] (%p5703_p4)  ;;  %v3997_v53 = vld [vmem:[%s6542_s30 + $0x128] sm:$0xff] (%p5703_p4) }
 0x4b5   : > { %3368 = vst [vmem:[%s6542_s30 + $0x338] sm:$0xff] %v3160_v60  ;;  %v2544_v63 = vadd.f32 %v6795_v24, %v5266_v62  ;;  %v2538_v0 = vpop.f32.mrb[121].mxu0  ;;  %3974 = vst [vmem:[%s6971_s27 + $0x190] sm:$0xff] (%p5703_p4), %v3973_v41  ;;  %v3999_v54 = vld [vmem:[%s6542_s30 + $0x130] sm:$0xff] (%p5703_p4)  ;;  %v4001_v55 = vld [vmem:[%s6542_s30 + $0x138] sm:$0xff] (%p5703_p4) }
 0x4b6   : > { %3367 = vst [vmem:[%s6542_s30 + $0x330] sm:$0xff] %v3159_v61  ;;  %v2539_v1 = vadd.f32 %v6795_v24, %v2538_v0  ;;  %3976 = vst [vmem:[%s6971_s27 + $0x1a0] sm:$0xff] (%p5703_p4), %v3975_v42  ;;  %v4003_v56 = vld [vmem:[%s6542_s30 + $0x140] sm:$0xff] (%p5703_p4)  ;;  %v4005_v57 = vld [vmem:[%s6542_s30 + $0x148] sm:$0xff] (%p5703_p4) }
 0x4b7   : > { %v3162_v2 = vmax.f32 %v2544_v63, 0.0  ;;  %3978 = vst [vmem:[%s6971_s27 + $0x1b0] sm:$0xff] (%p5703_p4), %v3977_v43  ;;  %3980 = vst [vmem:[%s6971_s27 + $0x1c0] sm:$0xff] (%p5703_p4), %v3979_v44  ;;  %v4007_v58 = vld [vmem:[%s6542_s30 + $0x150] sm:$0xff] (%p5703_p4)  ;;  %v4009_v59 = vld [vmem:[%s6542_s30 + $0x158] sm:$0xff] (%p5703_p4) }
 0x4b8   : > { %v3161_v3 = vmax.f32 %v2539_v1, 0.0  ;;  %v5269_v4 = vpop.f32.mrb[122].mxu0  ;;  %3982 = vst [vmem:[%s6971_s27 + $0x1d0] sm:$0xff] (%p5703_p4), %v3981_v45  ;;  %3984 = vst [vmem:[%s6971_s27 + $0x1e0] sm:$0xff] (%p5703_p4), %v3983_v46  ;;  %v4011_v60 = vld [vmem:[%s6542_s30 + $0x160] sm:$0xff] (%p5703_p4)  ;;  %v4013_v61 = vld [vmem:[%s6542_s30 + $0x168] sm:$0xff] (%p5703_p4) }
 0x4b9   : > { %3370 = vst [vmem:[%s6542_s30 + $0x348] sm:$0xff] %v3162_v2  ;;  %v2554_v5 = vadd.f32 %v6795_v24, %v5269_v4  ;;  %v2548_v6 = vpop.f32.mrb[123].mxu0  ;;  %3986 = vst [vmem:[%s6971_s27 + $0x1f0] sm:$0xff] (%p5703_p4), %v3985_v47  ;;  %v4015_v62 = vld [vmem:[%s6542_s30 + $0x170] sm:$0xff] (%p5703_p4)  ;;  %v4017_v63 = vld [vmem:[%s6542_s30 + $0x178] sm:$0xff] (%p5703_p4) }
 0x4ba   : > { %3369 = vst [vmem:[%s6542_s30 + $0x340] sm:$0xff] %v3161_v3  ;;  %v2549_v7 = vadd.f32 %v6795_v24, %v2548_v6  ;;  %3988 = vst [vmem:[%s6971_s27 + $0x200] sm:$0xff] (%p5703_p4), %v3987_v48  ;;  %v4019_v0 = vld [vmem:[%s6542_s30 + $0x180] sm:$0xff] (%p5703_p4)  ;;  %v4021_v1 = vld [vmem:[%s6542_s30 + $0x188] sm:$0xff] (%p5703_p4) }
 0x4bb   : > { %v3164_v8 = vmax.f32 %v2554_v5, 0.0  ;;  %3990 = vst [vmem:[%s6971_s27 + $0x210] sm:$0xff] (%p5703_p4), %v3989_v49  ;;  %3992 = vst [vmem:[%s6971_s27 + $0x220] sm:$0xff] (%p5703_p4), %v3991_v50  ;;  %v4023_v2 = vld [vmem:[%s6542_s30 + $0x190] sm:$0xff] (%p5703_p4)  ;;  %v4025_v3 = vld [vmem:[%s6542_s30 + $0x198] sm:$0xff] (%p5703_p4) }
 0x4bc   : > { %v3163_v9 = vmax.f32 %v2549_v7, 0.0  ;;  %v5272_v10 = vpop.f32.mrb[124].mxu0  ;;  %3479 = sbr.rel (!%p5703_p4) target bundleno = 1301 (0x515), region = 60  ;;  %3994 = vst [vmem:[%s6971_s27 + $0x230] sm:$0xff] (%p5703_p4), %v3993_v51  ;;  %3996 = vst [vmem:[%s6971_s27 + $0x240] sm:$0xff] (%p5703_p4), %v3995_v52  ;;  %v4027_v4 = vld [vmem:[%s6542_s30 + $0x1a0] sm:$0xff] (%p5703_p4) }
 0x4bd   : > { %3372 = vst [vmem:[%s6542_s30 + $0x358] sm:$0xff] %v3164_v8  ;;  %v2564_v11 = vadd.f32 %v6795_v24, %v5272_v10  ;;  %v2558_v12 = vpop.f32.mrb[125].mxu0  ;;  %3998 = vst [vmem:[%s6971_s27 + $0x250] sm:$0xff] (%p5703_p4), %v3997_v53  ;;  %v4029_v5 = vld [vmem:[%s6542_s30 + $0x1a8] sm:$0xff] (%p5703_p4)  ;;  %v4031_v6 = vld [vmem:[%s6542_s30 + $0x1b0] sm:$0xff] (%p5703_p4) }
 0x4be   : > { %3371 = vst [vmem:[%s6542_s30 + $0x350] sm:$0xff] %v3163_v9  ;;  %v2559_v13 = vadd.f32 %v6795_v24, %v2558_v12  ;;  %v3925_v24 = vld [vmem:[%s6542_s30 + $0x8] sm:$0xff] (%p5703_p4)  ;;  %4000 = vst [vmem:[%s6971_s27 + $0x260] sm:$0xff] (%p5703_p4), %v3999_v54  ;;  %v4033_v7 = vld [vmem:[%s6542_s30 + $0x1b8] sm:$0xff] (%p5703_p4) }
 0x4bf   : > { %v3166_v14 = vmax.f32 %v2564_v11, 0.0  ;;  %3926 = vst [vmem:[%s6971_s27 + $0x10] sm:$0xff] (%p5703_p4), %v3925_v24  ;;  %4002 = vst [vmem:[%s6971_s27 + $0x270] sm:$0xff] (%p5703_p4), %v4001_v55  ;;  %v4035_v8 = vld [vmem:[%s6542_s30 + $0x1c0] sm:$0xff] (%p5703_p4)  ;;  %v4037_v9 = vld [vmem:[%s6542_s30 + $0x1c8] sm:$0xff] (%p5703_p4) }
 0x4c0   : > { %v3165_v15 = vmax.f32 %v2559_v13, 0.0  ;;  %4004 = vst [vmem:[%s6971_s27 + $0x280] sm:$0xff] (%p5703_p4), %v4003_v56  ;;  %4006 = vst [vmem:[%s6971_s27 + $0x290] sm:$0xff] (%p5703_p4), %v4005_v57  ;;  %v4039_v10 = vld [vmem:[%s6542_s30 + $0x1d0] sm:$0xff] (%p5703_p4)  ;;  %v4041_v11 = vld [vmem:[%s6542_s30 + $0x1d8] sm:$0xff] (%p5703_p4) }
 0x4c1   : > { %3374 = vst [vmem:[%s6542_s30 + $0x368] sm:$0xff] %v3166_v14  ;;  %4008 = vst [vmem:[%s6971_s27 + $0x2a0] sm:$0xff] (%p5703_p4), %v4007_v58  ;;  %v4043_v12 = vld [vmem:[%s6542_s30 + $0x1e0] sm:$0xff] (%p5703_p4)  ;;  %v4045_v13 = vld [vmem:[%s6542_s30 + $0x1e8] sm:$0xff] (%p5703_p4) }
 0x4c2   : > { %3373 = vst [vmem:[%s6542_s30 + $0x360] sm:$0xff] %v3165_v15  ;;  %4010 = vst [vmem:[%s6971_s27 + $0x2b0] sm:$0xff] (%p5703_p4), %v4009_v59  ;;  %v4047_v14 = vld [vmem:[%s6542_s30 + $0x1f0] sm:$0xff] (%p5703_p4)  ;;  %v4049_v15 = vld [vmem:[%s6542_s30 + $0x1f8] sm:$0xff] (%p5703_p4) }
 0x4c3   : > { %4012 = vst [vmem:[%s6971_s27 + $0x2c0] sm:$0xff] %v4011_v60  ;;  %4014 = vst [vmem:[%s6971_s27 + $0x2d0] sm:$0xff] %v4013_v61  ;;  %v4051_v16 = vld [vmem:[%s6542_s30 + $0x200] sm:$0xff]  ;;  %v4053_v24 = vld [vmem:[%s6542_s30 + $0x208] sm:$0xff] }
 0x4c4   : > { %4016 = vst [vmem:[%s6971_s27 + $0x2e0] sm:$0xff] %v4015_v62  ;;  %4018 = vst [vmem:[%s6971_s27 + $0x2f0] sm:$0xff] %v4017_v63  ;;  %v4055_v17 = vld [vmem:[%s6542_s30 + $0x210] sm:$0xff]  ;;  %v4057_v18 = vld [vmem:[%s6542_s30 + $0x218] sm:$0xff] }
 0x4c5   : > { %4020 = vst [vmem:[%s6971_s27 + $0x300] sm:$0xff] %v4019_v0  ;;  %4022 = vst [vmem:[%s6971_s27 + $0x310] sm:$0xff] %v4021_v1  ;;  %v4059_v20 = vld [vmem:[%s6542_s30 + $0x220] sm:$0xff]  ;;  %v4061_v21 = vld [vmem:[%s6542_s30 + $0x228] sm:$0xff] }
 0x4c6   : > { %4024 = vst [vmem:[%s6971_s27 + $0x320] sm:$0xff] %v4023_v2  ;;  %4026 = vst [vmem:[%s6971_s27 + $0x330] sm:$0xff] %v4025_v3  ;;  %v4063_v22 = vld [vmem:[%s6542_s30 + $0x230] sm:$0xff]  ;;  %v4065_v23 = vld [vmem:[%s6542_s30 + $0x238] sm:$0xff] }
 0x4c7   : > { %4028 = vst [vmem:[%s6971_s27 + $0x340] sm:$0xff] %v4027_v4  ;;  %4030 = vst [vmem:[%s6971_s27 + $0x350] sm:$0xff] %v4029_v5  ;;  %v4067_v25 = vld [vmem:[%s6542_s30 + $0x240] sm:$0xff]  ;;  %v4069_v26 = vld [vmem:[%s6542_s30 + $0x248] sm:$0xff] }
 0x4c8   : > { %4032 = vst [vmem:[%s6971_s27 + $0x360] sm:$0xff] %v4031_v6  ;;  %4034 = vst [vmem:[%s6971_s27 + $0x370] sm:$0xff] %v4033_v7  ;;  %v4071_v27 = vld [vmem:[%s6542_s30 + $0x250] sm:$0xff]  ;;  %v4073_v28 = vld [vmem:[%s6542_s30 + $0x258] sm:$0xff] }
 0x4c9   : > { %4036 = vst [vmem:[%s6971_s27 + $0x380] sm:$0xff] %v4035_v8  ;;  %4038 = vst [vmem:[%s6971_s27 + $0x390] sm:$0xff] %v4037_v9  ;;  %v4075_v29 = vld [vmem:[%s6542_s30 + $0x260] sm:$0xff]  ;;  %v4077_v30 = vld [vmem:[%s6542_s30 + $0x268] sm:$0xff] }
 0x4ca   : > { %4040 = vst [vmem:[%s6971_s27 + $0x3a0] sm:$0xff] %v4039_v10  ;;  %4042 = vst [vmem:[%s6971_s27 + $0x3b0] sm:$0xff] %v4041_v11  ;;  %v4079_v31 = vld [vmem:[%s6542_s30 + $0x270] sm:$0xff]  ;;  %v4081_v19 = vld [vmem:[%s6542_s30 + $0x278] sm:$0xff] }
 0x4cb   : > { %4044 = vst [vmem:[%s6971_s27 + $0x3c0] sm:$0xff] %v4043_v12  ;;  %4046 = vst [vmem:[%s6971_s27 + $0x3d0] sm:$0xff] %v4045_v13  ;;  %v4083_v32 = vld [vmem:[%s6542_s30 + $0x280] sm:$0xff]  ;;  %v4085_v33 = vld [vmem:[%s6542_s30 + $0x288] sm:$0xff] }
 0x4cc   : > { %4048 = vst [vmem:[%s6971_s27 + $0x3e0] sm:$0xff] %v4047_v14  ;;  %4050 = vst [vmem:[%s6971_s27 + $0x3f0] sm:$0xff] %v4049_v15  ;;  %v4087_v34 = vld [vmem:[%s6542_s30 + $0x290] sm:$0xff]  ;;  %v4089_v35 = vld [vmem:[%s6542_s30 + $0x298] sm:$0xff] }
 0x4cd   : > { %4052 = vst [vmem:[%s6971_s27 + $0x400] sm:$0xff] %v4051_v16  ;;  %4054 = vst [vmem:[%s6971_s27 + $0x410] sm:$0xff] %v4053_v24  ;;  %v4091_v36 = vld [vmem:[%s6542_s30 + $0x2a0] sm:$0xff]  ;;  %v4093_v37 = vld [vmem:[%s6542_s30 + $0x2a8] sm:$0xff] }
 0x4ce   : > { %4056 = vst [vmem:[%s6971_s27 + $0x420] sm:$0xff] %v4055_v17  ;;  %4058 = vst [vmem:[%s6971_s27 + $0x430] sm:$0xff] %v4057_v18  ;;  %v4095_v38 = vld [vmem:[%s6542_s30 + $0x2b0] sm:$0xff]  ;;  %v4097_v39 = vld [vmem:[%s6542_s30 + $0x2b8] sm:$0xff] }
 0x4cf   : > { %4060 = vst [vmem:[%s6971_s27 + $0x440] sm:$0xff] %v4059_v20  ;;  %4062 = vst [vmem:[%s6971_s27 + $0x450] sm:$0xff] %v4061_v21  ;;  %v4099_v40 = vld [vmem:[%s6542_s30 + $0x2c0] sm:$0xff]  ;;  %v4101_v41 = vld [vmem:[%s6542_s30 + $0x2c8] sm:$0xff] }
 0x4d0   : > { %4064 = vst [vmem:[%s6971_s27 + $0x460] sm:$0xff] %v4063_v22  ;;  %4066 = vst [vmem:[%s6971_s27 + $0x470] sm:$0xff] %v4065_v23  ;;  %v4103_v42 = vld [vmem:[%s6542_s30 + $0x2d0] sm:$0xff]  ;;  %v4105_v43 = vld [vmem:[%s6542_s30 + $0x2d8] sm:$0xff] }
 0x4d1   : > { %4068 = vst [vmem:[%s6971_s27 + $0x480] sm:$0xff] %v4067_v25  ;;  %4070 = vst [vmem:[%s6971_s27 + $0x490] sm:$0xff] %v4069_v26  ;;  %v4107_v44 = vld [vmem:[%s6542_s30 + $0x2e0] sm:$0xff]  ;;  %v4109_v45 = vld [vmem:[%s6542_s30 + $0x2e8] sm:$0xff] }
 0x4d2   : > { %4072 = vst [vmem:[%s6971_s27 + $0x4a0] sm:$0xff] %v4071_v27  ;;  %4074 = vst [vmem:[%s6971_s27 + $0x4b0] sm:$0xff] %v4073_v28  ;;  %v4111_v46 = vld [vmem:[%s6542_s30 + $0x2f0] sm:$0xff]  ;;  %v4113_v47 = vld [vmem:[%s6542_s30 + $0x2f8] sm:$0xff] }
 0x4d3   : > { %4076 = vst [vmem:[%s6971_s27 + $0x4c0] sm:$0xff] %v4075_v29  ;;  %4078 = vst [vmem:[%s6971_s27 + $0x4d0] sm:$0xff] %v4077_v30  ;;  %v4115_v48 = vld [vmem:[%s6542_s30 + $0x300] sm:$0xff]  ;;  %v4117_v49 = vld [vmem:[%s6542_s30 + $0x308] sm:$0xff] }
 0x4d4   : > { %4080 = vst [vmem:[%s6971_s27 + $0x4e0] sm:$0xff] %v4079_v31  ;;  %4082 = vst [vmem:[%s6971_s27 + $0x4f0] sm:$0xff] %v4081_v19  ;;  %v4119_v50 = vld [vmem:[%s6542_s30 + $0x310] sm:$0xff]  ;;  %v4121_v51 = vld [vmem:[%s6542_s30 + $0x318] sm:$0xff] }
 0x4d5   : > { %4084 = vst [vmem:[%s6971_s27 + $0x500] sm:$0xff] %v4083_v32  ;;  %4086 = vst [vmem:[%s6971_s27 + $0x510] sm:$0xff] %v4085_v33  ;;  %v4123_v52 = vld [vmem:[%s6542_s30 + $0x320] sm:$0xff]  ;;  %v4125_v53 = vld [vmem:[%s6542_s30 + $0x328] sm:$0xff] }
 0x4d6   : > { %4088 = vst [vmem:[%s6971_s27 + $0x520] sm:$0xff] %v4087_v34  ;;  %4090 = vst [vmem:[%s6971_s27 + $0x530] sm:$0xff] %v4089_v35  ;;  %v4127_v54 = vld [vmem:[%s6542_s30 + $0x330] sm:$0xff]  ;;  %v4129_v55 = vld [vmem:[%s6542_s30 + $0x338] sm:$0xff] }
 0x4d7   : > { %4092 = vst [vmem:[%s6971_s27 + $0x540] sm:$0xff] %v4091_v36  ;;  %4094 = vst [vmem:[%s6971_s27 + $0x550] sm:$0xff] %v4093_v37  ;;  %v4131_v56 = vld [vmem:[%s6542_s30 + $0x340] sm:$0xff]  ;;  %v4133_v57 = vld [vmem:[%s6542_s30 + $0x348] sm:$0xff] }
 0x4d8   : > { %4096 = vst [vmem:[%s6971_s27 + $0x560] sm:$0xff] %v4095_v38  ;;  %4098 = vst [vmem:[%s6971_s27 + $0x570] sm:$0xff] %v4097_v39  ;;  %v4135_v58 = vld [vmem:[%s6542_s30 + $0x350] sm:$0xff]  ;;  %v4137_v59 = vld [vmem:[%s6542_s30 + $0x358] sm:$0xff] }
 0x4d9   : > { %4100 = vst [vmem:[%s6971_s27 + $0x580] sm:$0xff] %v4099_v40  ;;  %4102 = vst [vmem:[%s6971_s27 + $0x590] sm:$0xff] %v4101_v41  ;;  %v4139_v60 = vld [vmem:[%s6542_s30 + $0x360] sm:$0xff]  ;;  %v4141_v61 = vld [vmem:[%s6542_s30 + $0x368] sm:$0xff] }
 0x4da   : > { %4104 = vst [vmem:[%s6971_s27 + $0x5a0] sm:$0xff] %v4103_v42  ;;  %4106 = vst [vmem:[%s6971_s27 + $0x5b0] sm:$0xff] %v4105_v43  ;;  %v4143_v62 = vld [vmem:[%s6542_s30 + $0x370] sm:$0xff]  ;;  %v4145_v63 = vld [vmem:[%s6542_s30 + $0x378] sm:$0xff] }
 0x4db   : > { %4108 = vst [vmem:[%s6971_s27 + $0x5c0] sm:$0xff] %v4107_v44  ;;  %4110 = vst [vmem:[%s6971_s27 + $0x5d0] sm:$0xff] %v4109_v45  ;;  %v4147_v0 = vld [vmem:[%s6542_s30 + $0x380] sm:$0xff]  ;;  %v4149_v1 = vld [vmem:[%s6542_s30 + $0x388] sm:$0xff] }
 0x4dc   : > { %4112 = vst [vmem:[%s6971_s27 + $0x5e0] sm:$0xff] %v4111_v46  ;;  %4114 = vst [vmem:[%s6971_s27 + $0x5f0] sm:$0xff] %v4113_v47  ;;  %v4151_v2 = vld [vmem:[%s6542_s30 + $0x390] sm:$0xff]  ;;  %v4153_v3 = vld [vmem:[%s6542_s30 + $0x398] sm:$0xff] }
 0x4dd   : > { %4116 = vst [vmem:[%s6971_s27 + $0x600] sm:$0xff] %v4115_v48  ;;  %4118 = vst [vmem:[%s6971_s27 + $0x610] sm:$0xff] %v4117_v49  ;;  %v4155_v4 = vld [vmem:[%s6542_s30 + $0x3a0] sm:$0xff]  ;;  %v4157_v5 = vld [vmem:[%s6542_s30 + $0x3a8] sm:$0xff] }
 0x4de   : > { %4120 = vst [vmem:[%s6971_s27 + $0x620] sm:$0xff] %v4119_v50  ;;  %4122 = vst [vmem:[%s6971_s27 + $0x630] sm:$0xff] %v4121_v51  ;;  %v4159_v6 = vld [vmem:[%s6542_s30 + $0x3b0] sm:$0xff]  ;;  %v4161_v7 = vld [vmem:[%s6542_s30 + $0x3b8] sm:$0xff] }
 0x4df   : > { %4124 = vst [vmem:[%s6971_s27 + $0x640] sm:$0xff] %v4123_v52  ;;  %4126 = vst [vmem:[%s6971_s27 + $0x650] sm:$0xff] %v4125_v53  ;;  %v4163_v8 = vld [vmem:[%s6542_s30 + $0x3c0] sm:$0xff]  ;;  %v4165_v9 = vld [vmem:[%s6542_s30 + $0x3c8] sm:$0xff] }
 0x4e0   : > { %4128 = vst [vmem:[%s6971_s27 + $0x660] sm:$0xff] %v4127_v54  ;;  %4130 = vst [vmem:[%s6971_s27 + $0x670] sm:$0xff] %v4129_v55  ;;  %v4167_v10 = vld [vmem:[%s6542_s30 + $0x3d0] sm:$0xff]  ;;  %v4169_v11 = vld [vmem:[%s6542_s30 + $0x3d8] sm:$0xff] }
 0x4e1   : > { %4132 = vst [vmem:[%s6971_s27 + $0x680] sm:$0xff] %v4131_v56  ;;  %4134 = vst [vmem:[%s6971_s27 + $0x690] sm:$0xff] %v4133_v57  ;;  %v4171_v12 = vld [vmem:[%s6542_s30 + $0x3e0] sm:$0xff]  ;;  %v4173_v13 = vld [vmem:[%s6542_s30 + $0x3e8] sm:$0xff] }
 0x4e2   : > { %4136 = vst [vmem:[%s6971_s27 + $0x6a0] sm:$0xff] %v4135_v58  ;;  %4138 = vst [vmem:[%s6971_s27 + $0x6b0] sm:$0xff] %v4137_v59  ;;  %v4175_v14 = vld [vmem:[%s6542_s30 + $0x3f0] sm:$0xff]  ;;  %v4177_v15 = vld [vmem:[%s6542_s30 + $0x3f8] sm:$0xff] }
 0x4e3   : > { %4140 = vst [vmem:[%s6971_s27 + $0x6c0] sm:$0xff] %v4139_v60  ;;  %4142 = vst [vmem:[%s6971_s27 + $0x6d0] sm:$0xff] %v4141_v61  ;;  %v4179_v16 = vld [vmem:[%s6542_s30 + $0x400] sm:$0xff]  ;;  %v4181_v24 = vld [vmem:[%s6542_s30 + $0x408] sm:$0xff] }
 0x4e4   : > { %4144 = vst [vmem:[%s6971_s27 + $0x6e0] sm:$0xff] %v4143_v62  ;;  %4146 = vst [vmem:[%s6971_s27 + $0x6f0] sm:$0xff] %v4145_v63  ;;  %v4183_v17 = vld [vmem:[%s6542_s30 + $0x410] sm:$0xff]  ;;  %v4185_v18 = vld [vmem:[%s6542_s30 + $0x418] sm:$0xff] }
 0x4e5   : > { %4148 = vst [vmem:[%s6971_s27 + $0x700] sm:$0xff] %v4147_v0  ;;  %4150 = vst [vmem:[%s6971_s27 + $0x710] sm:$0xff] %v4149_v1  ;;  %v4187_v20 = vld [vmem:[%s6542_s30 + $0x420] sm:$0xff]  ;;  %v4189_v21 = vld [vmem:[%s6542_s30 + $0x428] sm:$0xff] }
 0x4e6   : > { %4152 = vst [vmem:[%s6971_s27 + $0x720] sm:$0xff] %v4151_v2  ;;  %4154 = vst [vmem:[%s6971_s27 + $0x730] sm:$0xff] %v4153_v3  ;;  %v4191_v22 = vld [vmem:[%s6542_s30 + $0x430] sm:$0xff]  ;;  %v4193_v23 = vld [vmem:[%s6542_s30 + $0x438] sm:$0xff] }
 0x4e7   : > { %4156 = vst [vmem:[%s6971_s27 + $0x740] sm:$0xff] %v4155_v4  ;;  %4158 = vst [vmem:[%s6971_s27 + $0x750] sm:$0xff] %v4157_v5  ;;  %v4195_v25 = vld [vmem:[%s6542_s30 + $0x440] sm:$0xff]  ;;  %v4197_v26 = vld [vmem:[%s6542_s30 + $0x448] sm:$0xff] }
 0x4e8   : > { %4160 = vst [vmem:[%s6971_s27 + $0x760] sm:$0xff] %v4159_v6  ;;  %4162 = vst [vmem:[%s6971_s27 + $0x770] sm:$0xff] %v4161_v7  ;;  %v4199_v27 = vld [vmem:[%s6542_s30 + $0x450] sm:$0xff]  ;;  %v4201_v28 = vld [vmem:[%s6542_s30 + $0x458] sm:$0xff] }
 0x4e9   : > { %4164 = vst [vmem:[%s6971_s27 + $0x780] sm:$0xff] %v4163_v8  ;;  %4166 = vst [vmem:[%s6971_s27 + $0x790] sm:$0xff] %v4165_v9  ;;  %v4203_v29 = vld [vmem:[%s6542_s30 + $0x460] sm:$0xff]  ;;  %v4205_v30 = vld [vmem:[%s6542_s30 + $0x468] sm:$0xff] }
 0x4ea   : > { %4168 = vst [vmem:[%s6971_s27 + $0x7a0] sm:$0xff] %v4167_v10  ;;  %4170 = vst [vmem:[%s6971_s27 + $0x7b0] sm:$0xff] %v4169_v11  ;;  %v4207_v31 = vld [vmem:[%s6542_s30 + $0x470] sm:$0xff]  ;;  %v4209_v19 = vld [vmem:[%s6542_s30 + $0x478] sm:$0xff] }
 0x4eb   : > { %4172 = vst [vmem:[%s6971_s27 + $0x7c0] sm:$0xff] %v4171_v12  ;;  %4174 = vst [vmem:[%s6971_s27 + $0x7d0] sm:$0xff] %v4173_v13  ;;  %v4211_v32 = vld [vmem:[%s6542_s30 + $0x480] sm:$0xff]  ;;  %v4213_v33 = vld [vmem:[%s6542_s30 + $0x488] sm:$0xff] }
 0x4ec   : > { %4176 = vst [vmem:[%s6971_s27 + $0x7e0] sm:$0xff] %v4175_v14  ;;  %4178 = vst [vmem:[%s6971_s27 + $0x7f0] sm:$0xff] %v4177_v15  ;;  %v4215_v34 = vld [vmem:[%s6542_s30 + $0x490] sm:$0xff]  ;;  %v4217_v35 = vld [vmem:[%s6542_s30 + $0x498] sm:$0xff] }
 0x4ed   : > { %4180 = vst [vmem:[%s6971_s27 + $0x800] sm:$0xff] %v4179_v16  ;;  %4182 = vst [vmem:[%s6971_s27 + $0x810] sm:$0xff] %v4181_v24  ;;  %v4219_v36 = vld [vmem:[%s6542_s30 + $0x4a0] sm:$0xff]  ;;  %v4221_v37 = vld [vmem:[%s6542_s30 + $0x4a8] sm:$0xff] }
 0x4ee   : > { %4184 = vst [vmem:[%s6971_s27 + $0x820] sm:$0xff] %v4183_v17  ;;  %4186 = vst [vmem:[%s6971_s27 + $0x830] sm:$0xff] %v4185_v18  ;;  %v4223_v38 = vld [vmem:[%s6542_s30 + $0x4b0] sm:$0xff]  ;;  %v4225_v39 = vld [vmem:[%s6542_s30 + $0x4b8] sm:$0xff] }
 0x4ef   : > { %4188 = vst [vmem:[%s6971_s27 + $0x840] sm:$0xff] %v4187_v20  ;;  %4190 = vst [vmem:[%s6971_s27 + $0x850] sm:$0xff] %v4189_v21  ;;  %v4227_v40 = vld [vmem:[%s6542_s30 + $0x4c0] sm:$0xff]  ;;  %v4229_v41 = vld [vmem:[%s6542_s30 + $0x4c8] sm:$0xff] }
 0x4f0   : > { %4192 = vst [vmem:[%s6971_s27 + $0x860] sm:$0xff] %v4191_v22  ;;  %4194 = vst [vmem:[%s6971_s27 + $0x870] sm:$0xff] %v4193_v23  ;;  %v4231_v42 = vld [vmem:[%s6542_s30 + $0x4d0] sm:$0xff]  ;;  %v4233_v43 = vld [vmem:[%s6542_s30 + $0x4d8] sm:$0xff] }
 0x4f1   : > { %4196 = vst [vmem:[%s6971_s27 + $0x880] sm:$0xff] %v4195_v25  ;;  %4198 = vst [vmem:[%s6971_s27 + $0x890] sm:$0xff] %v4197_v26  ;;  %v4235_v44 = vld [vmem:[%s6542_s30 + $0x4e0] sm:$0xff]  ;;  %v4237_v45 = vld [vmem:[%s6542_s30 + $0x4e8] sm:$0xff] }
 0x4f2   : > { %4200 = vst [vmem:[%s6971_s27 + $0x8a0] sm:$0xff] %v4199_v27  ;;  %4202 = vst [vmem:[%s6971_s27 + $0x8b0] sm:$0xff] %v4201_v28  ;;  %v4239_v46 = vld [vmem:[%s6542_s30 + $0x4f0] sm:$0xff]  ;;  %v4241_v47 = vld [vmem:[%s6542_s30 + $0x4f8] sm:$0xff] }
 0x4f3   : > { %4204 = vst [vmem:[%s6971_s27 + $0x8c0] sm:$0xff] %v4203_v29  ;;  %4206 = vst [vmem:[%s6971_s27 + $0x8d0] sm:$0xff] %v4205_v30  ;;  %v4243_v48 = vld [vmem:[%s6542_s30 + $0x500] sm:$0xff]  ;;  %v4245_v49 = vld [vmem:[%s6542_s30 + $0x508] sm:$0xff] }
 0x4f4   : > { %4208 = vst [vmem:[%s6971_s27 + $0x8e0] sm:$0xff] %v4207_v31  ;;  %4210 = vst [vmem:[%s6971_s27 + $0x8f0] sm:$0xff] %v4209_v19  ;;  %v4247_v50 = vld [vmem:[%s6542_s30 + $0x510] sm:$0xff]  ;;  %v4249_v51 = vld [vmem:[%s6542_s30 + $0x518] sm:$0xff] }
 0x4f5   : > { %4212 = vst [vmem:[%s6971_s27 + $0x900] sm:$0xff] %v4211_v32  ;;  %4214 = vst [vmem:[%s6971_s27 + $0x910] sm:$0xff] %v4213_v33  ;;  %v4251_v52 = vld [vmem:[%s6542_s30 + $0x520] sm:$0xff]  ;;  %v4253_v53 = vld [vmem:[%s6542_s30 + $0x528] sm:$0xff] }
 0x4f6   : > { %4216 = vst [vmem:[%s6971_s27 + $0x920] sm:$0xff] %v4215_v34  ;;  %4218 = vst [vmem:[%s6971_s27 + $0x930] sm:$0xff] %v4217_v35  ;;  %v4255_v54 = vld [vmem:[%s6542_s30 + $0x530] sm:$0xff]  ;;  %v4257_v55 = vld [vmem:[%s6542_s30 + $0x538] sm:$0xff] }
 0x4f7   : > { %4220 = vst [vmem:[%s6971_s27 + $0x940] sm:$0xff] %v4219_v36  ;;  %4222 = vst [vmem:[%s6971_s27 + $0x950] sm:$0xff] %v4221_v37  ;;  %v4259_v56 = vld [vmem:[%s6542_s30 + $0x540] sm:$0xff]  ;;  %v4261_v57 = vld [vmem:[%s6542_s30 + $0x548] sm:$0xff] }
 0x4f8   : > { %4224 = vst [vmem:[%s6971_s27 + $0x960] sm:$0xff] %v4223_v38  ;;  %4226 = vst [vmem:[%s6971_s27 + $0x970] sm:$0xff] %v4225_v39  ;;  %v4263_v58 = vld [vmem:[%s6542_s30 + $0x550] sm:$0xff]  ;;  %v4265_v59 = vld [vmem:[%s6542_s30 + $0x558] sm:$0xff] }
 0x4f9   : > { %4228 = vst [vmem:[%s6971_s27 + $0x980] sm:$0xff] %v4227_v40  ;;  %4230 = vst [vmem:[%s6971_s27 + $0x990] sm:$0xff] %v4229_v41  ;;  %v4267_v60 = vld [vmem:[%s6542_s30 + $0x560] sm:$0xff]  ;;  %v4269_v61 = vld [vmem:[%s6542_s30 + $0x568] sm:$0xff] }
 0x4fa   : > { %4232 = vst [vmem:[%s6971_s27 + $0x9a0] sm:$0xff] %v4231_v42  ;;  %4234 = vst [vmem:[%s6971_s27 + $0x9b0] sm:$0xff] %v4233_v43  ;;  %v4271_v62 = vld [vmem:[%s6542_s30 + $0x570] sm:$0xff]  ;;  %v4273_v63 = vld [vmem:[%s6542_s30 + $0x578] sm:$0xff] }
 0x4fb   : > { %4236 = vst [vmem:[%s6971_s27 + $0x9c0] sm:$0xff] %v4235_v44  ;;  %4238 = vst [vmem:[%s6971_s27 + $0x9d0] sm:$0xff] %v4237_v45  ;;  %v4275_v0 = vld [vmem:[%s6542_s30 + $0x580] sm:$0xff]  ;;  %v4277_v1 = vld [vmem:[%s6542_s30 + $0x588] sm:$0xff] }
 0x4fc   : > { %4240 = vst [vmem:[%s6971_s27 + $0x9e0] sm:$0xff] %v4239_v46  ;;  %4242 = vst [vmem:[%s6971_s27 + $0x9f0] sm:$0xff] %v4241_v47  ;;  %v4279_v2 = vld [vmem:[%s6542_s30 + $0x590] sm:$0xff]  ;;  %v4281_v3 = vld [vmem:[%s6542_s30 + $0x598] sm:$0xff] }
 0x4fd   : > { %4244 = vst [vmem:[%s6971_s27 + $0xa00] sm:$0xff] %v4243_v48  ;;  %4246 = vst [vmem:[%s6971_s27 + $0xa10] sm:$0xff] %v4245_v49  ;;  %v4283_v4 = vld [vmem:[%s6542_s30 + $0x5a0] sm:$0xff]  ;;  %v4285_v5 = vld [vmem:[%s6542_s30 + $0x5a8] sm:$0xff] }
 0x4fe   : > { %4248 = vst [vmem:[%s6971_s27 + $0xa20] sm:$0xff] %v4247_v50  ;;  %4250 = vst [vmem:[%s6971_s27 + $0xa30] sm:$0xff] %v4249_v51  ;;  %v4287_v6 = vld [vmem:[%s6542_s30 + $0x5b0] sm:$0xff]  ;;  %v4289_v7 = vld [vmem:[%s6542_s30 + $0x5b8] sm:$0xff] }
 0x4ff   : > { %4252 = vst [vmem:[%s6971_s27 + $0xa40] sm:$0xff] %v4251_v52  ;;  %4254 = vst [vmem:[%s6971_s27 + $0xa50] sm:$0xff] %v4253_v53  ;;  %v4291_v8 = vld [vmem:[%s6542_s30 + $0x5c0] sm:$0xff]  ;;  %v4293_v9 = vld [vmem:[%s6542_s30 + $0x5c8] sm:$0xff] }
 0x500   : > { %4256 = vst [vmem:[%s6971_s27 + $0xa60] sm:$0xff] %v4255_v54  ;;  %4258 = vst [vmem:[%s6971_s27 + $0xa70] sm:$0xff] %v4257_v55  ;;  %v4295_v10 = vld [vmem:[%s6542_s30 + $0x5d0] sm:$0xff]  ;;  %v4297_v11 = vld [vmem:[%s6542_s30 + $0x5d8] sm:$0xff] }
 0x501   : > { %4260 = vst [vmem:[%s6971_s27 + $0xa80] sm:$0xff] %v4259_v56  ;;  %4262 = vst [vmem:[%s6971_s27 + $0xa90] sm:$0xff] %v4261_v57  ;;  %v4299_v12 = vld [vmem:[%s6542_s30 + $0x5e0] sm:$0xff]  ;;  %v4301_v13 = vld [vmem:[%s6542_s30 + $0x5e8] sm:$0xff] }
 0x502   : > { %4264 = vst [vmem:[%s6971_s27 + $0xaa0] sm:$0xff] %v4263_v58  ;;  %4266 = vst [vmem:[%s6971_s27 + $0xab0] sm:$0xff] %v4265_v59  ;;  %v4303_v14 = vld [vmem:[%s6542_s30 + $0x5f0] sm:$0xff]  ;;  %v4305_v15 = vld [vmem:[%s6542_s30 + $0x5f8] sm:$0xff] }
 0x503   : > { %4268 = vst [vmem:[%s6971_s27 + $0xac0] sm:$0xff] %v4267_v60  ;;  %4270 = vst [vmem:[%s6971_s27 + $0xad0] sm:$0xff] %v4269_v61  ;;  %v4307_v16 = vld [vmem:[%s6542_s30 + $0x600] sm:$0xff]  ;;  %v4309_v24 = vld [vmem:[%s6542_s30 + $0x608] sm:$0xff] }
 0x504   : > { %4272 = vst [vmem:[%s6971_s27 + $0xae0] sm:$0xff] %v4271_v62  ;;  %4274 = vst [vmem:[%s6971_s27 + $0xaf0] sm:$0xff] %v4273_v63  ;;  %v4311_v17 = vld [vmem:[%s6542_s30 + $0x610] sm:$0xff]  ;;  %v4313_v18 = vld [vmem:[%s6542_s30 + $0x618] sm:$0xff] }
 0x505   : > { %4276 = vst [vmem:[%s6971_s27 + $0xb00] sm:$0xff] %v4275_v0  ;;  %4278 = vst [vmem:[%s6971_s27 + $0xb10] sm:$0xff] %v4277_v1  ;;  %v4315_v20 = vld [vmem:[%s6542_s30 + $0x620] sm:$0xff]  ;;  %v4317_v21 = vld [vmem:[%s6542_s30 + $0x628] sm:$0xff] }
 0x506   : > { %4280 = vst [vmem:[%s6971_s27 + $0xb20] sm:$0xff] %v4279_v2  ;;  %4282 = vst [vmem:[%s6971_s27 + $0xb30] sm:$0xff] %v4281_v3  ;;  %v4319_v22 = vld [vmem:[%s6542_s30 + $0x630] sm:$0xff]  ;;  %v4321_v23 = vld [vmem:[%s6542_s30 + $0x638] sm:$0xff] }
 0x507   : > { %4284 = vst [vmem:[%s6971_s27 + $0xb40] sm:$0xff] %v4283_v4  ;;  %4286 = vst [vmem:[%s6971_s27 + $0xb50] sm:$0xff] %v4285_v5  ;;  %v4323_v25 = vld [vmem:[%s6542_s30 + $0x640] sm:$0xff]  ;;  %v4325_v26 = vld [vmem:[%s6542_s30 + $0x648] sm:$0xff] }
 0x508   : > { %4288 = vst [vmem:[%s6971_s27 + $0xb60] sm:$0xff] %v4287_v6  ;;  %4290 = vst [vmem:[%s6971_s27 + $0xb70] sm:$0xff] %v4289_v7  ;;  %v4327_v27 = vld [vmem:[%s6542_s30 + $0x650] sm:$0xff]  ;;  %v4329_v28 = vld [vmem:[%s6542_s30 + $0x658] sm:$0xff] }
 0x509   : > { %4292 = vst [vmem:[%s6971_s27 + $0xb80] sm:$0xff] %v4291_v8  ;;  %4294 = vst [vmem:[%s6971_s27 + $0xb90] sm:$0xff] %v4293_v9  ;;  %v4331_v29 = vld [vmem:[%s6542_s30 + $0x660] sm:$0xff]  ;;  %v4333_v30 = vld [vmem:[%s6542_s30 + $0x668] sm:$0xff] }
 0x50a   : > { %4296 = vst [vmem:[%s6971_s27 + $0xba0] sm:$0xff] %v4295_v10  ;;  %4298 = vst [vmem:[%s6971_s27 + $0xbb0] sm:$0xff] %v4297_v11  ;;  %v4335_v31 = vld [vmem:[%s6542_s30 + $0x670] sm:$0xff]  ;;  %v4337_v19 = vld [vmem:[%s6542_s30 + $0x678] sm:$0xff] }
 0x50b   : > { %4300 = vst [vmem:[%s6971_s27 + $0xbc0] sm:$0xff] %v4299_v12  ;;  %4302 = vst [vmem:[%s6971_s27 + $0xbd0] sm:$0xff] %v4301_v13 }
 0x50c   : > { %4304 = vst [vmem:[%s6971_s27 + $0xbe0] sm:$0xff] %v4303_v14  ;;  %4306 = vst [vmem:[%s6971_s27 + $0xbf0] sm:$0xff] %v4305_v15 }
 0x50d   : > { %4308 = vst [vmem:[%s6971_s27 + $0xc00] sm:$0xff] %v4307_v16  ;;  %4310 = vst [vmem:[%s6971_s27 + $0xc10] sm:$0xff] %v4309_v24 }
 0x50e   : > { %4312 = vst [vmem:[%s6971_s27 + $0xc20] sm:$0xff] %v4311_v17  ;;  %4314 = vst [vmem:[%s6971_s27 + $0xc30] sm:$0xff] %v4313_v18 }
 0x50f   : > { %4316 = vst [vmem:[%s6971_s27 + $0xc40] sm:$0xff] %v4315_v20  ;;  %4318 = vst [vmem:[%s6971_s27 + $0xc50] sm:$0xff] %v4317_v21 }
 0x510   : > { %4320 = vst [vmem:[%s6971_s27 + $0xc60] sm:$0xff] %v4319_v22  ;;  %4322 = vst [vmem:[%s6971_s27 + $0xc70] sm:$0xff] %v4321_v23 }
 0x511   : > { %4324 = vst [vmem:[%s6971_s27 + $0xc80] sm:$0xff] %v4323_v25  ;;  %4326 = vst [vmem:[%s6971_s27 + $0xc90] sm:$0xff] %v4325_v26 }
 0x512   : > { %4328 = vst [vmem:[%s6971_s27 + $0xca0] sm:$0xff] %v4327_v27  ;;  %4330 = vst [vmem:[%s6971_s27 + $0xcb0] sm:$0xff] %v4329_v28 }
 0x513   : > { %4332 = vst [vmem:[%s6971_s27 + $0xcc0] sm:$0xff] %v4331_v29  ;;  %4334 = vst [vmem:[%s6971_s27 + $0xcd0] sm:$0xff] %v4333_v30 }
 0x514   : > { %4336 = vst [vmem:[%s6971_s27 + $0xce0] sm:$0xff] %v4335_v31  ;;  %4338 = vst [vmem:[%s6971_s27 + $0xcf0] sm:$0xff] %v4337_v19 }
 0x515 PF: > { %p16_p8 = scmp.ge.s32.totalorder %s5693_s13, 4   ;;  %s7407_s30 = smov %s5622_s10 }
 0x516   : > { %s7408_s10 = smov %s5701_s16  ;;  %s7409_s11 = smov %s5693_s13 }
 0x517   :  { %18 = sbr.rel (!%p16_p8) target bundleno = 2 (0x2), region = 133 }

</bundles_post_ra>
